<compile_context>
chip_gen: v7x
topology: tpu7x:2x2x1
jax: 0.10.0
libtpu: 0.0.40
codegen_flags: <defaults>
</compile_context>

<pallas_src>
import math

import jax
import jax.numpy as jnp
import numpy as np
from jax.experimental import pallas as pl
from jax.experimental.pallas import tpu as pltpu

SEQ = 23                  # sequence length / width of the front block
FEAT = 26                 # total features per timestep
SIDE_CH = 3               # side channels (last 3 features)
SIDE = SIDE_CH * SEQ      # 69 flattened side features
PAD = 128                 # lane padding for the unit_1/unit_2 slab
PAD2 = 2 * PAD            # lane padding for the unit_3/unit_4 slab
OFF12 = SEQ               # lane offset of unit_2 inside the 128-lane slab
OFF34 = PAD               # lane offset of unit_4 inside the 256-lane slab
NEG_SLOPE = 0.01          # LeakyReLU slope
MAX_TB = 32               # batches per grid step

LINEAR1 = [23, 20, 15, 15, 15, 10, 5, 1]
LINEAR2 = [23 * 4, 23 * 4, 23 * 3, 23 * 3, 23 * 3, 23 * 3, 23 * 2, 23 * 2, 23 * 1]
N1 = len(LINEAR1) - 1     # 7 layers in unit_1 / unit_2
N2 = len(LINEAR2) - 1     # 8 layers in unit_3 / unit_4


# ---------------------------------------------------------------------------
# Kernel
# ---------------------------------------------------------------------------
def _leaky_relu(h):
    return jnp.where(h > 0.0, h, NEG_SLOPE * h)


def _critic_kernel(aat_ref, side_ref, diag_ref, ssum_ref,
                   w12_ref, b12_ref, w34_ref, b34_ref, out_ref):
    rows = aat_ref.shape[0]              # tb * 23
    tb = out_ref.shape[0]                # batches in this block

    # --- fused unit_1 / unit_2 column MLPs (block-diagonal weights, 128 lanes)
    aat = aat_ref[...].astype(jnp.float32)                              # (rows, 46)
    h = jnp.concatenate(
        [aat, jnp.zeros((rows, PAD - 2 * SEQ), jnp.float32)], axis=1)   # (rows, 128)
    for k in range(N1):
        h = jnp.dot(h, w12_ref[k], preferred_element_type=jnp.float32) + b12_ref[k]
        h = _leaky_relu(h)

    # --- fold the per-row scalars (lane 0 -> unit_1, lane OFF12 -> unit_2)
    #     back into lane-dense (tb, 23) rows: scatter onto a tiled diagonal,
    #     then block-sum rows with a matmul (tiny constant 0/1 matrices).
    diag = diag_ref[...]                                                # (rows, 23)
    ssum = ssum_ref[...]                                                # (tb, rows)
    p1 = jnp.dot(ssum, diag * h[:, 0:1],
                 preferred_element_type=jnp.float32)                    # (tb, 23)
    p2 = jnp.dot(ssum, diag * h[:, OFF12:OFF12 + 1],
                 preferred_element_type=jnp.float32)                    # (tb, 23)

    # --- fused unit_3 / unit_4 heads (block-diagonal weights, 256 lanes)
    side = side_ref[...].astype(jnp.float32)                            # (tb, 69)
    gap = jnp.zeros((tb, OFF34 - SEQ - SIDE), jnp.float32)              # (tb, 36)
    g = jnp.concatenate([p1, side, gap, p2, side, gap], axis=1)         # (tb, 256)
    for k in range(N2):
        g = jnp.dot(g, w34_ref[k], preferred_element_type=jnp.float32) + b34_ref[k]
        g = _leaky_relu(g)

    # residual add of the two heads (unit_3 output at lanes 0:23, unit_4 at 128:151)
    out_ref[...] = (g[:, :SEQ] + g[:, OFF34:OFF34 + SEQ]).astype(out_ref.dtype)


# ---------------------------------------------------------------------------
# Parameters: deterministic PyTorch nn.Linear-style init, stored as (in, out).
# ---------------------------------------------------------------------------
def init_linear(key, fan_in, fan_out):
    kw, kb = jax.random.split(key)
    bound = 1.0 / math.sqrt(fan_in)
    w = jax.random.uniform(kw, (fan_in, fan_out), jnp.float32, -bound, bound)
    b = jax.random.uniform(kb, (1, fan_out), jnp.float32, -bound, bound)
    return w, b


def init_unit(key, dims):
    keys = jax.random.split(key, len(dims) - 1)
    return [init_linear(keys[i], dims[i], dims[i + 1]) for i in range(len(dims) - 1)]


def init_critic_params(key):
    k1, k2, k3, k4 = jax.random.split(key, 4)
    return {
        "unit_1": init_unit(k1, LINEAR1),
        "unit_2": init_unit(k2, LINEAR1),
        "unit_3": init_unit(k3, LINEAR2),
        "unit_4": init_unit(k4, LINEAR2),
    }


def _pack_pair(layers_a, layers_b, width, off):
    """Pack two same-shaped unit chains into block-diagonal (n, w, w) slabs."""
    n = len(layers_a)
    w_slab = np.zeros((n, width, width), np.float32)
    b_slab = np.zeros((n, 1, width), np.float32)
    for k, ((wa, ba), (wb, bb)) in enumerate(zip(layers_a, layers_b)):
        wa, ba, wb, bb = (np.asarray(t) for t in (wa, ba, wb, bb))
        w_slab[k, : wa.shape[0], : wa.shape[1]] = wa
        b_slab[k, :, : ba.shape[1]] = ba
        w_slab[k, off: off + wb.shape[0], off: off + wb.shape[1]] = wb
        b_slab[k, :, off: off + bb.shape[1]] = bb
    return jnp.asarray(w_slab), jnp.asarray(b_slab)


def pack_critic_params(params):
    w12, b12 = _pack_pair(params["unit_1"], params["unit_2"], PAD, OFF12)
    w34, b34 = _pack_pair(params["unit_3"], params["unit_4"], PAD2, OFF34)
    return {"w12": w12, "b12": b12, "w34": w34, "b34": b34}


# ---------------------------------------------------------------------------
# Forward pass: thin JAX wrapper + one fused pallas_call.
# ---------------------------------------------------------------------------
def critic_forward(x, packed):
    """x: (B, 23, 26) float32  ->  (B, 23) float32."""
    b, s, f = x.shape
    assert s == SEQ and f == FEAT, (s, f)

    tb = b if b <= MAX_TB else MAX_TB
    bp = ((b + tb - 1) // tb) * tb
    if bp != b:
        x = jnp.pad(x, ((0, bp - b), (0, 0), (0, 0)))

    # Lane-dense 2-D layouts for the kernel (see TODO(synk) at top of file).
    front = x[:, :, :SEQ]                                                  # (bp, 23, 23)
    aat = jnp.concatenate([front, jnp.transpose(front, (0, 2, 1))],
                          axis=-1).reshape(bp * SEQ, 2 * SEQ)              # (bp*23, 46)
    side = jnp.transpose(x[:, :, SEQ:], (0, 2, 1)).reshape(bp, SIDE)       # (bp, 69)

    # Constant fold matrices; depend only on the static block size.
    diag = jnp.asarray(
        np.kron(np.ones((tb, 1), np.float32), np.eye(SEQ, dtype=np.float32)))   # (tb*23, 23)
    ssum = jnp.asarray(
        np.kron(np.eye(tb, dtype=np.float32), np.ones((1, SEQ), np.float32)))   # (tb, tb*23)

    grid = (bp // tb,)
    out = pl.pallas_call(
        _critic_kernel,
        out_shape=jax.ShapeDtypeStruct((bp, SEQ), jnp.float32),
        grid=grid,
        in_specs=[
            pl.BlockSpec((tb * SEQ, 2 * SEQ), lambda i: (i, 0)),     # aat (rows + cols)
            pl.BlockSpec((tb, SIDE), lambda i: (i, 0)),              # side
            pl.BlockSpec((tb * SEQ, SEQ), lambda i: (0, 0)),         # diag (resident)
            pl.BlockSpec((tb, tb * SEQ), lambda i: (0, 0)),          # ssum (resident)
            pl.BlockSpec((N1, PAD, PAD), lambda i: (0, 0, 0)),       # w12 (resident)
            pl.BlockSpec((N1, 1, PAD), lambda i: (0, 0, 0)),         # b12
            pl.BlockSpec((N2, PAD2, PAD2), lambda i: (0, 0, 0)),     # w34 (resident)
            pl.BlockSpec((N2, 1, PAD2), lambda i: (0, 0, 0)),        # b34
        ],
        out_specs=pl.BlockSpec((tb, SEQ), lambda i: (i, 0)),
        compiler_params=pltpu.CompilerParams(
            dimension_semantics=("parallel",),
        ),
    )(aat, side, diag, ssum,
      packed["w12"], packed["b12"], packed["w34"], packed["b34"])

    return out[:b] if bp != b else out


# ---------------------------------------------------------------------------
# Pure-JAX reference (mirrors the PyTorch forward exactly) for a sanity check.
# ---------------------------------------------------------------------------
def _chain_ref(h, layers):
    for w, bias in layers:
        h = _leaky_relu(h @ w + bias)
    return h


def critic_reference(x, params):
    b = x.shape[0]
    side = jnp.transpose(x[:, :, -3:], (0, 2, 1)).reshape(b, SIDE)

    p1 = _chain_ref(x[:, :, :SEQ], params["unit_1"]).reshape(b, SEQ)
    h1 = _chain_ref(jnp.concatenate([p1, side], axis=1), params["unit_3"])

    p2 = _chain_ref(jnp.transpose(x[:, :, :SEQ], (0, 2, 1)), params["unit_2"]).reshape(b, SEQ)
    h2 = _chain_ref(jnp.concatenate([p2, side], axis=1), params["unit_4"])
    return h1 + h2


if __name__ == "__main__":
    key = jax.random.PRNGKey(0)
    k_params, k_x = jax.random.split(key)

    params = init_critic_params(k_params)
    packed = pack_critic_params(params)

    B = 2
    x = jax.random.normal(k_x, (B, SEQ, FEAT), dtype=jnp.float32)

    fwd = jax.jit(critic_forward)
    out = jax.block_until_ready(fwd(x, packed))

    ref = critic_reference(x, params)
    assert out.shape == (B, SEQ), out.shape
    assert bool(jnp.all(jnp.isfinite(out)))
    assert bool(jnp.allclose(out, ref, rtol=2e-3, atol=2e-3)), "mismatch vs reference"

    print("KERNEL_OK")
</pallas_src>

<mosaic_0001>
module attributes {stable_mosaic.version = 11 : i64} {
  func.func @_critic_kernel(%arg0: i32, %arg1: memref<46x46xf32, #tpu.memory_space<vmem>>, %arg2: memref<2x69xf32, #tpu.memory_space<vmem>>, %arg3: memref<46x23xf32, #tpu.memory_space<vmem>>, %arg4: memref<2x46xf32, #tpu.memory_space<vmem>>, %arg5: memref<7x128x128xf32, #tpu.memory_space<vmem>>, %arg6: memref<7x1x128xf32, #tpu.memory_space<vmem>>, %arg7: memref<8x256x256xf32, #tpu.memory_space<vmem>>, %arg8: memref<8x1x256xf32, #tpu.memory_space<vmem>>, %arg9: memref<2x23xf32, #tpu.memory_space<vmem>>) attributes {dimension_semantics = [#tpu.dimension_semantics<parallel>], iteration_bounds = array<i64: 1>, scalar_prefetch = 0 : i64, scratch_operands = 0 : i64, tpu.core_type = #tpu.core_type<tc>, window_params = [{transform_indices = @transform_0, window_bounds = array<i64: 46, 46>}, {transform_indices = @transform_1, window_bounds = array<i64: 2, 69>}, {pipeline_mode = #tpu.pipeline_mode<synchronous>, transform_indices = @transform_2, window_bounds = array<i64: 46, 23>}, {pipeline_mode = #tpu.pipeline_mode<synchronous>, transform_indices = @transform_3, window_bounds = array<i64: 2, 46>}, {pipeline_mode = #tpu.pipeline_mode<synchronous>, transform_indices = @transform_4, window_bounds = array<i64: 7, 128, 128>}, {pipeline_mode = #tpu.pipeline_mode<synchronous>, transform_indices = @transform_5, window_bounds = array<i64: 7, 1, 128>}, {pipeline_mode = #tpu.pipeline_mode<synchronous>, transform_indices = @transform_6, window_bounds = array<i64: 8, 256, 256>}, {pipeline_mode = #tpu.pipeline_mode<synchronous>, transform_indices = @transform_7, window_bounds = array<i64: 8, 1, 256>}, {transform_indices = @transform_8, window_bounds = array<i64: 2, 23>}]} {
    %c0 = arith.constant 0 : index
    %c0_0 = arith.constant 0 : index
    %0 = vector.load %arg1[%c0, %c0_0] : memref<46x46xf32, #tpu.memory_space<vmem>>, vector<46x46xf32>
    %cst = arith.constant 0.000000e+00 : f32
    %1 = vector.broadcast %cst : f32 to vector<46x82xf32>
    %2 = tpu.concatenate %0, %1 in 1 : vector<46x46xf32>, vector<46x82xf32> -> vector<46x128xf32>
    %c0_1 = arith.constant 0 : index
    %c0_2 = arith.constant 0 : index
    %c0_3 = arith.constant 0 : index
    %3 = vector.load %arg5[%c0_1, %c0_2, %c0_3] : memref<7x128x128xf32, #tpu.memory_space<vmem>>, vector<1x128x128xf32>
    %4 = vector.shape_cast %3 : vector<1x128x128xf32> to vector<128x128xf32>
    %cst_4 = arith.constant dense<0.000000e+00> : vector<46x128xf32>
    %5 = tpu.matmul %2, %4, %cst_4 {dimension_numbers = #tpu.dot_dimension_numbers<[1], [0], [0], [1], [0, 0, 1, 1], [], []>} : vector<46x128xf32>, vector<128x128xf32>, vector<46x128xf32> -> vector<46x128xf32>
    %c0_5 = arith.constant 0 : index
    %c0_6 = arith.constant 0 : index
    %c0_7 = arith.constant 0 : index
    %6 = vector.load %arg6[%c0_5, %c0_6, %c0_7] : memref<7x1x128xf32, #tpu.memory_space<vmem>>, vector<1x1x128xf32>
    %7 = vector.shape_cast %6 : vector<1x1x128xf32> to vector<1x128xf32>
    %8 = vector.broadcast %7 : vector<1x128xf32> to vector<46x128xf32>
    %9 = arith.addf %5, %8 : vector<46x128xf32>
    %cst_8 = arith.constant 0.000000e+00 : f32
    %10 = vector.broadcast %cst_8 : f32 to vector<46x128xf32>
    %11 = arith.cmpf ogt, %9, %10 : vector<46x128xf32>
    %cst_9 = arith.constant 0.00999999977 : f32
    %12 = vector.broadcast %cst_9 : f32 to vector<46x128xf32>
    %13 = arith.mulf %12, %9 : vector<46x128xf32>
    %14 = arith.select %11, %9, %13 : vector<46x128xi1>, vector<46x128xf32>
    %c1 = arith.constant 1 : index
    %c0_10 = arith.constant 0 : index
    %c0_11 = arith.constant 0 : index
    %15 = vector.load %arg5[%c1, %c0_10, %c0_11] : memref<7x128x128xf32, #tpu.memory_space<vmem>>, vector<1x128x128xf32>
    %16 = vector.shape_cast %15 : vector<1x128x128xf32> to vector<128x128xf32>
    %cst_12 = arith.constant dense<0.000000e+00> : vector<46x128xf32>
    %17 = tpu.matmul %14, %16, %cst_12 {dimension_numbers = #tpu.dot_dimension_numbers<[1], [0], [0], [1], [0, 0, 1, 1], [], []>} : vector<46x128xf32>, vector<128x128xf32>, vector<46x128xf32> -> vector<46x128xf32>
    %c1_13 = arith.constant 1 : index
    %c0_14 = arith.constant 0 : index
    %c0_15 = arith.constant 0 : index
    %18 = vector.load %arg6[%c1_13, %c0_14, %c0_15] : memref<7x1x128xf32, #tpu.memory_space<vmem>>, vector<1x1x128xf32>
    %19 = vector.shape_cast %18 : vector<1x1x128xf32> to vector<1x128xf32>
    %20 = vector.broadcast %19 : vector<1x128xf32> to vector<46x128xf32>
    %21 = arith.addf %17, %20 : vector<46x128xf32>
    %cst_16 = arith.constant 0.000000e+00 : f32
    %22 = vector.broadcast %cst_16 : f32 to vector<46x128xf32>
    %23 = arith.cmpf ogt, %21, %22 : vector<46x128xf32>
    %cst_17 = arith.constant 0.00999999977 : f32
    %24 = vector.broadcast %cst_17 : f32 to vector<46x128xf32>
    %25 = arith.mulf %24, %21 : vector<46x128xf32>
    %26 = arith.select %23, %21, %25 : vector<46x128xi1>, vector<46x128xf32>
    %c2 = arith.constant 2 : index
    %c0_18 = arith.constant 0 : index
    %c0_19 = arith.constant 0 : index
    %27 = vector.load %arg5[%c2, %c0_18, %c0_19] : memref<7x128x128xf32, #tpu.memory_space<vmem>>, vector<1x128x128xf32>
    %28 = vector.shape_cast %27 : vector<1x128x128xf32> to vector<128x128xf32>
    %cst_20 = arith.constant dense<0.000000e+00> : vector<46x128xf32>
    %29 = tpu.matmul %26, %28, %cst_20 {dimension_numbers = #tpu.dot_dimension_numbers<[1], [0], [0], [1], [0, 0, 1, 1], [], []>} : vector<46x128xf32>, vector<128x128xf32>, vector<46x128xf32> -> vector<46x128xf32>
    %c2_21 = arith.constant 2 : index
    %c0_22 = arith.constant 0 : index
    %c0_23 = arith.constant 0 : index
    %30 = vector.load %arg6[%c2_21, %c0_22, %c0_23] : memref<7x1x128xf32, #tpu.memory_space<vmem>>, vector<1x1x128xf32>
    %31 = vector.shape_cast %30 : vector<1x1x128xf32> to vector<1x128xf32>
    %32 = vector.broadcast %31 : vector<1x128xf32> to vector<46x128xf32>
    %33 = arith.addf %29, %32 : vector<46x128xf32>
    %cst_24 = arith.constant 0.000000e+00 : f32
    %34 = vector.broadcast %cst_24 : f32 to vector<46x128xf32>
    %35 = arith.cmpf ogt, %33, %34 : vector<46x128xf32>
    %cst_25 = arith.constant 0.00999999977 : f32
    %36 = vector.broadcast %cst_25 : f32 to vector<46x128xf32>
    %37 = arith.mulf %36, %33 : vector<46x128xf32>
    %38 = arith.select %35, %33, %37 : vector<46x128xi1>, vector<46x128xf32>
    %c3 = arith.constant 3 : index
    %c0_26 = arith.constant 0 : index
    %c0_27 = arith.constant 0 : index
    %39 = vector.load %arg5[%c3, %c0_26, %c0_27] : memref<7x128x128xf32, #tpu.memory_space<vmem>>, vector<1x128x128xf32>
    %40 = vector.shape_cast %39 : vector<1x128x128xf32> to vector<128x128xf32>
    %cst_28 = arith.constant dense<0.000000e+00> : vector<46x128xf32>
    %41 = tpu.matmul %38, %40, %cst_28 {dimension_numbers = #tpu.dot_dimension_numbers<[1], [0], [0], [1], [0, 0, 1, 1], [], []>} : vector<46x128xf32>, vector<128x128xf32>, vector<46x128xf32> -> vector<46x128xf32>
    %c3_29 = arith.constant 3 : index
    %c0_30 = arith.constant 0 : index
    %c0_31 = arith.constant 0 : index
    %42 = vector.load %arg6[%c3_29, %c0_30, %c0_31] : memref<7x1x128xf32, #tpu.memory_space<vmem>>, vector<1x1x128xf32>
    %43 = vector.shape_cast %42 : vector<1x1x128xf32> to vector<1x128xf32>
    %44 = vector.broadcast %43 : vector<1x128xf32> to vector<46x128xf32>
    %45 = arith.addf %41, %44 : vector<46x128xf32>
    %cst_32 = arith.constant 0.000000e+00 : f32
    %46 = vector.broadcast %cst_32 : f32 to vector<46x128xf32>
    %47 = arith.cmpf ogt, %45, %46 : vector<46x128xf32>
    %cst_33 = arith.constant 0.00999999977 : f32
    %48 = vector.broadcast %cst_33 : f32 to vector<46x128xf32>
    %49 = arith.mulf %48, %45 : vector<46x128xf32>
    %50 = arith.select %47, %45, %49 : vector<46x128xi1>, vector<46x128xf32>
    %c4 = arith.constant 4 : index
    %c0_34 = arith.constant 0 : index
    %c0_35 = arith.constant 0 : index
    %51 = vector.load %arg5[%c4, %c0_34, %c0_35] : memref<7x128x128xf32, #tpu.memory_space<vmem>>, vector<1x128x128xf32>
    %52 = vector.shape_cast %51 : vector<1x128x128xf32> to vector<128x128xf32>
    %cst_36 = arith.constant dense<0.000000e+00> : vector<46x128xf32>
    %53 = tpu.matmul %50, %52, %cst_36 {dimension_numbers = #tpu.dot_dimension_numbers<[1], [0], [0], [1], [0, 0, 1, 1], [], []>} : vector<46x128xf32>, vector<128x128xf32>, vector<46x128xf32> -> vector<46x128xf32>
    %c4_37 = arith.constant 4 : index
    %c0_38 = arith.constant 0 : index
    %c0_39 = arith.constant 0 : index
    %54 = vector.load %arg6[%c4_37, %c0_38, %c0_39] : memref<7x1x128xf32, #tpu.memory_space<vmem>>, vector<1x1x128xf32>
    %55 = vector.shape_cast %54 : vector<1x1x128xf32> to vector<1x128xf32>
    %56 = vector.broadcast %55 : vector<1x128xf32> to vector<46x128xf32>
    %57 = arith.addf %53, %56 : vector<46x128xf32>
    %cst_40 = arith.constant 0.000000e+00 : f32
    %58 = vector.broadcast %cst_40 : f32 to vector<46x128xf32>
    %59 = arith.cmpf ogt, %57, %58 : vector<46x128xf32>
    %cst_41 = arith.constant 0.00999999977 : f32
    %60 = vector.broadcast %cst_41 : f32 to vector<46x128xf32>
    %61 = arith.mulf %60, %57 : vector<46x128xf32>
    %62 = arith.select %59, %57, %61 : vector<46x128xi1>, vector<46x128xf32>
    %c5 = arith.constant 5 : index
    %c0_42 = arith.constant 0 : index
    %c0_43 = arith.constant 0 : index
    %63 = vector.load %arg5[%c5, %c0_42, %c0_43] : memref<7x128x128xf32, #tpu.memory_space<vmem>>, vector<1x128x128xf32>
    %64 = vector.shape_cast %63 : vector<1x128x128xf32> to vector<128x128xf32>
    %cst_44 = arith.constant dense<0.000000e+00> : vector<46x128xf32>
    %65 = tpu.matmul %62, %64, %cst_44 {dimension_numbers = #tpu.dot_dimension_numbers<[1], [0], [0], [1], [0, 0, 1, 1], [], []>} : vector<46x128xf32>, vector<128x128xf32>, vector<46x128xf32> -> vector<46x128xf32>
    %c5_45 = arith.constant 5 : index
    %c0_46 = arith.constant 0 : index
    %c0_47 = arith.constant 0 : index
    %66 = vector.load %arg6[%c5_45, %c0_46, %c0_47] : memref<7x1x128xf32, #tpu.memory_space<vmem>>, vector<1x1x128xf32>
    %67 = vector.shape_cast %66 : vector<1x1x128xf32> to vector<1x128xf32>
    %68 = vector.broadcast %67 : vector<1x128xf32> to vector<46x128xf32>
    %69 = arith.addf %65, %68 : vector<46x128xf32>
    %cst_48 = arith.constant 0.000000e+00 : f32
    %70 = vector.broadcast %cst_48 : f32 to vector<46x128xf32>
    %71 = arith.cmpf ogt, %69, %70 : vector<46x128xf32>
    %cst_49 = arith.constant 0.00999999977 : f32
    %72 = vector.broadcast %cst_49 : f32 to vector<46x128xf32>
    %73 = arith.mulf %72, %69 : vector<46x128xf32>
    %74 = arith.select %71, %69, %73 : vector<46x128xi1>, vector<46x128xf32>
    %c6 = arith.constant 6 : index
    %c0_50 = arith.constant 0 : index
    %c0_51 = arith.constant 0 : index
    %75 = vector.load %arg5[%c6, %c0_50, %c0_51] : memref<7x128x128xf32, #tpu.memory_space<vmem>>, vector<1x128x128xf32>
    %76 = vector.shape_cast %75 : vector<1x128x128xf32> to vector<128x128xf32>
    %cst_52 = arith.constant dense<0.000000e+00> : vector<46x128xf32>
    %77 = tpu.matmul %74, %76, %cst_52 {dimension_numbers = #tpu.dot_dimension_numbers<[1], [0], [0], [1], [0, 0, 1, 1], [], []>} : vector<46x128xf32>, vector<128x128xf32>, vector<46x128xf32> -> vector<46x128xf32>
    %c6_53 = arith.constant 6 : index
    %c0_54 = arith.constant 0 : index
    %c0_55 = arith.constant 0 : index
    %78 = vector.load %arg6[%c6_53, %c0_54, %c0_55] : memref<7x1x128xf32, #tpu.memory_space<vmem>>, vector<1x1x128xf32>
    %79 = vector.shape_cast %78 : vector<1x1x128xf32> to vector<1x128xf32>
    %80 = vector.broadcast %79 : vector<1x128xf32> to vector<46x128xf32>
    %81 = arith.addf %77, %80 : vector<46x128xf32>
    %cst_56 = arith.constant 0.000000e+00 : f32
    %82 = vector.broadcast %cst_56 : f32 to vector<46x128xf32>
    %83 = arith.cmpf ogt, %81, %82 : vector<46x128xf32>
    %cst_57 = arith.constant 0.00999999977 : f32
    %84 = vector.broadcast %cst_57 : f32 to vector<46x128xf32>
    %85 = arith.mulf %84, %81 : vector<46x128xf32>
    %86 = arith.select %83, %81, %85 : vector<46x128xi1>, vector<46x128xf32>
    %c0_58 = arith.constant 0 : index
    %c0_59 = arith.constant 0 : index
    %87 = vector.load %arg3[%c0_58, %c0_59] : memref<46x23xf32, #tpu.memory_space<vmem>>, vector<46x23xf32>
    %c0_60 = arith.constant 0 : index
    %c0_61 = arith.constant 0 : index
    %88 = vector.load %arg4[%c0_60, %c0_61] : memref<2x46xf32, #tpu.memory_space<vmem>>, vector<2x46xf32>
    %89 = vector.extract_strided_slice %86 {offsets = [0, 0], sizes = [46, 1], strides = [1, 1]} : vector<46x128xf32> to vector<46x1xf32>
    %90 = vector.broadcast %89 : vector<46x1xf32> to vector<46x23xf32>
    %91 = arith.mulf %87, %90 : vector<46x23xf32>
    %cst_62 = arith.constant dense<0.000000e+00> : vector<2x23xf32>
    %92 = tpu.matmul %88, %91, %cst_62 {dimension_numbers = #tpu.dot_dimension_numbers<[1], [0], [0], [1], [0, 0, 1, 1], [], []>} : vector<2x46xf32>, vector<46x23xf32>, vector<2x23xf32> -> vector<2x23xf32>
    %93 = vector.extract_strided_slice %86 {offsets = [0, 23], sizes = [46, 1], strides = [1, 1]} : vector<46x128xf32> to vector<46x1xf32>
    %94 = vector.broadcast %93 : vector<46x1xf32> to vector<46x23xf32>
    %95 = arith.mulf %87, %94 : vector<46x23xf32>
    %cst_63 = arith.constant dense<0.000000e+00> : vector<2x23xf32>
    %96 = tpu.matmul %88, %95, %cst_63 {dimension_numbers = #tpu.dot_dimension_numbers<[1], [0], [0], [1], [0, 0, 1, 1], [], []>} : vector<2x46xf32>, vector<46x23xf32>, vector<2x23xf32> -> vector<2x23xf32>
    %c0_64 = arith.constant 0 : index
    %c0_65 = arith.constant 0 : index
    %97 = vector.load %arg2[%c0_64, %c0_65] : memref<2x69xf32, #tpu.memory_space<vmem>>, vector<2x69xf32>
    %cst_66 = arith.constant 0.000000e+00 : f32
    %98 = vector.broadcast %cst_66 : f32 to vector<2x36xf32>
    %99 = tpu.concatenate %92, %97, %98, %96, %97, %98 in 1 : vector<2x23xf32>, vector<2x69xf32>, vector<2x36xf32>, vector<2x23xf32>, vector<2x69xf32>, vector<2x36xf32> -> vector<2x256xf32>
    %c0_67 = arith.constant 0 : index
    %c0_68 = arith.constant 0 : index
    %c0_69 = arith.constant 0 : index
    %100 = vector.load %arg7[%c0_67, %c0_68, %c0_69] : memref<8x256x256xf32, #tpu.memory_space<vmem>>, vector<1x256x256xf32>
    %101 = vector.shape_cast %100 : vector<1x256x256xf32> to vector<256x256xf32>
    %cst_70 = arith.constant dense<0.000000e+00> : vector<2x256xf32>
    %102 = tpu.matmul %99, %101, %cst_70 {dimension_numbers = #tpu.dot_dimension_numbers<[1], [0], [0], [1], [0, 0, 1, 1], [], []>} : vector<2x256xf32>, vector<256x256xf32>, vector<2x256xf32> -> vector<2x256xf32>
    %c0_71 = arith.constant 0 : index
    %c0_72 = arith.constant 0 : index
    %c0_73 = arith.constant 0 : index
    %103 = vector.load %arg8[%c0_71, %c0_72, %c0_73] : memref<8x1x256xf32, #tpu.memory_space<vmem>>, vector<1x1x256xf32>
    %104 = vector.shape_cast %103 : vector<1x1x256xf32> to vector<1x256xf32>
    %105 = vector.broadcast %104 : vector<1x256xf32> to vector<2x256xf32>
    %106 = arith.addf %102, %105 : vector<2x256xf32>
    %cst_74 = arith.constant 0.000000e+00 : f32
    %107 = vector.broadcast %cst_74 : f32 to vector<2x256xf32>
    %108 = arith.cmpf ogt, %106, %107 : vector<2x256xf32>
    %cst_75 = arith.constant 0.00999999977 : f32
    %109 = vector.broadcast %cst_75 : f32 to vector<2x256xf32>
    %110 = arith.mulf %109, %106 : vector<2x256xf32>
    %111 = arith.select %108, %106, %110 : vector<2x256xi1>, vector<2x256xf32>
    %c1_76 = arith.constant 1 : index
    %c0_77 = arith.constant 0 : index
    %c0_78 = arith.constant 0 : index
    %112 = vector.load %arg7[%c1_76, %c0_77, %c0_78] : memref<8x256x256xf32, #tpu.memory_space<vmem>>, vector<1x256x256xf32>
    %113 = vector.shape_cast %112 : vector<1x256x256xf32> to vector<256x256xf32>
    %cst_79 = arith.constant dense<0.000000e+00> : vector<2x256xf32>
    %114 = tpu.matmul %111, %113, %cst_79 {dimension_numbers = #tpu.dot_dimension_numbers<[1], [0], [0], [1], [0, 0, 1, 1], [], []>} : vector<2x256xf32>, vector<256x256xf32>, vector<2x256xf32> -> vector<2x256xf32>
    %c1_80 = arith.constant 1 : index
    %c0_81 = arith.constant 0 : index
    %c0_82 = arith.constant 0 : index
    %115 = vector.load %arg8[%c1_80, %c0_81, %c0_82] : memref<8x1x256xf32, #tpu.memory_space<vmem>>, vector<1x1x256xf32>
    %116 = vector.shape_cast %115 : vector<1x1x256xf32> to vector<1x256xf32>
    %117 = vector.broadcast %116 : vector<1x256xf32> to vector<2x256xf32>
    %118 = arith.addf %114, %117 : vector<2x256xf32>
    %cst_83 = arith.constant 0.000000e+00 : f32
    %119 = vector.broadcast %cst_83 : f32 to vector<2x256xf32>
    %120 = arith.cmpf ogt, %118, %119 : vector<2x256xf32>
    %cst_84 = arith.constant 0.00999999977 : f32
    %121 = vector.broadcast %cst_84 : f32 to vector<2x256xf32>
    %122 = arith.mulf %121, %118 : vector<2x256xf32>
    %123 = arith.select %120, %118, %122 : vector<2x256xi1>, vector<2x256xf32>
    %c2_85 = arith.constant 2 : index
    %c0_86 = arith.constant 0 : index
    %c0_87 = arith.constant 0 : index
    %124 = vector.load %arg7[%c2_85, %c0_86, %c0_87] : memref<8x256x256xf32, #tpu.memory_space<vmem>>, vector<1x256x256xf32>
    %125 = vector.shape_cast %124 : vector<1x256x256xf32> to vector<256x256xf32>
    %cst_88 = arith.constant dense<0.000000e+00> : vector<2x256xf32>
    %126 = tpu.matmul %123, %125, %cst_88 {dimension_numbers = #tpu.dot_dimension_numbers<[1], [0], [0], [1], [0, 0, 1, 1], [], []>} : vector<2x256xf32>, vector<256x256xf32>, vector<2x256xf32> -> vector<2x256xf32>
    %c2_89 = arith.constant 2 : index
    %c0_90 = arith.constant 0 : index
    %c0_91 = arith.constant 0 : index
    %127 = vector.load %arg8[%c2_89, %c0_90, %c0_91] : memref<8x1x256xf32, #tpu.memory_space<vmem>>, vector<1x1x256xf32>
    %128 = vector.shape_cast %127 : vector<1x1x256xf32> to vector<1x256xf32>
    %129 = vector.broadcast %128 : vector<1x256xf32> to vector<2x256xf32>
    %130 = arith.addf %126, %129 : vector<2x256xf32>
    %cst_92 = arith.constant 0.000000e+00 : f32
    %131 = vector.broadcast %cst_92 : f32 to vector<2x256xf32>
    %132 = arith.cmpf ogt, %130, %131 : vector<2x256xf32>
    %cst_93 = arith.constant 0.00999999977 : f32
    %133 = vector.broadcast %cst_93 : f32 to vector<2x256xf32>
    %134 = arith.mulf %133, %130 : vector<2x256xf32>
    %135 = arith.select %132, %130, %134 : vector<2x256xi1>, vector<2x256xf32>
    %c3_94 = arith.constant 3 : index
    %c0_95 = arith.constant 0 : index
    %c0_96 = arith.constant 0 : index
    %136 = vector.load %arg7[%c3_94, %c0_95, %c0_96] : memref<8x256x256xf32, #tpu.memory_space<vmem>>, vector<1x256x256xf32>
    %137 = vector.shape_cast %136 : vector<1x256x256xf32> to vector<256x256xf32>
    %cst_97 = arith.constant dense<0.000000e+00> : vector<2x256xf32>
    %138 = tpu.matmul %135, %137, %cst_97 {dimension_numbers = #tpu.dot_dimension_numbers<[1], [0], [0], [1], [0, 0, 1, 1], [], []>} : vector<2x256xf32>, vector<256x256xf32>, vector<2x256xf32> -> vector<2x256xf32>
    %c3_98 = arith.constant 3 : index
    %c0_99 = arith.constant 0 : index
    %c0_100 = arith.constant 0 : index
    %139 = vector.load %arg8[%c3_98, %c0_99, %c0_100] : memref<8x1x256xf32, #tpu.memory_space<vmem>>, vector<1x1x256xf32>
    %140 = vector.shape_cast %139 : vector<1x1x256xf32> to vector<1x256xf32>
    %141 = vector.broadcast %140 : vector<1x256xf32> to vector<2x256xf32>
    %142 = arith.addf %138, %141 : vector<2x256xf32>
    %cst_101 = arith.constant 0.000000e+00 : f32
    %143 = vector.broadcast %cst_101 : f32 to vector<2x256xf32>
    %144 = arith.cmpf ogt, %142, %143 : vector<2x256xf32>
    %cst_102 = arith.constant 0.00999999977 : f32
    %145 = vector.broadcast %cst_102 : f32 to vector<2x256xf32>
    %146 = arith.mulf %145, %142 : vector<2x256xf32>
    %147 = arith.select %144, %142, %146 : vector<2x256xi1>, vector<2x256xf32>
    %c4_103 = arith.constant 4 : index
    %c0_104 = arith.constant 0 : index
    %c0_105 = arith.constant 0 : index
    %148 = vector.load %arg7[%c4_103, %c0_104, %c0_105] : memref<8x256x256xf32, #tpu.memory_space<vmem>>, vector<1x256x256xf32>
    %149 = vector.shape_cast %148 : vector<1x256x256xf32> to vector<256x256xf32>
    %cst_106 = arith.constant dense<0.000000e+00> : vector<2x256xf32>
    %150 = tpu.matmul %147, %149, %cst_106 {dimension_numbers = #tpu.dot_dimension_numbers<[1], [0], [0], [1], [0, 0, 1, 1], [], []>} : vector<2x256xf32>, vector<256x256xf32>, vector<2x256xf32> -> vector<2x256xf32>
    %c4_107 = arith.constant 4 : index
    %c0_108 = arith.constant 0 : index
    %c0_109 = arith.constant 0 : index
    %151 = vector.load %arg8[%c4_107, %c0_108, %c0_109] : memref<8x1x256xf32, #tpu.memory_space<vmem>>, vector<1x1x256xf32>
    %152 = vector.shape_cast %151 : vector<1x1x256xf32> to vector<1x256xf32>
    %153 = vector.broadcast %152 : vector<1x256xf32> to vector<2x256xf32>
    %154 = arith.addf %150, %153 : vector<2x256xf32>
    %cst_110 = arith.constant 0.000000e+00 : f32
    %155 = vector.broadcast %cst_110 : f32 to vector<2x256xf32>
    %156 = arith.cmpf ogt, %154, %155 : vector<2x256xf32>
    %cst_111 = arith.constant 0.00999999977 : f32
    %157 = vector.broadcast %cst_111 : f32 to vector<2x256xf32>
    %158 = arith.mulf %157, %154 : vector<2x256xf32>
    %159 = arith.select %156, %154, %158 : vector<2x256xi1>, vector<2x256xf32>
    %c5_112 = arith.constant 5 : index
    %c0_113 = arith.constant 0 : index
    %c0_114 = arith.constant 0 : index
    %160 = vector.load %arg7[%c5_112, %c0_113, %c0_114] : memref<8x256x256xf32, #tpu.memory_space<vmem>>, vector<1x256x256xf32>
    %161 = vector.shape_cast %160 : vector<1x256x256xf32> to vector<256x256xf32>
    %cst_115 = arith.constant dense<0.000000e+00> : vector<2x256xf32>
    %162 = tpu.matmul %159, %161, %cst_115 {dimension_numbers = #tpu.dot_dimension_numbers<[1], [0], [0], [1], [0, 0, 1, 1], [], []>} : vector<2x256xf32>, vector<256x256xf32>, vector<2x256xf32> -> vector<2x256xf32>
    %c5_116 = arith.constant 5 : index
    %c0_117 = arith.constant 0 : index
    %c0_118 = arith.constant 0 : index
    %163 = vector.load %arg8[%c5_116, %c0_117, %c0_118] : memref<8x1x256xf32, #tpu.memory_space<vmem>>, vector<1x1x256xf32>
    %164 = vector.shape_cast %163 : vector<1x1x256xf32> to vector<1x256xf32>
    %165 = vector.broadcast %164 : vector<1x256xf32> to vector<2x256xf32>
    %166 = arith.addf %162, %165 : vector<2x256xf32>
    %cst_119 = arith.constant 0.000000e+00 : f32
    %167 = vector.broadcast %cst_119 : f32 to vector<2x256xf32>
    %168 = arith.cmpf ogt, %166, %167 : vector<2x256xf32>
    %cst_120 = arith.constant 0.00999999977 : f32
    %169 = vector.broadcast %cst_120 : f32 to vector<2x256xf32>
    %170 = arith.mulf %169, %166 : vector<2x256xf32>
    %171 = arith.select %168, %166, %170 : vector<2x256xi1>, vector<2x256xf32>
    %c6_121 = arith.constant 6 : index
    %c0_122 = arith.constant 0 : index
    %c0_123 = arith.constant 0 : index
    %172 = vector.load %arg7[%c6_121, %c0_122, %c0_123] : memref<8x256x256xf32, #tpu.memory_space<vmem>>, vector<1x256x256xf32>
    %173 = vector.shape_cast %172 : vector<1x256x256xf32> to vector<256x256xf32>
    %cst_124 = arith.constant dense<0.000000e+00> : vector<2x256xf32>
    %174 = tpu.matmul %171, %173, %cst_124 {dimension_numbers = #tpu.dot_dimension_numbers<[1], [0], [0], [1], [0, 0, 1, 1], [], []>} : vector<2x256xf32>, vector<256x256xf32>, vector<2x256xf32> -> vector<2x256xf32>
    %c6_125 = arith.constant 6 : index
    %c0_126 = arith.constant 0 : index
    %c0_127 = arith.constant 0 : index
    %175 = vector.load %arg8[%c6_125, %c0_126, %c0_127] : memref<8x1x256xf32, #tpu.memory_space<vmem>>, vector<1x1x256xf32>
    %176 = vector.shape_cast %175 : vector<1x1x256xf32> to vector<1x256xf32>
    %177 = vector.broadcast %176 : vector<1x256xf32> to vector<2x256xf32>
    %178 = arith.addf %174, %177 : vector<2x256xf32>
    %cst_128 = arith.constant 0.000000e+00 : f32
    %179 = vector.broadcast %cst_128 : f32 to vector<2x256xf32>
    %180 = arith.cmpf ogt, %178, %179 : vector<2x256xf32>
    %cst_129 = arith.constant 0.00999999977 : f32
    %181 = vector.broadcast %cst_129 : f32 to vector<2x256xf32>
    %182 = arith.mulf %181, %178 : vector<2x256xf32>
    %183 = arith.select %180, %178, %182 : vector<2x256xi1>, vector<2x256xf32>
    %c7 = arith.constant 7 : index
    %c0_130 = arith.constant 0 : index
    %c0_131 = arith.constant 0 : index
    %184 = vector.load %arg7[%c7, %c0_130, %c0_131] : memref<8x256x256xf32, #tpu.memory_space<vmem>>, vector<1x256x256xf32>
    %185 = vector.shape_cast %184 : vector<1x256x256xf32> to vector<256x256xf32>
    %cst_132 = arith.constant dense<0.000000e+00> : vector<2x256xf32>
    %186 = tpu.matmul %183, %185, %cst_132 {dimension_numbers = #tpu.dot_dimension_numbers<[1], [0], [0], [1], [0, 0, 1, 1], [], []>} : vector<2x256xf32>, vector<256x256xf32>, vector<2x256xf32> -> vector<2x256xf32>
    %c7_133 = arith.constant 7 : index
    %c0_134 = arith.constant 0 : index
    %c0_135 = arith.constant 0 : index
    %187 = vector.load %arg8[%c7_133, %c0_134, %c0_135] : memref<8x1x256xf32, #tpu.memory_space<vmem>>, vector<1x1x256xf32>
    %188 = vector.shape_cast %187 : vector<1x1x256xf32> to vector<1x256xf32>
    %189 = vector.broadcast %188 : vector<1x256xf32> to vector<2x256xf32>
    %190 = arith.addf %186, %189 : vector<2x256xf32>
    %cst_136 = arith.constant 0.000000e+00 : f32
    %191 = vector.broadcast %cst_136 : f32 to vector<2x256xf32>
    %192 = arith.cmpf ogt, %190, %191 : vector<2x256xf32>
    %cst_137 = arith.constant 0.00999999977 : f32
    %193 = vector.broadcast %cst_137 : f32 to vector<2x256xf32>
    %194 = arith.mulf %193, %190 : vector<2x256xf32>
    %195 = arith.select %192, %190, %194 : vector<2x256xi1>, vector<2x256xf32>
    %196 = vector.extract_strided_slice %195 {offsets = [0, 0], sizes = [2, 23], strides = [1, 1]} : vector<2x256xf32> to vector<2x23xf32>
    %197 = vector.extract_strided_slice %195 {offsets = [0, 128], sizes = [2, 23], strides = [1, 1]} : vector<2x256xf32> to vector<2x23xf32>
    %198 = arith.addf %196, %197 : vector<2x23xf32>
    %c0_138 = arith.constant 0 : index
    %c0_139 = arith.constant 0 : index
    %199 = vector.load %arg9[%c0_138, %c0_139] : memref<2x23xf32, #tpu.memory_space<vmem>>, vector<2x23xf32>
    tpu.vector_store %arg9[%c0_138, %c0_139], %198 {strides = array<i32>} : memref<2x23xf32, #tpu.memory_space<vmem>>, vector<2x23xf32>,
    return
  }
  func.func @transform_0(%arg0: i32) -> (i32, i32) {
    %c0_i32 = arith.constant 0 : i32
    %c0_i32_0 = arith.constant 0 : i32
    return %arg0, %c0_i32 : i32, i32
  }
  func.func @transform_1(%arg0: i32) -> (i32, i32) {
    %c0_i32 = arith.constant 0 : i32
    %c0_i32_0 = arith.constant 0 : i32
    return %arg0, %c0_i32 : i32, i32
  }
  func.func @transform_2(%arg0: i32) -> (i32, i32) {
    %c0_i32 = arith.constant 0 : i32
    %c0_i32_0 = arith.constant 0 : i32
    %c0_i32_1 = arith.constant 0 : i32
    return %c0_i32, %c0_i32_0 : i32, i32
  }
  func.func @transform_3(%arg0: i32) -> (i32, i32) {
    %c0_i32 = arith.constant 0 : i32
    %c0_i32_0 = arith.constant 0 : i32
    %c0_i32_1 = arith.constant 0 : i32
    return %c0_i32, %c0_i32_0 : i32, i32
  }
  func.func @transform_4(%arg0: i32) -> (i32, i32, i32) {
    %c0_i32 = arith.constant 0 : i32
    %c0_i32_0 = arith.constant 0 : i32
    %c0_i32_1 = arith.constant 0 : i32
    %c0_i32_2 = arith.constant 0 : i32
    return %c0_i32, %c0_i32_0, %c0_i32_1 : i32, i32, i32
  }
  func.func @transform_5(%arg0: i32) -> (i32, i32, i32) {
    %c0_i32 = arith.constant 0 : i32
    %c0_i32_0 = arith.constant 0 : i32
    %c0_i32_1 = arith.constant 0 : i32
    %c0_i32_2 = arith.constant 0 : i32
    return %c0_i32, %c0_i32_0, %c0_i32_1 : i32, i32, i32
  }
  func.func @transform_6(%arg0: i32) -> (i32, i32, i32) {
    %c0_i32 = arith.constant 0 : i32
    %c0_i32_0 = arith.constant 0 : i32
    %c0_i32_1 = arith.constant 0 : i32
    %c0_i32_2 = arith.constant 0 : i32
    return %c0_i32, %c0_i32_0, %c0_i32_1 : i32, i32, i32
  }
  func.func @transform_7(%arg0: i32) -> (i32, i32, i32) {
    %c0_i32 = arith.constant 0 : i32
    %c0_i32_0 = arith.constant 0 : i32
    %c0_i32_1 = arith.constant 0 : i32
    %c0_i32_2 = arith.constant 0 : i32
    return %c0_i32, %c0_i32_0, %c0_i32_1 : i32, i32, i32
  }
  func.func @transform_8(%arg0: i32) -> (i32, i32) {
    %c0_i32 = arith.constant 0 : i32
    %c0_i32_0 = arith.constant 0 : i32
    return %arg0, %c0_i32 : i32, i32
  }
}

</mosaic_0001>

<bundles_post_ra>
// kernel: critic_forward.1
= control target key start
LH: loop header
LB: loop body
LE: loop exit
PB: predicated region body
PF: predicated region fallthrough
CT: control target
= control target key end

     0   :  { %13 = vsyncpa [#allocation3], 0  ;;  %s4257_s0 = inlined_call_operand.vmem [shape: f32[46,46], index: 0, kind: input, shape index: {}]   ;;  %s4258_s1 = inlined_call_operand.vmem [shape: f32[2,69], index: 1, kind: input, shape index: {}]   ;;  %s4259_s2 = inlined_call_operand.hbm [shape: f32[46,23], index: 2, kind: input, shape index: {}]   ;;  %s4260_s3 = inlined_call_operand.hbm [shape: f32[2,46], index: 3, kind: input, shape index: {}]   ;;  %s4261_s4 = inlined_call_operand.hbm [shape: f32[7,128,128], index: 4, kind: input, shape index: {}]   ;;  %s4262_s5 = inlined_call_operand.hbm [shape: f32[7,1,128], index: 5, kind: input, shape index: {}]   ;;  %s4263_s6 = inlined_call_operand.hbm [shape: f32[8,256,256], index: 6, kind: input, shape index: {}]   ;;  %s4264_s7 = inlined_call_operand.hbm [shape: f32[8,1,256], index: 7, kind: input, shape index: {}]   ;;  %s4265_s8 = inlined_call_operand.hbm [shape: f32[2,23], index: 8, kind: output, shape index: {}]  }
   0x1   :  { %14 = vsyncpa [#allocation6], 0 }
   0x2   :  { %15 = vsyncpa [#allocation9], 0 }
   0x3   :  { %16 = vsyncpa [#allocation12], 0 }
   0x4   :  { %17 = vsyncpa [#allocation4], 0  ;;  %s4031_s27 = smov [#allocation5]   ;;  %s4032_s29 = smov [#allocation8]  }
   0x5   :  { %s40_s28 = sshll.u32 %s4031_s27, 4  ;;  %s61_s30 = sshll.u32 %s4032_s29, 4  ;;  %s41_s28 = int_to_ptr.vmem [resolvable:$true] %s40_s28  ;;  %s4097_s30 = int_to_ptr.vmem [resolvable:$true] %s61_s30 }
   0x6   :  { %s3867_s11 = scalar_lea.hbm %s4260_s3, 32 }
   0x7   :  { %p3868_p0 = scmp.ne.s32.totalorder %s4260_s3, %s3867_s11  ;;  %p3871_p1 = scmp.lt.u32.totalorder %s3867_s11, %s4260_s3 }
   0x9   :  { %p3873_p2 = pnand %p3871_p1, %p3868_p0 }
   0xb   :  { %3876 = shalt.err (!%p3873_p2)
}
   0xc   :  { %s3877_s16 = scalar_lea.vmem %s41_s28, 32  ;;  %p3882_p4 = scmp.lt.s32.totalorder %s41_s28, %s41_s28 }
   0xd   :  { %p3878_p3 = scmp.ne.s32.totalorder %s41_s28, %s3877_s16  ;;  %p3883_p5 = scmp.lt.s32.totalorder %s3877_s16, %s3877_s16 }
   0xf   :  { %p3884_p6 = por %p3883_p5, %p3882_p4 }
  0x11   :  { %p3885_p7 = pnand %p3884_p6, %p3878_p3 }
  0x13   :  { %3888 = shalt.err (!%p3885_p7)
}
  0x14   :  { %43 = dma.hbm_to_vmem [thread:$0]  %s4260_s3, 32, %s41_s28, [#allocation6]  }
  0x15   :  { %s3889_s21 = scalar_lea.hbm %s4262_s5, 112 }
  0x16   :  { %p3890_p8 = scmp.ne.s32.totalorder %s4262_s5, %s3889_s21  ;;  %p3893_p9 = scmp.lt.u32.totalorder %s3889_s21, %s4262_s5 }
  0x18   :  { %p3895_p10 = pnand %p3893_p9, %p3890_p8 }
  0x1a   :  { %3898 = shalt.err (!%p3895_p10)
}
  0x1b   :  { %s3899_s26 = scalar_lea.vmem %s4097_s30, 112  ;;  %s3903_s3 = scalar_lea.vmem %s4097_s30, 128 }
  0x1c   :  { %p3900_p11 = scmp.ne.s32.totalorder %s4097_s30, %s3899_s26  ;;  %p3904_p12 = scmp.lt.s32.totalorder %s4097_s30, %s4097_s30 }
  0x1d   :  { %p3905_p13 = scmp.lt.s32.totalorder %s3903_s3, %s3899_s26 }
  0x1f   :  { %p3906_p0 = por %p3905_p13, %p3904_p12 }
  0x21   :  { %p3907_p1 = pnand %p3906_p0, %p3900_p11 }
  0x23   :  { %3910 = shalt.err (!%p3907_p1)
}
  0x24   :  { %s4033_s27 = smov 16   ;;  %s4034_s28 = smov 1  }
  0x25   :  { %67 = dma.hbm_to_vmem [thread:$0]  %s4262_s5, 112, %s4097_s30, [#allocation9], %s4033_s27, %s4033_s27, %s4034_s28  }
  0x26   :  { %s4035_s10 = smov [#allocation2]   ;;  %s3911_s14 = scalar_lea.hbm %s4259_s2, 768 }
  0x27   :  { %s27_s11 = sshll.u32 %s4035_s10, 4  ;;  %p3912_p2 = scmp.ne.s32.totalorder %s4259_s2, %s3911_s14  ;;  %s28_s11 = int_to_ptr.vmem [resolvable:$true] %s27_s11 }
  0x28   :  { %p3915_p3 = scmp.lt.u32.totalorder %s3911_s14, %s4259_s2 }
  0x2a   :  { %p3917_p4 = pnand %p3915_p3, %p3912_p2 }
  0x2c   :  { %3920 = shalt.err (!%p3917_p4)
}
  0x2d   :  { %s3921_s19 = scalar_lea.vmem %s28_s11, 768  ;;  %p3926_p6 = scmp.lt.s32.totalorder %s28_s11, %s28_s11 }
  0x2e   :  { %p3922_p5 = scmp.ne.s32.totalorder %s28_s11, %s3921_s19  ;;  %p3927_p7 = scmp.lt.s32.totalorder %s3921_s19, %s3921_s19 }
  0x30   :  { %p3928_p8 = por %p3927_p7, %p3926_p6 }
  0x32   :  { %p3929_p9 = pnand %p3928_p8, %p3922_p5 }
  0x34   :  { %3932 = shalt.err (!%p3929_p9)
}
  0x35   :  { %s4036_s5 = smov 128   ;;  %s4037_s30 = smov 8  }
  0x36   :  { %33 = dma.hbm_to_vmem [thread:$0]  %s4259_s2, 768, %s28_s11, [#allocation3], %s4036_s5, %s4036_s5, %s4037_s30  }
  0x37   :  { %s4038_s22 = smov [#allocation7]   ;;  %s4039_s24 = smov [#allocation10]  }
  0x38   :  { %s49_s23 = sshll.u32 %s4038_s22, 4  ;;  %s73_s25 = sshll.u32 %s4039_s24, 4  ;;  %s50_s23 = int_to_ptr.vmem [resolvable:$true] %s49_s23  ;;  %s74_s25 = int_to_ptr.vmem [resolvable:$true] %s73_s25 }
  0x39   :  { %s3933_s28 = scalar_lea.hbm %s4261_s4, 14336 }
  0x3a   :  { %p3934_p10 = scmp.ne.s32.totalorder %s4261_s4, %s3933_s28  ;;  %p3937_p11 = scmp.lt.u32.totalorder %s3933_s28, %s4261_s4 }
  0x3c   :  { %p3939_p12 = pnand %p3937_p11, %p3934_p10 }
  0x3e   :  { %3942 = shalt.err (!%p3939_p12)
}
  0x3f   :  { %s3943_s2 = scalar_lea.vmem %s50_s23, 14336  ;;  %p3948_p0 = scmp.lt.s32.totalorder %s50_s23, %s50_s23 }
  0x40   :  { %p3944_p13 = scmp.ne.s32.totalorder %s50_s23, %s3943_s2  ;;  %p3949_p1 = scmp.lt.s32.totalorder %s3943_s2, %s3943_s2 }
  0x42   :  { %p3950_p2 = por %p3949_p1, %p3948_p0 }
  0x44   :  { %p3951_p3 = pnand %p3950_p2, %p3944_p13 }
  0x46   :  { %3954 = shalt.err (!%p3951_p3)
}
  0x47   :  { %55 = dma.hbm_to_vmem [thread:$0]  %s4261_s4, 14336, %s50_s23, [#allocation6], %s4036_s5, %s4036_s5, %s4037_s30  }
  0x48   :  { %s3955_s16 = scalar_lea.hbm %s4263_s6, 65536 }
  0x49   :  { %p3956_p4 = scmp.ne.s32.totalorder %s4263_s6, %s3955_s16  ;;  %p3959_p5 = scmp.lt.u32.totalorder %s3955_s16, %s4263_s6 }
  0x4b   :  { %p3961_p6 = pnand %p3959_p5, %p3956_p4 }
  0x4d   :  { %3964 = shalt.err (!%p3961_p6)
}
  0x4e   :  { %s3965_s21 = scalar_lea.vmem %s74_s25, 65536  ;;  %p3970_p8 = scmp.lt.s32.totalorder %s74_s25, %s74_s25 }
  0x4f   :  { %p3966_p7 = scmp.ne.s32.totalorder %s74_s25, %s3965_s21  ;;  %p3971_p9 = scmp.lt.s32.totalorder %s3965_s21, %s3965_s21 }
  0x51   :  { %p3972_p10 = por %p3971_p9, %p3970_p8 }
  0x53   :  { %p3973_p11 = pnand %p3972_p10, %p3966_p7 }
  0x55   :  { %3976 = shalt.err (!%p3973_p11)
}
  0x56   :  { %s4040_s4 = smov 256   ;;  %s4041_s22 = smov [#allocation11]  }
  0x57   :  { %79 = dma.hbm_to_vmem [thread:$0]  %s4263_s6, 65536, %s74_s25, [#allocation9], %s4040_s4, %s4040_s4, %s4033_s27  }
  0x58   :  { %s85_s23 = sshll.u32 %s4041_s22, 4  ;;  %s3977_s3 = scalar_lea.hbm %s4264_s7, 256  ;;  %s86_s23 = int_to_ptr.vmem [resolvable:$true] %s85_s23 }
  0x59   :  { %p3978_p12 = scmp.ne.s32.totalorder %s4264_s7, %s3977_s3  ;;  %p3981_p13 = scmp.lt.u32.totalorder %s3977_s3, %s4264_s7 }
  0x5b   :  { %p3983_p0 = pnand %p3981_p13, %p3978_p12 }
  0x5d   :  { %3986 = shalt.err (!%p3983_p0)
}
  0x5e   :  { %s3987_s12 = scalar_lea.vmem %s86_s23, 256  ;;  %p3992_p2 = scmp.lt.s32.totalorder %s86_s23, %s86_s23 }
  0x5f   :  { %p3988_p1 = scmp.ne.s32.totalorder %s86_s23, %s3987_s12  ;;  %p3993_p3 = scmp.lt.s32.totalorder %s3987_s12, %s3987_s12 }
  0x61   :  { %p3994_p4 = por %p3993_p3, %p3992_p2 }
  0x63   :  { %p3995_p5 = pnand %p3994_p4, %p3988_p1 }
  0x65   :  { %3998 = shalt.err (!%p3995_p5)
}
  0x66   :  { %s4042_s6 = smov 32   ;;  %s4043_s27 = smov 2  }
  0x67   :  { %91 = dma.hbm_to_vmem [thread:$0]  %s4264_s7, 256, %s86_s23, [#allocation12], %s4042_s6, %s4042_s6, %s4043_s27  }
  0x68   :  { %4021 = dma.done.wait [#allocation3], 768  }
  0x69   :  { %4022 = vsyncadd [#allocation3], 4294966528 }
  0x6a   :  { %4023 = dma.done.wait [#allocation6], 14368  }
  0x6b   :  { %4024 = vsyncadd [#allocation6], 4294952928 }
  0x6c   :  { %4025 = dma.done.wait [#allocation9], 65648  }
  0x6d   :  { %4026 = vsyncadd [#allocation9], 4294901648 }
  0x6e   :  { %4027 = dma.done.wait [#allocation12], 256  }
  0x6f   :  { %4028 = vsyncadd [#allocation12], 4294967040  ;;  %v123_v0 = vld [vmem:[#allocation7] sm:$0xff]  ;;  %v124_v1 = vld [vmem:[#allocation7 + $0x8] sm:$0xff]  ;;  %vm116_vm0 = vcmask 375808   ;;  %s4049_s30 = smov 23  }
  0x70   :  { %v125_v2 = vld [vmem:[#allocation7 + $0x10] sm:$0xff]  ;;  %v3084_v3 = vpack.c.bf16 %v124_v1, %v123_v0  ;;  %v126_v4 = vld [vmem:[#allocation7 + $0x18] sm:$0xff]  ;;  %v127_v6 = vld [vmem:[#allocation7 + $0x20] sm:$0xff] }
  0x71   :  { %v3088_v5 = vpack.c.bf16 %v126_v4, %v125_v2  ;;  %v128_v7 = vld [vmem:[#allocation7 + $0x28] sm:$0xff]  ;;  %v129_v10 = vld [vmem:[#allocation7 + $0x30] sm:$0xff]  ;;  %v130_v11 = vld [vmem:[#allocation7 + $0x38] sm:$0xff] }
  0x72   :  { %3085 = vmatprep.subr.bf16.mxu0 %v3084_v3  ;;  %v3092_v8 = vpack.c.bf16 %v128_v7, %v127_v6  ;;  %v110_v9 = vld [vmem:[%s4257_s0] sm:$0xff]  ;;  %v260_v12 = vld [vmem:[#allocation7 + $0x80] sm:$0xff]  ;;  %v263_v16 = vld [vmem:[#allocation7 + $0x98] sm:$0xff]  ;;  %v3096_v17 = vpack.c.bf16 %v130_v11, %v129_v10 }
  0x73   :  { %3087 = vmatpush3.bf16.msra.mxu0 %v3084_v3  ;;  %2799 = vmatprep.mubr.msk.f32.mxu0 %vm116_vm0, %v110_v9  ;;  %v261_v13 = vld [vmem:[#allocation7 + $0x88] sm:$0xff]  ;;  %v262_v15 = vld [vmem:[#allocation7 + $0x90] sm:$0xff]  ;;  %v264_v19 = vld [vmem:[#allocation7 + $0xa0] sm:$0xff] }
  0x74   :  { %3089 = vmatprep.subr.bf16.mxu0 %v3088_v5  ;;  %v3116_v14 = vpack.c.bf16 %v261_v13, %v260_v12  ;;  %v3120_v18 = vpack.c.bf16 %v263_v16, %v262_v15  ;;  %v265_v20 = vld [vmem:[#allocation7 + $0xa8] sm:$0xff]  ;;  %v131_v21 = vld [vmem:[#allocation7 + $0x40] sm:$0xff]  ;;  %v266_v25 = vld [vmem:[#allocation7 + $0xb0] sm:$0xff] }
  0x75   :  { %v132_v22 = vld [vmem:[#allocation7 + $0x48] sm:$0xff]  ;;  %v3124_v23 = vpack.c.bf16 %v265_v20, %v264_v19  ;;  %v267_v26 = vld [vmem:[#allocation7 + $0xb8] sm:$0xff]  ;;  %v133_v27 = vld [vmem:[#allocation7 + $0x50] sm:$0xff] }
  0x76   :  { %3117 = vmatprep.subr.bf16.mxu1 %v3116_v14  ;;  %v3100_v24 = vpack.c.bf16 %v132_v22, %v131_v21  ;;  %v134_v28 = vld [vmem:[#allocation7 + $0x58] sm:$0xff]  ;;  %v3128_v29 = vpack.c.bf16 %v267_v26, %v266_v25  ;;  %v268_v31 = vld [vmem:[#allocation7 + $0xc0] sm:$0xff]  ;;  %v269_v32 = vld [vmem:[#allocation7 + $0xc8] sm:$0xff] }
  0x77   :  { %3091 = vmatpush3.bf16.msra.mxu0 %v3088_v5  ;;  %3119 = vmatpush3.bf16.msra.mxu1 %v3116_v14  ;;  %v3104_v30 = vpack.c.bf16 %v134_v28, %v133_v27  ;;  %v135_v33 = vld [vmem:[#allocation7 + $0x60] sm:$0xff]  ;;  %v136_v34 = vld [vmem:[#allocation7 + $0x68] sm:$0xff]  ;;  %v3132_v35 = vpack.c.bf16 %v269_v32, %v268_v31  ;;  %v270_v37 = vld [vmem:[#allocation7 + $0xd0] sm:$0xff] }
  0x78   :  { %3093 = vmatprep.subr.bf16.mxu0 %v3092_v8  ;;  %3121 = vmatprep.subr.bf16.mxu1 %v3120_v18  ;;  %v3108_v36 = vpack.c.bf16 %v136_v34, %v135_v33  ;;  %v271_v38 = vld [vmem:[#allocation7 + $0xd8] sm:$0xff]  ;;  %v137_v39 = vld [vmem:[#allocation7 + $0x70] sm:$0xff]  ;;  %v113_v45 = vld [vmem:[%s4257_s0 + $0x18] sm:$0xff] }
  0x79   :  { %v138_v40 = vld [vmem:[#allocation7 + $0x78] sm:$0xff]  ;;  %v3136_v41 = vpack.c.bf16 %v271_v38, %v270_v37  ;;  %v114_v46 = vld [vmem:[%s4257_s0 + $0x20] sm:$0xff]  ;;  %v272_v48 = vld [vmem:[#allocation7 + $0xe0] sm:$0xff] }
  0x7a   :  { %v3112_v42 = vpack.c.bf16 %v138_v40, %v137_v39  ;;  %v111_v43 = vld [vmem:[%s4257_s0 + $0x8] sm:$0xff]  ;;  %v112_v44 = vld [vmem:[%s4257_s0 + $0x10] sm:$0xff]  ;;  %v273_v49 = vld [vmem:[#allocation7 + $0xe8] sm:$0xff] }
  0x7b   :  { %3095 = vmatpush3.bf16.msra.mxu0 %v3092_v8  ;;  %3123 = vmatpush3.bf16.msra.mxu1 %v3120_v18  ;;  %v115_v47 = vld [vmem:[%s4257_s0 + $0x28] sm:$0x3f]  ;;  %v3140_v50 = vpack.c.bf16 %v273_v49, %v272_v48  ;;  %v398_v54 = vld [vmem:[#allocation7 + $0x100] sm:$0xff]  ;;  %v399_v55 = vld [vmem:[#allocation7 + $0x108] sm:$0xff] }
  0x7c   :  { %3097 = vmatprep.subr.bf16.mxu0 %v3096_v17  ;;  %3125 = vmatprep.subr.bf16.mxu1 %v3124_v23  ;;  %v274_v51 = vld [vmem:[#allocation7 + $0xf0] sm:$0xff]  ;;  %v275_v52 = vld [vmem:[#allocation7 + $0xf8] sm:$0xff]  ;;  %v3148_v57 = vpack.c.bf16 %v399_v55, %v398_v54  ;;  %v402_v60 = vld [vmem:[#allocation7 + $0x120] sm:$0xff] }
  0x7d   :  { %v3144_v53 = vpack.c.bf16 %v275_v52, %v274_v51  ;;  %v400_v56 = vld [vmem:[#allocation7 + $0x110] sm:$0xff]  ;;  %v401_v58 = vld [vmem:[#allocation7 + $0x118] sm:$0xff]  ;;  %v403_v61 = vld [vmem:[#allocation7 + $0x128] sm:$0xff] }
  0x7e   :  { %v3152_v59 = vpack.c.bf16 %v401_v58, %v400_v56  ;;  %v3156_v62 = vpack.c.bf16 %v403_v61, %v402_v60  ;;  %v404_v63 = vld [vmem:[#allocation7 + $0x130] sm:$0xff]  ;;  %v405_v0 = vld [vmem:[#allocation7 + $0x138] sm:$0xff]  ;;  %v406_v2 = vld [vmem:[#allocation7 + $0x140] sm:$0xff] }
  0x7f   :  { %3099 = vmatpush3.bf16.msra.mxu0 %v3096_v17  ;;  %3127 = vmatpush3.bf16.msra.mxu1 %v3124_v23  ;;  %v3160_v1 = vpack.c.bf16 %v405_v0, %v404_v63  ;;  %v407_v3 = vld [vmem:[#allocation7 + $0x148] sm:$0xff]  ;;  %v408_v5 = vld [vmem:[#allocation7 + $0x150] sm:$0xff]  ;;  %v409_v6 = vld [vmem:[#allocation7 + $0x158] sm:$0xff] }
  0x80   :  { %3101 = vmatprep.subr.bf16.mxu0 %v3100_v24  ;;  %3129 = vmatprep.subr.bf16.mxu1 %v3128_v29  ;;  %v3164_v4 = vpack.c.bf16 %v407_v3, %v406_v2  ;;  %v3168_v7 = vpack.c.bf16 %v409_v6, %v408_v5  ;;  %v2580_v8 = vld [vmem:[#allocation8] ss:$0 sm:$0xff]  ;;  %v411_v34 = vld [vmem:[#allocation7 + $0x168] sm:$0xff]  ;;  %v413_v37 = vld [vmem:[#allocation7 + $0x178] sm:$0xff] }
  0x81   :  { %v410_v33 = vld [vmem:[#allocation7 + $0x160] sm:$0xff]  ;;  %v537_v40 = vld [vmem:[#allocation7 + $0x188] sm:$0xff]  ;;  %v542_v48 = vld [vmem:[#allocation7 + $0x1b0] sm:$0xff] }
  0x82   :  { %v536_v39 = vld [vmem:[#allocation7 + $0x180] sm:$0xff]  ;;  %v543_v49 = vld [vmem:[#allocation7 + $0x1b8] sm:$0xff]  ;;  %v545_v52 = vld [vmem:[#allocation7 + $0x1c8] sm:$0xff] }
  0x83   :  { %3103 = vmatpush3.bf16.msra.mxu0 %v3100_v24  ;;  %3131 = vmatpush3.bf16.msra.mxu1 %v3128_v29  ;;  %v544_v51 = vld [vmem:[#allocation7 + $0x1c0] sm:$0xff]  ;;  %v546_v54 = vld [vmem:[#allocation7 + $0x1d0] sm:$0xff]  ;;  %v547_v55 = vld [vmem:[#allocation7 + $0x1d8] sm:$0xff] }
  0x84   :  { %3105 = vmatprep.subr.bf16.mxu0 %v3104_v30  ;;  %3133 = vmatprep.subr.bf16.mxu1 %v3132_v35  ;;  %v3200_v56 = vpack.c.bf16 %v547_v55, %v546_v54 }
  0x87   :  { %3107 = vmatpush3.bf16.msra.mxu0 %v3104_v30  ;;  %3135 = vmatpush3.bf16.msra.mxu1 %v3132_v35  ;;  %v3172_v35 = vpack.c.bf16 %v411_v34, %v410_v33  ;;  %v680_v33 = vld [vmem:[#allocation7 + $0x230] sm:$0xff]  ;;  %v681_v34 = vld [vmem:[#allocation7 + $0x238] sm:$0xff] }
  0x88   :  { %3109 = vmatprep.subr.bf16.mxu0 %v3108_v36  ;;  %3137 = vmatprep.subr.bf16.mxu1 %v3136_v41 }
  0x8b   :  { %3111 = vmatpush3.bf16.msra.mxu0 %v3108_v36  ;;  %3139 = vmatpush3.bf16.msra.mxu1 %v3136_v41  ;;  %v412_v36 = vld [vmem:[#allocation7 + $0x170] sm:$0xff] }
  0x8c   :  { %3113 = vmatprep.subr.bf16.mxu0 %v3112_v42  ;;  %3141 = vmatprep.subr.bf16.mxu1 %v3140_v50  ;;  %v3176_v38 = vpack.c.bf16 %v413_v37, %v412_v36  ;;  %v538_v41 = vld [vmem:[#allocation7 + $0x190] sm:$0xff]  ;;  %v682_v36 = vld [vmem:[#allocation7 + $0x240] sm:$0xff]  ;;  %v683_v37 = vld [vmem:[#allocation7 + $0x248] sm:$0xff] }
  0x8f   :  { %3115 = vmatpush3.bf16.msra.mxu0 %v3112_v42  ;;  %3143 = vmatpush3.bf16.msra.mxu1 %v3140_v50  ;;  %v3180_v42 = vpack.c.bf16 %v537_v40, %v536_v39  ;;  %v3192_v50 = vpack.c.bf16 %v543_v49, %v542_v48  ;;  %v684_v39 = vld [vmem:[#allocation7 + $0x250] sm:$0xff]  ;;  %v685_v40 = vld [vmem:[#allocation7 + $0x258] sm:$0xff] }
  0x90   :  { %3145 = vmatprep.subr.bf16.mxu1 %v3144_v53  ;;  %3149 = vmatprep.subr.bf16.mxu0 %v3148_v57 }
  0x92   :  { %2800 = vmatmul.mubr.msk.f32.vlgmr.msra.gmra.mrb[0].mxu0 %vm116_vm0, %v111_v43  ;;  %v539_v43 = vld [vmem:[#allocation7 + $0x198] sm:$0xff] }
  0x93   :  { %2802 = vmatprep.mubr.msk.f32.mxu0 %vm116_vm0, %v112_v44  ;;  %3147 = vmatpush3.bf16.msra.mxu1 %v3144_v53  ;;  %v3184_v44 = vpack.c.bf16 %v539_v43, %v538_v41  ;;  %v3196_v53 = vpack.c.bf16 %v545_v52, %v544_v51  ;;  %v3232_v41 = vpack.c.bf16 %v685_v40, %v684_v39 }
  0x94   :  { %3151 = vmatpush3.bf16.msra.mxu0 %v3148_v57  ;;  %3181 = vmatprep.subr.bf16.mxu1 %v3180_v42  ;;  %v2587_v57 = vld [vmem:[#allocation8 + $0x1] ss:$0 sm:$0xff] }
  0x95   :  { %3153 = vmatprep.subr.bf16.mxu0 %v3152_v59 }
  0x96   :  { %2803 = vmatmul.mubr.msk.f32.gmra.mrb[2].mxu0 %vm116_vm0, %v113_v45  ;;  %v540_v45 = vld [vmem:[#allocation7 + $0x1a0] sm:$0xff] }
  0x97   :  { %2805 = vmatprep.mubr.msk.f32.mxu0 %vm116_vm0, %v114_v46  ;;  %v541_v46 = vld [vmem:[#allocation7 + $0x1a8] sm:$0xff] }
  0x98   :  { %3155 = vmatpush3.bf16.msra.mxu0 %v3152_v59 }
  0x99   :  { %3157 = vmatprep.subr.bf16.mxu0 %v3156_v62 }
  0x9a   :  { %2806 = vmatmul.mubr.msk.f32.gmra.mrb[4].mxu0 %vm116_vm0, %v115_v47  ;;  %v3188_v47 = vpack.c.bf16 %v541_v46, %v540_v45 }
  0x9c   :  { %3159 = vmatpush3.bf16.msra.mxu0 %v3156_v62 }
  0x9d   :  { %3161 = vmatprep.subr.bf16.mxu0 %v3160_v1 }
  0xa0   :  { %3163 = vmatpush3.bf16.msra.mxu0 %v3160_v1 }
  0xa1   :  { %3165 = vmatprep.subr.bf16.mxu0 %v3164_v4 }
  0xa4   :  { %3167 = vmatpush3.bf16.msra.mxu0 %v3164_v4 }
  0xa5   :  { %3169 = vmatprep.subr.bf16.mxu0 %v3168_v7 }
  0xa8   :  { %3171 = vmatpush3.bf16.msra.mxu0 %v3168_v7 }
  0xa9   :  { %3173 = vmatprep.subr.bf16.mxu0 %v3172_v35 }
  0xac   :  { %3175 = vmatpush3.bf16.msra.mxu0 %v3172_v35  ;;  %v3224_v35 = vpack.c.bf16 %v681_v34, %v680_v33 }
  0xad   :  { %3177 = vmatprep.subr.bf16.mxu0 %v3176_v38 }
  0xb0   :  { %3179 = vmatpush3.bf16.msra.mxu0 %v3176_v38  ;;  %v3228_v38 = vpack.c.bf16 %v683_v37, %v682_v36 }
 0x165   :  { %v2801_v9 = vpop.f32.mrb[0].mxu0 }
 0x166   :  { %v218_v10 = vadd.f32 %v2801_v9, %v2580_v8  ;;  %v212_v11 = vpop.f32.mrb[1].mxu0 }
 0x167   :  { %v213_v12 = vadd.f32 %v2580_v8, %v212_v11 }
 0x168   :  { %v248_v13 = vmul.f32 0.01, %v218_v10  ;;  %vm242_vm2 = vcmp.gt.f32.partialorder %v218_v10, 0.0 }
 0x169   :  { %v2804_v14 = vpop.f32.mrb[2].mxu0  ;;  %vm241_vm1 = vcmp.gt.f32.partialorder %v213_v12, 0.0  ;;  %v247_v15 = vmul.f32 0.01, %v213_v12 }
 0x16a   :  { %v228_v16 = vadd.f32 %v2804_v14, %v2580_v8  ;;  %v222_v17 = vpop.f32.mrb[3].mxu0  ;;  %v254_v21 = vsel %vm242_vm2, %v218_v10, %v248_v13 }
 0x16b   :  { %v223_v18 = vadd.f32 %v2580_v8, %v222_v17  ;;  %v253_v19 = vsel %vm241_vm1, %v213_v12, %v247_v15 }
 0x16c   :  { %v250_v20 = vmul.f32 0.01, %v228_v16  ;;  %2840 = vmatprep.mubr.f32.mxu1 %v253_v19  ;;  %vm244_vm4 = vcmp.gt.f32.partialorder %v228_v16, 0.0  ;;  %v549_v19 = vld [vmem:[#allocation7 + $0x1e8] sm:$0xff] }
 0x16d   :  { %v249_v22 = vmul.f32 0.01, %v223_v18  ;;  %v2807_v23 = vpop.f32.mrb[4].mxu0  ;;  %2841 = vmatmul.mubr.f32.vlgmr.msra.gmra.mrb[0].mxu1 %v254_v21  ;;  %vm243_vm3 = vcmp.gt.f32.partialorder %v223_v18, 0.0  ;;  %v550_v21 = vld [vmem:[#allocation7 + $0x1f0] sm:$0xff] }
 0x16e   :  { %v238_v24 = vadd.f32 %v2807_v23, %v2580_v8  ;;  %v232_v25 = vpop.f32.mrb[5].mxu0  ;;  %v256_v29 = vsel %vm244_vm4, %v228_v16, %v250_v20  ;;  %3183 = vmatpush3.bf16.msra.mxu1 %v3180_v42  ;;  %v2588_v42 = vld [vmem:[#allocation8 + $0x2] ss:$0 sm:$0xff] }
 0x16f   :  { %v233_v26 = vadd.f32 %v2580_v8, %v232_v25  ;;  %v255_v27 = vsel %vm243_vm3, %v223_v18, %v249_v22  ;;  %3185 = vmatprep.subr.bf16.mxu1 %v3184_v44  ;;  %v548_v18 = vld [vmem:[#allocation7 + $0x1e0] sm:$0xff]  ;;  %v551_v22 = vld [vmem:[#allocation7 + $0x1f8] sm:$0xff]  ;;  %v675_v25 = vld [vmem:[#allocation7 + $0x208] sm:$0xff] }
 0x170   :  { %v252_v28 = vmul.f32 0.01, %v238_v24  ;;  %2843 = vmatprep.mubr.f32.mxu1 %v255_v27  ;;  %vm246_vm5 = vcmp.gt.f32.partialorder %v238_v24, 0.0  ;;  %v3204_v20 = vpack.c.bf16 %v549_v19, %v548_v18  ;;  %v3208_v23 = vpack.c.bf16 %v551_v22, %v550_v21  ;;  %v818_v18 = vld [vmem:[#allocation7 + $0x2b0] sm:$0xff]  ;;  %v819_v19 = vld [vmem:[#allocation7 + $0x2b8] sm:$0xff]  ;;  %v820_v21 = vld [vmem:[#allocation7 + $0x2c0] sm:$0xff] }
 0x171   :  { %v251_v30 = vmul.f32 0.01, %v233_v26  ;;  %2844 = vmatmul.mubr.f32.gmra.mrb[2].mxu1 %v256_v29  ;;  %vm245_vm6 = vcmp.gt.f32.partialorder %v233_v26, 0.0  ;;  %v821_v22 = vld [vmem:[#allocation7 + $0x2c8] sm:$0xff] }
 0x172   :  { %v258_v31 = vsel %vm246_vm5, %v238_v24, %v252_v28  ;;  %3187 = vmatpush3.bf16.msra.mxu1 %v3184_v44  ;;  %v674_v24 = vld [vmem:[#allocation7 + $0x200] sm:$0xff]  ;;  %v677_v28 = vld [vmem:[#allocation7 + $0x218] sm:$0xff] }
 0x173   :  { %v257_v32 = vsel %vm245_vm6, %v233_v26, %v251_v30  ;;  %3189 = vmatprep.subr.bf16.mxu1 %v3188_v47  ;;  %v676_v26 = vld [vmem:[#allocation7 + $0x210] sm:$0xff]  ;;  %v3212_v27 = vpack.c.bf16 %v675_v25, %v674_v24  ;;  %v678_v30 = vld [vmem:[#allocation7 + $0x220] sm:$0xff]  ;;  %v823_v25 = vld [vmem:[#allocation7 + $0x2d8] sm:$0xff] }
 0x174   :  { %2846 = vmatprep.mubr.f32.mxu1 %v257_v32  ;;  %v3216_v29 = vpack.c.bf16 %v677_v28, %v676_v26  ;;  %v822_v24 = vld [vmem:[#allocation7 + $0x2d0] sm:$0xff] }
 0x175   :  { %2847 = vmatmul.mubr.f32.gmra.mrb[4].mxu1 %v258_v31  ;;  %v679_v31 = vld [vmem:[#allocation7 + $0x228] sm:$0xff]  ;;  %3213 = vmatprep.subr.bf16.mxu0 %v3212_v27  ;;  %v3264_v26 = vpack.c.bf16 %v823_v25, %v822_v24 }
 0x176   :  { %3191 = vmatpush3.bf16.msra.mxu1 %v3188_v47  ;;  %v3220_v32 = vpack.c.bf16 %v679_v31, %v678_v30 }
 0x177   :  { %3193 = vmatprep.subr.bf16.mxu1 %v3192_v50 }
 0x17a   :  { %3195 = vmatpush3.bf16.msra.mxu1 %v3192_v50 }
 0x17b   :  { %3197 = vmatprep.subr.bf16.mxu1 %v3196_v53 }
 0x17e   :  { %3199 = vmatpush3.bf16.msra.mxu1 %v3196_v53 }
 0x17f   :  { %3201 = vmatprep.subr.bf16.mxu1 %v3200_v56 }
 0x182   :  { %3203 = vmatpush3.bf16.msra.mxu1 %v3200_v56 }
 0x183   :  { %3205 = vmatprep.subr.bf16.mxu1 %v3204_v20 }
 0x186   :  { %3207 = vmatpush3.bf16.msra.mxu1 %v3204_v20  ;;  %v3256_v20 = vpack.c.bf16 %v819_v19, %v818_v18 }
 0x187   :  { %3209 = vmatprep.subr.bf16.mxu1 %v3208_v23 }
 0x18a   :  { %3211 = vmatpush3.bf16.msra.mxu1 %v3208_v23  ;;  %v3260_v23 = vpack.c.bf16 %v821_v22, %v820_v21 }
 0x240   :  { %v2842_v58 = vpop.f32.mrb[0].mxu1 }
 0x241   :  { %v356_v59 = vadd.f32 %v2842_v58, %v2587_v57  ;;  %v350_v60 = vpop.f32.mrb[1].mxu1 }
 0x242   :  { %v351_v61 = vadd.f32 %v2587_v57, %v350_v60 }
 0x243   :  { %v386_v62 = vmul.f32 0.01, %v356_v59  ;;  %vm380_vm7 = vcmp.gt.f32.partialorder %v356_v59, 0.0 }
 0x244   :  { %v385_v63 = vmul.f32 0.01, %v351_v61  ;;  %v2845_v0 = vpop.f32.mrb[2].mxu1  ;;  %vm379_vm8 = vcmp.gt.f32.partialorder %v351_v61, 0.0 }
 0x245   :  { %v366_v1 = vadd.f32 %v2845_v0, %v2587_v57  ;;  %v360_v2 = vpop.f32.mrb[3].mxu1  ;;  %v392_v5 = vsel %vm380_vm7, %v356_v59, %v386_v62 }
 0x246   :  { %v361_v3 = vadd.f32 %v2587_v57, %v360_v2  ;;  %v391_v4 = vsel %vm379_vm8, %v351_v61, %v385_v63 }
 0x247   :  { %v388_v6 = vmul.f32 0.01, %v366_v1  ;;  %2881 = vmatprep.mubr.f32.mxu0 %v391_v4  ;;  %vm382_vm10 = vcmp.gt.f32.partialorder %v366_v1, 0.0  ;;  %v687_v4 = vld [vmem:[#allocation7 + $0x268] sm:$0xff] }
 0x248   :  { %v387_v7 = vmul.f32 0.01, %v361_v3  ;;  %v2848_v8 = vpop.f32.mrb[4].mxu1  ;;  %2882 = vmatmul.mubr.f32.vlgmr.msra.gmra.mrb[6].mxu0 %v392_v5  ;;  %vm381_vm9 = vcmp.gt.f32.partialorder %v361_v3, 0.0 }
 0x249   :  { %v376_v9 = vadd.f32 %v2848_v8, %v2587_v57  ;;  %v370_v10 = vpop.f32.mrb[5].mxu1  ;;  %v394_v14 = vsel %vm382_vm10, %v366_v1, %v388_v6  ;;  %3215 = vmatpush3.bf16.msra.mxu0 %v3212_v27  ;;  %v688_v6 = vld [vmem:[#allocation7 + $0x270] sm:$0xff]  ;;  %v2589_v27 = vld [vmem:[#allocation8 + $0x3] ss:$0 sm:$0xff] }
 0x24a   :  { %v371_v11 = vadd.f32 %v2587_v57, %v370_v10  ;;  %v393_v12 = vsel %vm381_vm9, %v361_v3, %v387_v7  ;;  %3217 = vmatprep.subr.bf16.mxu0 %v3216_v29  ;;  %v686_v3 = vld [vmem:[#allocation7 + $0x260] sm:$0xff]  ;;  %v689_v7 = vld [vmem:[#allocation7 + $0x278] sm:$0xff]  ;;  %v813_v10 = vld [vmem:[#allocation7 + $0x288] sm:$0xff] }
 0x24b   :  { %v390_v13 = vmul.f32 0.01, %v376_v9  ;;  %2884 = vmatprep.mubr.f32.mxu0 %v393_v12  ;;  %vm384_vm12 = vcmp.gt.f32.partialorder %v376_v9, 0.0  ;;  %v3236_v5 = vpack.c.bf16 %v687_v4, %v686_v3  ;;  %v3240_v8 = vpack.c.bf16 %v689_v7, %v688_v6  ;;  %v956_v3 = vld [vmem:[#allocation7 + $0x330] sm:$0xff]  ;;  %v957_v4 = vld [vmem:[#allocation7 + $0x338] sm:$0xff]  ;;  %v958_v6 = vld [vmem:[#allocation7 + $0x340] sm:$0xff] }
 0x24c   :  { %v389_v15 = vmul.f32 0.01, %v371_v11  ;;  %2885 = vmatmul.mubr.f32.gmra.mrb[8].mxu0 %v394_v14  ;;  %vm383_vm11 = vcmp.gt.f32.partialorder %v371_v11, 0.0  ;;  %v959_v7 = vld [vmem:[#allocation7 + $0x348] sm:$0xff] }
 0x24d   :  { %v396_v17 = vsel %vm384_vm12, %v376_v9, %v390_v13  ;;  %3219 = vmatpush3.bf16.msra.mxu0 %v3216_v29  ;;  %v812_v9 = vld [vmem:[#allocation7 + $0x280] sm:$0xff]  ;;  %v815_v13 = vld [vmem:[#allocation7 + $0x298] sm:$0xff] }
 0x24e   :  { %v395_v16 = vsel %vm383_vm11, %v371_v11, %v389_v15  ;;  %3221 = vmatprep.subr.bf16.mxu0 %v3220_v32  ;;  %v814_v11 = vld [vmem:[#allocation7 + $0x290] sm:$0xff]  ;;  %v3244_v12 = vpack.c.bf16 %v813_v10, %v812_v9  ;;  %v816_v15 = vld [vmem:[#allocation7 + $0x2a0] sm:$0xff]  ;;  %v961_v10 = vld [vmem:[#allocation7 + $0x358] sm:$0xff] }
 0x24f   :  { %2887 = vmatprep.mubr.f32.mxu0 %v395_v16  ;;  %v3248_v14 = vpack.c.bf16 %v815_v13, %v814_v11  ;;  %v817_v16 = vld [vmem:[#allocation7 + $0x2a8] sm:$0xff]  ;;  %v960_v9 = vld [vmem:[#allocation7 + $0x350] sm:$0xff] }
 0x250   :  { %2888 = vmatmul.mubr.f32.gmra.mrb[10].mxu0 %v396_v17  ;;  %3245 = vmatprep.subr.bf16.mxu1 %v3244_v12  ;;  %v3252_v17 = vpack.c.bf16 %v817_v16, %v816_v15  ;;  %v3296_v11 = vpack.c.bf16 %v961_v10, %v960_v9 }
 0x251   :  { %3223 = vmatpush3.bf16.msra.mxu0 %v3220_v32 }
 0x252   :  { %3225 = vmatprep.subr.bf16.mxu0 %v3224_v35 }
 0x255   :  { %3227 = vmatpush3.bf16.msra.mxu0 %v3224_v35 }
 0x256   :  { %3229 = vmatprep.subr.bf16.mxu0 %v3228_v38 }
 0x259   :  { %3231 = vmatpush3.bf16.msra.mxu0 %v3228_v38 }
 0x25a   :  { %3233 = vmatprep.subr.bf16.mxu0 %v3232_v41 }
 0x25d   :  { %3235 = vmatpush3.bf16.msra.mxu0 %v3232_v41 }
 0x25e   :  { %3237 = vmatprep.subr.bf16.mxu0 %v3236_v5 }
 0x261   :  { %3239 = vmatpush3.bf16.msra.mxu0 %v3236_v5  ;;  %v3288_v5 = vpack.c.bf16 %v957_v4, %v956_v3  ;;  %v4044_v4 = vmov 0  }
 0x262   :  { %3241 = vmatprep.subr.bf16.mxu0 %v3240_v8  ;;  %3861 = vset.pattern.permute.xlu0 %v4044_v4 }
 0x263   :  { %3863 = vset.pattern.permute.xlu1 %v4044_v4 }
 0x265   :  { %3243 = vmatpush3.bf16.msra.mxu0 %v3240_v8  ;;  %v3292_v8 = vpack.c.bf16 %v959_v7, %v958_v6 }
 0x31b   :  { %v2883_v43 = vpop.f32.mrb[6].mxu0 }
 0x31c   :  { %v494_v44 = vadd.f32 %v2883_v43, %v2588_v42  ;;  %v488_v45 = vpop.f32.mrb[7].mxu0 }
 0x31d   :  { %v489_v46 = vadd.f32 %v2588_v42, %v488_v45 }
 0x31e   :  { %v524_v47 = vmul.f32 0.01, %v494_v44  ;;  %vm518_vm13 = vcmp.gt.f32.partialorder %v494_v44, 0.0 }
 0x31f   :  { %v523_v48 = vmul.f32 0.01, %v489_v46  ;;  %v2886_v49 = vpop.f32.mrb[8].mxu0  ;;  %vm517_vm14 = vcmp.gt.f32.partialorder %v489_v46, 0.0 }
 0x320   :  { %v504_v50 = vadd.f32 %v2886_v49, %v2588_v42  ;;  %v498_v51 = vpop.f32.mrb[9].mxu0  ;;  %v530_v54 = vsel %vm518_vm13, %v494_v44, %v524_v47 }
 0x321   :  { %v499_v52 = vadd.f32 %v2588_v42, %v498_v51  ;;  %v529_v53 = vsel %vm517_vm14, %v489_v46, %v523_v48 }
 0x322   :  { %v526_v55 = vmul.f32 0.01, %v504_v50  ;;  %2922 = vmatprep.mubr.f32.mxu1 %v529_v53  ;;  %vm520_vm1 = vcmp.gt.f32.partialorder %v504_v50, 0.0  ;;  %v825_v53 = vld [vmem:[#allocation7 + $0x2e8] sm:$0xff] }
 0x323   :  { %v525_v56 = vmul.f32 0.01, %v499_v52  ;;  %v2889_v57 = vpop.f32.mrb[10].mxu0  ;;  %2923 = vmatmul.mubr.f32.vlgmr.msra.gmra.mrb[6].mxu1 %v530_v54  ;;  %vm519_vm15 = vcmp.gt.f32.partialorder %v499_v52, 0.0 }
 0x324   :  { %v514_v58 = vadd.f32 %v2889_v57, %v2588_v42  ;;  %v508_v59 = vpop.f32.mrb[11].mxu0  ;;  %v532_v63 = vsel %vm520_vm1, %v504_v50, %v526_v55  ;;  %3247 = vmatpush3.bf16.msra.mxu1 %v3244_v12  ;;  %v826_v55 = vld [vmem:[#allocation7 + $0x2f0] sm:$0xff]  ;;  %v2590_v12 = vld [vmem:[#allocation8 + $0x4] ss:$0 sm:$0xff] }
 0x325   :  { %v509_v60 = vadd.f32 %v2588_v42, %v508_v59  ;;  %v531_v61 = vsel %vm519_vm15, %v499_v52, %v525_v56  ;;  %3249 = vmatprep.subr.bf16.mxu1 %v3248_v14  ;;  %v824_v52 = vld [vmem:[#allocation7 + $0x2e0] sm:$0xff]  ;;  %v827_v56 = vld [vmem:[#allocation7 + $0x2f8] sm:$0xff]  ;;  %v951_v59 = vld [vmem:[#allocation7 + $0x308] sm:$0xff] }
 0x326   :  { %v528_v62 = vmul.f32 0.01, %v514_v58  ;;  %2925 = vmatprep.mubr.f32.mxu1 %v531_v61  ;;  %vm522_vm3 = vcmp.gt.f32.partialorder %v514_v58, 0.0  ;;  %v3268_v54 = vpack.c.bf16 %v825_v53, %v824_v52  ;;  %v3272_v57 = vpack.c.bf16 %v827_v56, %v826_v55 }
 0x327   :  { %v527_v0 = vmul.f32 0.01, %v509_v60  ;;  %2926 = vmatmul.mubr.f32.gmra.mrb[8].mxu1 %v532_v63  ;;  %vm521_vm2 = vcmp.gt.f32.partialorder %v509_v60, 0.0 }
 0x328   :  { %v534_v2 = vsel %vm522_vm3, %v514_v58, %v528_v62  ;;  %3251 = vmatpush3.bf16.msra.mxu1 %v3248_v14  ;;  %v950_v58 = vld [vmem:[#allocation7 + $0x300] sm:$0xff]  ;;  %v953_v62 = vld [vmem:[#allocation7 + $0x318] sm:$0xff] }
 0x329   :  { %v533_v1 = vsel %vm521_vm2, %v509_v60, %v527_v0  ;;  %3253 = vmatprep.subr.bf16.mxu1 %v3252_v17  ;;  %v952_v60 = vld [vmem:[#allocation7 + $0x310] sm:$0xff]  ;;  %v3276_v61 = vpack.c.bf16 %v951_v59, %v950_v58  ;;  %v954_v0 = vld [vmem:[#allocation7 + $0x320] sm:$0xff] }
 0x32a   :  { %2928 = vmatprep.mubr.f32.mxu1 %v533_v1  ;;  %v3280_v63 = vpack.c.bf16 %v953_v62, %v952_v60  ;;  %v955_v1 = vld [vmem:[#allocation7 + $0x328] sm:$0xff] }
 0x32b   :  { %2929 = vmatmul.mubr.f32.gmra.mrb[10].mxu1 %v534_v2  ;;  %3277 = vmatprep.subr.bf16.mxu0 %v3276_v61  ;;  %v3284_v2 = vpack.c.bf16 %v955_v1, %v954_v0 }
 0x32c   :  { %3255 = vmatpush3.bf16.msra.mxu1 %v3252_v17 }
 0x32d   :  { %3257 = vmatprep.subr.bf16.mxu1 %v3256_v20 }
 0x330   :  { %3259 = vmatpush3.bf16.msra.mxu1 %v3256_v20 }
 0x331   :  { %3261 = vmatprep.subr.bf16.mxu1 %v3260_v23 }
 0x334   :  { %3263 = vmatpush3.bf16.msra.mxu1 %v3260_v23 }
 0x335   :  { %3265 = vmatprep.subr.bf16.mxu1 %v3264_v26 }
 0x338   :  { %3267 = vmatpush3.bf16.msra.mxu1 %v3264_v26 }
 0x339   :  { %3269 = vmatprep.subr.bf16.mxu1 %v3268_v54 }
 0x33c   :  { %3271 = vmatpush3.bf16.msra.mxu1 %v3268_v54 }
 0x33d   :  { %3273 = vmatprep.subr.bf16.mxu1 %v3272_v57 }
 0x340   :  { %3275 = vmatpush3.bf16.msra.mxu1 %v3272_v57 }
 0x3f6   :  { %v2924_v28 = vpop.f32.mrb[6].mxu1 }
 0x3f7   :  { %v632_v29 = vadd.f32 %v2924_v28, %v2589_v27  ;;  %v626_v30 = vpop.f32.mrb[7].mxu1 }
 0x3f8   :  { %v627_v31 = vadd.f32 %v2589_v27, %v626_v30 }
 0x3f9   :  { %v662_v32 = vmul.f32 0.01, %v632_v29  ;;  %vm656_vm4 = vcmp.gt.f32.partialorder %v632_v29, 0.0 }
 0x3fa   :  { %v661_v33 = vmul.f32 0.01, %v627_v31  ;;  %v2927_v34 = vpop.f32.mrb[8].mxu1  ;;  %vm655_vm5 = vcmp.gt.f32.partialorder %v627_v31, 0.0 }
 0x3fb   :  { %v642_v35 = vadd.f32 %v2927_v34, %v2589_v27  ;;  %v636_v36 = vpop.f32.mrb[9].mxu1  ;;  %v668_v39 = vsel %vm656_vm4, %v632_v29, %v662_v32 }
 0x3fc   :  { %v637_v37 = vadd.f32 %v2589_v27, %v636_v36  ;;  %v667_v38 = vsel %vm655_vm5, %v627_v31, %v661_v33 }
 0x3fd   :  { %v664_v40 = vmul.f32 0.01, %v642_v35  ;;  %2963 = vmatprep.mubr.f32.mxu0 %v667_v38  ;;  %vm658_vm7 = vcmp.gt.f32.partialorder %v642_v35, 0.0  ;;  %v963_v38 = vld [vmem:[#allocation7 + $0x368] sm:$0xff] }
 0x3fe   :  { %v663_v41 = vmul.f32 0.01, %v637_v37  ;;  %v2930_v42 = vpop.f32.mrb[10].mxu1  ;;  %2964 = vmatmul.mubr.f32.vlgmr.msra.gmra.mrb[12].mxu0 %v668_v39  ;;  %vm657_vm6 = vcmp.gt.f32.partialorder %v637_v37, 0.0 }
 0x3ff   :  { %v652_v43 = vadd.f32 %v2930_v42, %v2589_v27  ;;  %v646_v44 = vpop.f32.mrb[11].mxu1  ;;  %v670_v48 = vsel %vm658_vm7, %v642_v35, %v664_v40  ;;  %3279 = vmatpush3.bf16.msra.mxu0 %v3276_v61  ;;  %v964_v40 = vld [vmem:[#allocation7 + $0x370] sm:$0xff] }
 0x400   :  { %v647_v45 = vadd.f32 %v2589_v27, %v646_v44  ;;  %v669_v46 = vsel %vm657_vm6, %v637_v37, %v663_v41  ;;  %3281 = vmatprep.subr.bf16.mxu0 %v3280_v63  ;;  %v962_v37 = vld [vmem:[#allocation7 + $0x360] sm:$0xff]  ;;  %v965_v41 = vld [vmem:[#allocation7 + $0x378] sm:$0xff] }
 0x401   :  { %v666_v47 = vmul.f32 0.01, %v652_v43  ;;  %2966 = vmatprep.mubr.f32.mxu0 %v669_v46  ;;  %vm660_vm9 = vcmp.gt.f32.partialorder %v652_v43, 0.0  ;;  %v3300_v39 = vpack.c.bf16 %v963_v38, %v962_v37  ;;  %v3304_v42 = vpack.c.bf16 %v965_v41, %v964_v40  ;;  %v1090_v41 = vld [vmem:[#allocation2 + $0x18] sm:$0xff] }
 0x402   :  { %v665_v49 = vmul.f32 0.01, %v647_v45  ;;  %2967 = vmatmul.mubr.f32.gmra.mrb[14].mxu0 %v670_v48  ;;  %vm659_vm8 = vcmp.gt.f32.partialorder %v647_v45, 0.0 }
 0x403   :  { %v672_v51 = vsel %vm660_vm9, %v652_v43, %v666_v47  ;;  %3283 = vmatpush3.bf16.msra.mxu0 %v3280_v63  ;;  %v2591_v43 = vld [vmem:[#allocation8 + $0x5] ss:$0 sm:$0xff] }
 0x404   :  { %v671_v50 = vsel %vm659_vm8, %v647_v45, %v665_v49  ;;  %3285 = vmatprep.subr.bf16.mxu0 %v3284_v2 }
 0x405   :  { %2969 = vmatprep.mubr.f32.mxu0 %v671_v50 }
 0x406   :  { %2970 = vmatmul.mubr.f32.gmra.mrb[16].mxu0 %v672_v51 }
 0x407   :  { %3287 = vmatpush3.bf16.msra.mxu0 %v3284_v2 }
 0x408   :  { %3289 = vmatprep.subr.bf16.mxu0 %v3288_v5 }
 0x40b   :  { %3291 = vmatpush3.bf16.msra.mxu0 %v3288_v5  ;;  %v2592_v5 = vld [vmem:[#allocation8 + $0x6] ss:$0 sm:$0xff] }
 0x40c   :  { %3293 = vmatprep.subr.bf16.mxu0 %v3292_v8 }
 0x40f   :  { %3295 = vmatpush3.bf16.msra.mxu0 %v3292_v8 }
 0x410   :  { %3297 = vmatprep.subr.bf16.mxu0 %v3296_v11 }
 0x413   :  { %3299 = vmatpush3.bf16.msra.mxu0 %v3296_v11 }
 0x414   :  { %3301 = vmatprep.subr.bf16.mxu0 %v3300_v39 }
 0x417   :  { %3303 = vmatpush3.bf16.msra.mxu0 %v3300_v39 }
 0x418   :  { %3305 = vmatprep.subr.bf16.mxu0 %v3304_v42 }
 0x41b   :  { %3307 = vmatpush3.bf16.msra.mxu0 %v3304_v42  ;;  %v1089_v42 = vld [vmem:[#allocation2 + $0x10] sm:$0xff] }
 0x4d1   :  { %v2965_v13 = vpop.f32.mrb[12].mxu0 }
 0x4d2   :  { %v770_v14 = vadd.f32 %v2965_v13, %v2590_v12  ;;  %v764_v15 = vpop.f32.mrb[13].mxu0 }
 0x4d3   :  { %v765_v16 = vadd.f32 %v2590_v12, %v764_v15 }
 0x4d4   :  { %v800_v17 = vmul.f32 0.01, %v770_v14  ;;  %vm794_vm10 = vcmp.gt.f32.partialorder %v770_v14, 0.0 }
 0x4d5   :  { %v799_v18 = vmul.f32 0.01, %v765_v16  ;;  %v2968_v19 = vpop.f32.mrb[14].mxu0  ;;  %vm793_vm11 = vcmp.gt.f32.partialorder %v765_v16, 0.0 }
 0x4d6   :  { %v780_v20 = vadd.f32 %v2968_v19, %v2590_v12  ;;  %v774_v21 = vpop.f32.mrb[15].mxu0  ;;  %v806_v24 = vsel %vm794_vm10, %v770_v14, %v800_v17 }
 0x4d7   :  { %v775_v22 = vadd.f32 %v2590_v12, %v774_v21  ;;  %v805_v23 = vsel %vm793_vm11, %v765_v16, %v799_v18 }
 0x4d8   :  { %v802_v25 = vmul.f32 0.01, %v780_v20  ;;  %3004 = vmatprep.mubr.f32.mxu1 %v805_v23  ;;  %vm796_vm13 = vcmp.gt.f32.partialorder %v780_v20, 0.0 }
 0x4d9   :  { %v801_v26 = vmul.f32 0.01, %v775_v22  ;;  %v2971_v27 = vpop.f32.mrb[16].mxu0  ;;  %3005 = vmatmul.mubr.f32.vlgmr.msra.gmra.mrb[12].mxu1 %v806_v24  ;;  %vm795_vm12 = vcmp.gt.f32.partialorder %v775_v22, 0.0 }
 0x4da   :  { %v790_v28 = vadd.f32 %v2971_v27, %v2590_v12  ;;  %v784_v29 = vpop.f32.mrb[17].mxu0  ;;  %v808_v33 = vsel %vm796_vm13, %v780_v20, %v802_v25  ;;  %v4045_v27 = vmov 0.0|0.0   ;;  %vm4047_vm13 = vmmov 0  }
 0x4db   :  { %v785_v30 = vadd.f32 %v2590_v12, %v784_v29  ;;  %v807_v31 = vsel %vm795_vm12, %v775_v22, %v801_v26  ;;  %3308 = vmatprep.subr.bf16.mxu1 %v4045_v27 }
 0x4dc   :  { %v804_v32 = vmul.f32 0.01, %v790_v28  ;;  %3007 = vmatprep.mubr.f32.mxu1 %v807_v31  ;;  %vm798_vm15 = vcmp.gt.f32.partialorder %v790_v28, 0.0 }
 0x4dd   :  { %v803_v34 = vmul.f32 0.01, %v785_v30  ;;  %3008 = vmatmul.mubr.f32.gmra.mrb[14].mxu1 %v808_v33  ;;  %vm797_vm14 = vcmp.gt.f32.partialorder %v785_v30, 0.0  ;;  %v1310_v33 = vld [vmem:[%s4258_s1] sm:$0x3]  ;;  %s4051_s1 = smov [#allocation13]  }
 0x4de   :  { %v810_v36 = vsel %vm798_vm15, %v790_v28, %v804_v32  ;;  %v4046_v28 = vmov 23   ;;  %v4048_v32 = vmov 0.0   ;;  %vm4050_vm15 = vmmov 1   ;;  %s2568_s22 = sshll.u32 %s4051_s1, 4  ;;  %s2569_s22 = int_to_ptr.vmem [resolvable:$true] %s2568_s22 }
 0x4df   :  { %v809_v35 = vsel %vm797_vm14, %v785_v30, %v803_v34  ;;  %vm1133_vm14 = vcmask 1045504   ;;  %s3999_s23 = scalar_lea.vmem %s2569_s22, 32  ;;  %p4004_p7 = scmp.lt.s32.totalorder %s2569_s22, %s2569_s22 }
 0x4e0   :  { %3010 = vmatprep.mubr.f32.mxu1 %v809_v35  ;;  %v1088_v35 = vld [vmem:[#allocation2 + $0x8] sm:$0xff]  ;;  %p4000_p6 = scmp.ne.s32.totalorder %s2569_s22, %s3999_s23  ;;  %p4005_p8 = scmp.lt.s32.totalorder %s3999_s23, %s3999_s23 }
 0x4e1   :  { %3011 = vmatmul.mubr.f32.gmra.mrb[16].mxu1 %v810_v36  ;;  %v1087_v36 = vld [vmem:[#allocation2] sm:$0xff] }
 0x4e2   :  { %3066 = vmatprep.mubr.msk.f32.mxu1 %vm4047_vm13, %v4048_v32  ;;  %p4006_p9 = por %p4005_p8, %p4004_p7 }
 0x4e4   :  { %p4007_p10 = pnand %p4006_p9, %p4000_p6 }
 0x5ac   :  { %v3006_v44 = vpop.f32.mrb[12].mxu1 }
 0x5ad   :  { %v908_v45 = vadd.f32 %v3006_v44, %v2591_v43  ;;  %v902_v46 = vpop.f32.mrb[13].mxu1 }
 0x5ae   :  { %v903_v47 = vadd.f32 %v2591_v43, %v902_v46 }
 0x5af   :  { %v938_v48 = vmul.f32 0.01, %v908_v45  ;;  %vm932_vm1 = vcmp.gt.f32.partialorder %v908_v45, 0.0 }
 0x5b0   :  { %v937_v49 = vmul.f32 0.01, %v903_v47  ;;  %v3009_v50 = vpop.f32.mrb[14].mxu1  ;;  %vm931_vm2 = vcmp.gt.f32.partialorder %v903_v47, 0.0 }
 0x5b1   :  { %v918_v51 = vadd.f32 %v3009_v50, %v2591_v43  ;;  %v912_v52 = vpop.f32.mrb[15].mxu1  ;;  %v944_v55 = vsel %vm932_vm1, %v908_v45, %v938_v48  ;;  %vm4211_vm1 = vmpackc.low %vm1133_vm14, %vm4050_vm15 }
 0x5b2   :  { %v913_v53 = vadd.f32 %v2591_v43, %v912_v52  ;;  %v943_v54 = vsel %vm931_vm2, %v903_v47, %v937_v49  ;;  %v1092_v49 = vld [vmem:[#allocation2 + $0x28] sm:$0x3f]  ;;  %vm1317_vm2 = vcmask 752640  }
 0x5b3   :  { %v940_v56 = vmul.f32 0.01, %v918_v51  ;;  %3045 = vmatprep.mubr.f32.mxu0 %v943_v54  ;;  %vm934_vm4 = vcmp.gt.f32.partialorder %v918_v51, 0.0 }
 0x5b4   :  { %v939_v57 = vmul.f32 0.01, %v913_v53  ;;  %v3012_v58 = vpop.f32.mrb[16].mxu1  ;;  %3046 = vmatmul.mubr.f32.vlgmr.msra.gmra.mrb[18].mxu0 %v944_v55  ;;  %vm933_vm3 = vcmp.gt.f32.partialorder %v913_v53, 0.0  ;;  %v1354_v55 = vld [vmem:[#allocation10 + $0x108] sm:$0xff] }
 0x5b5   :  { %v928_v59 = vadd.f32 %v3012_v58, %v2591_v43  ;;  %v922_v60 = vpop.f32.mrb[17].mxu1  ;;  %v946_v0 = vsel %vm934_vm4, %v918_v51, %v940_v56  ;;  %v1091_v51 = vld [vmem:[#allocation2 + $0x20] sm:$0xff] }
 0x5b6   :  { %v923_v61 = vadd.f32 %v2591_v43, %v922_v60  ;;  %v945_v62 = vsel %vm933_vm3, %v913_v53, %v939_v57 }
 0x5b7   :  { %v942_v63 = vmul.f32 0.01, %v928_v59  ;;  %3048 = vmatprep.mubr.f32.mxu0 %v945_v62  ;;  %vm936_vm6 = vcmp.gt.f32.partialorder %v928_v59, 0.0 }
 0x5b8   :  { %v941_v1 = vmul.f32 0.01, %v923_v61  ;;  %3049 = vmatmul.mubr.f32.gmra.mrb[20].mxu0 %v946_v0  ;;  %vm935_vm5 = vcmp.gt.f32.partialorder %v923_v61, 0.0 }
 0x5b9   :  { %v948_v3 = vsel %vm936_vm6, %v928_v59, %v942_v63 }
 0x5ba   :  { %v947_v2 = vsel %vm935_vm5, %v923_v61, %v941_v1  ;;  %v1093_v61 = vld [vmem:[#allocation5] sm:$0x3] }
 0x5bb   :  { %3051 = vmatprep.mubr.f32.mxu0 %v947_v2 }
 0x5bc   :  { %3052 = vmatmul.mubr.f32.gmra.mrb[22].mxu0 %v948_v3 }
 0x687   :  { %v3047_v6 = vpop.f32.mrb[18].mxu0 }
 0x688   :  { %v1046_v7 = vadd.f32 %v3047_v6, %v2592_v5  ;;  %v1040_v8 = vpop.f32.mrb[19].mxu0  ;;  %v1324_v6 = vld [vmem:[#allocation10 + $0x18] sm:$0xff] }
 0x689   :  { %v1041_v9 = vadd.f32 %v2592_v5, %v1040_v8 }
 0x68a   :  { %vm1070_vm7 = vcmp.gt.f32.partialorder %v1046_v7, 0.0  ;;  %v1076_v10 = vmul.f32 0.01, %v1046_v7 }
 0x68b   :  { %v3050_v11 = vpop.f32.mrb[20].mxu0  ;;  %v1075_v12 = vmul.f32 0.01, %v1041_v9  ;;  %vm1069_vm8 = vcmp.gt.f32.partialorder %v1041_v9, 0.0 }
 0x68c   :  { %v1056_v13 = vadd.f32 %v3050_v11, %v2592_v5  ;;  %v1050_v14 = vpop.f32.mrb[21].mxu0  ;;  %v1082_v15 = vsel %vm1070_vm7, %v1046_v7, %v1076_v10  ;;  %v1321_v11 = vld [vmem:[#allocation10] sm:$0xff] }
 0x68d   :  { %v1051_v16 = vadd.f32 %v2592_v5, %v1050_v14  ;;  %1101 = vperm.xlu0 %3861, %v1082_v15   ;;  %v1081_v23 = vsel %vm1069_vm8, %v1041_v9, %v1075_v12  ;;  %v1323_v12 = vld [vmem:[#allocation10 + $0x10] sm:$0xff]  ;;  %v1328_v14 = vld [vmem:[#allocation10 + $0x38] sm:$0xff] }
 0x68e   :  { %vm1072_vm9 = vcmp.gt.f32.partialorder %v1056_v13, 0.0  ;;  %v1078_v17 = vmul.f32 0.01, %v1056_v13 }
 0x68f   :  { %v3053_v18 = vpop.f32.mrb[22].mxu0  ;;  %v1077_v19 = vmul.f32 0.01, %v1051_v16  ;;  %vm1071_vm10 = vcmp.gt.f32.partialorder %v1051_v16, 0.0 }
 0x690   :  { %v1066_v20 = vadd.f32 %v3053_v18, %v2592_v5  ;;  %v1060_v21 = vpop.f32.mrb[23].mxu0  ;;  %v1084_v22 = vsel %vm1072_vm9, %v1056_v13, %v1078_v17  ;;  %v1326_v13 = vld [vmem:[#allocation10 + $0x28] sm:$0xff]  ;;  %v1325_v17 = vld [vmem:[#allocation10 + $0x20] sm:$0xff]  ;;  %v1327_v18 = vld [vmem:[#allocation10 + $0x30] sm:$0xff] }
 0x691   :  { %1111 = vperm.xlu1 %3863, %v1084_v22   ;;  %1096 = vperm.xlu0 %3861, %v1081_v23   ;;  %v1061_v24 = vadd.f32 %v2592_v5, %v1060_v21  ;;  %v1083_v26 = vsel %vm1071_vm10, %v1051_v16, %v1077_v19  ;;  %v1322_v5 = vld [vmem:[#allocation10 + $0x8] sm:$0xff]  ;;  %v3332_v16 = vpack.c.bf16 %v1328_v14, %v1326_v13  ;;  %v1365_v13 = vld [vmem:[#allocation10 + $0x160] sm:$0xff]  ;;  %v1367_v14 = vld [vmem:[#allocation10 + $0x170] sm:$0xff] }
 0x692   :  { %v1080_v25 = vmul.f32 0.01, %v1066_v20  ;;  %vm1074_vm11 = vcmp.gt.f32.partialorder %v1066_v20, 0.0  ;;  %v3328_v10 = vpack.c.bf16 %v1324_v6, %v1322_v5  ;;  %v1330_v19 = vld [vmem:[#allocation10 + $0x48] sm:$0xff]  ;;  %v3334_v21 = vpack.c.bf16 %v1327_v18, %v1325_v17 }
 0x693   :  { %v1079_v29 = vmul.f32 0.01, %v1061_v24  ;;  %vm1073_vm12 = vcmp.gt.f32.partialorder %v1061_v24, 0.0  ;;  %v3374_v17 = vpack.c.bf16 %v1367_v14, %v1365_v13 }
 0x694   :  { %v1086_v30 = vsel %vm1074_vm11, %v1066_v20, %v1080_v25  ;;  %v1332_v20 = vld [vmem:[#allocation10 + $0x58] sm:$0xff]  ;;  %v1334_v25 = vld [vmem:[#allocation10 + $0x68] sm:$0xff] }
 0x695   :  { %1106 = vperm.xlu1 %3863, %v1083_v26   ;;  %3862 = vset.pattern.permute.xlu0 %v4046_v28  ;;  %v1085_v31 = vsel %vm1073_vm12, %v1061_v24, %v1079_v29  ;;  %v1331_v24 = vld [vmem:[#allocation10 + $0x50] sm:$0xff]  ;;  %v1333_v29 = vld [vmem:[#allocation10 + $0x60] sm:$0xff] }
 0x696   :  { %1208 = vperm.xlu0 %3862, %v1081_v23   ;;  %v1329_v23 = vld [vmem:[#allocation10 + $0x40] sm:$0xff] }
 0x699   :  { %1121 = vperm.xlu1 %3863, %v1086_v30  }
 0x69a   :  { %3865 = vset.pattern.permute.xlu0 %v4044_v4 }
 0x69b   :  { %1116 = vperm.xlu0 %3865, %v1085_v31  }
 0x69d   :  { %3864 = vset.pattern.permute.xlu1 %v4046_v28 }
 0x69e   :  { %1212 = vperm.xlu1 %3864, %v1082_v15   ;;  %v3330_v15 = vpack.c.bf16 %v1323_v12, %v1321_v11 }
 0x69f   :  { %3866 = vset.pattern.permute.xlu0 %v4046_v28 }
 0x6a0   :  { %1220 = vperm.xlu0 %3866, %v1084_v22   ;;  %v3336_v22 = vpack.c.bf16 %v1332_v20, %v1330_v19  ;;  %v1369_v19 = vld [vmem:[#allocation10 + $0x180] sm:$0xff]  ;;  %v1371_v20 = vld [vmem:[#allocation10 + $0x190] sm:$0xff] }
 0x6a2   :  { %1216 = vperm.xlu1 %3864, %v1083_v26   ;;  %v1336_v26 = vld [vmem:[#allocation10 + $0x78] sm:$0xff] }
 0x6a3   :  { %v3340_v28 = vpack.c.bf16 %v1336_v26, %v1334_v25  ;;  %v1373_v25 = vld [vmem:[#allocation10 + $0x1a0] sm:$0xff]  ;;  %v1375_v26 = vld [vmem:[#allocation10 + $0x1b0] sm:$0xff] }
 0x6a4   :  { %1228 = vperm.xlu0 %3866, %v1086_v30   ;;  %v1335_v30 = vld [vmem:[#allocation10 + $0x70] sm:$0xff] }
 0x6a6   :  { %1224 = vperm.xlu1 %3864, %v1085_v31   ;;  %v1338_v31 = vld [vmem:[#allocation10 + $0x88] sm:$0xff] }
 0x6aa   :  { %1312 = vrot.lane.b32.xlu1 %v1310_v33, %s4049_s30  ;;  %v3342_v33 = vpack.c.bf16 %v1335_v30, %v1333_v29  ;;  %v1380_v29 = vld [vmem:[#allocation10 + $0x1d8] sm:$0xff]  ;;  %v1377_v30 = vld [vmem:[#allocation10 + $0x1c0] sm:$0xff] }
 0x70c   :  { %v1102_v34 = vpop.permute.xlu0 %1101 }
 0x70d   :  { %v1125_v39 = vmul.f32 %v1102_v34, %v1088_v35 }
 0x710   :  { %v1112_v37 = vpop.permute.xlu1 %1111  ;;  %v1097_v38 = vpop.permute.xlu0 %1096 }
 0x711   :  { %v1124_v40 = vmul.f32 %v1097_v38, %v1087_v36  ;;  %v1127_v45 = vmul.f32 %v1112_v37, %v1090_v41  ;;  %v1342_v37 = vld [vmem:[#allocation10 + $0xa8] sm:$0xff]  ;;  %v1344_v38 = vld [vmem:[#allocation10 + $0xb8] sm:$0xff] }
 0x713   :  { %v3309_v43 = vpack.c.bf16 %v1125_v39, %v1124_v40  ;;  %v3348_v40 = vpack.c.bf16 %v1344_v38, %v1342_v37  ;;  %v1381_v37 = vld [vmem:[#allocation10 + $0x1e0] sm:$0xff]  ;;  %v1383_v38 = vld [vmem:[#allocation10 + $0x1f0] sm:$0xff] }
 0x714   :  { %v1107_v44 = vpop.permute.xlu1 %1106 }
 0x715   :  { %v1126_v46 = vmul.f32 %v1107_v44, %v1089_v42  ;;  %3310 = vmatpush3.bf16.msra.mxu1 %v3309_v43  ;;  %v1209_v47 = vpop.permute.xlu0 %1208  ;;  %v1346_v43 = vld [vmem:[#allocation10 + $0xc8] sm:$0xff]  ;;  %v1348_v44 = vld [vmem:[#allocation10 + $0xd8] sm:$0xff] }
 0x716   :  { %3311 = vmatprep.subr.bf16.mxu1 %v4045_v27  ;;  %v1231_v58 = vmul.f32 %v1209_v47, %v1087_v36  ;;  %v1339_v36 = vld [vmem:[#allocation10 + $0x90] sm:$0xff]  ;;  %v1345_v47 = vld [vmem:[#allocation10 + $0xc0] sm:$0xff] }
 0x717   :  { %v3312_v48 = vpack.c.bf16 %v1127_v45, %v1126_v46  ;;  %v3352_v46 = vpack.c.bf16 %v1348_v44, %v1346_v43  ;;  %v1477_v44 = vld [vmem:[#allocation10 + $0x210] sm:$0xff] }
 0x718   :  { %v1122_v50 = vpop.permute.xlu1 %1121 }
 0x719   :  { %3313 = vmatpush3.bf16.msra.mxu1 %v3312_v48  ;;  %v1129_v53 = vmul.f32 %v1122_v50, %v1092_v49  ;;  %v1347_v48 = vld [vmem:[#allocation10 + $0xd0] sm:$0xff]  ;;  %v1352_v50 = vld [vmem:[#allocation10 + $0xf8] sm:$0xff] }
 0x71a   :  { %v1117_v52 = vpop.permute.xlu0 %1116  ;;  %3314 = vmatprep.subr.bf16.mxu1 %v4045_v27 }
 0x71b   :  { %v1128_v54 = vmul.f32 %v1117_v52, %v1091_v51 }
 0x71d   :  { %v3315_v56 = vpack.c.bf16 %v1129_v53, %v1128_v54  ;;  %v1213_v57 = vpop.permute.xlu1 %1212  ;;  %v1349_v53 = vld [vmem:[#allocation10 + $0xe0] sm:$0xff]  ;;  %v1351_v54 = vld [vmem:[#allocation10 + $0xf0] sm:$0xff] }
 0x71e   :  { %v1232_v59 = vmul.f32 %v1213_v57, %v1088_v35  ;;  %v1337_v35 = vld [vmem:[#allocation10 + $0x80] sm:$0xff]  ;;  %v3358_v57 = vpack.c.bf16 %v1351_v54, %v1349_v53 }
 0x71f   :  { %3317 = vmatpush3.bf16.msk.msra.mxu1 %vm4211_vm1, %v3315_v56  ;;  %v1221_v60 = vpop.permute.xlu0 %1220  ;;  %v3346_v39 = vpack.c.bf16 %v1339_v36, %v1337_v35  ;;  %v1356_v56 = vld [vmem:[#allocation10 + $0x118] sm:$0xff] }
 0x720   :  { %v3319_v62 = vpack.c.bf16 %v1232_v59, %v1231_v58  ;;  %3318 = vmatprep.subr.bf16.mxu1 %v4045_v27  ;;  %v1234_v0 = vmul.f32 %v1221_v60, %v1090_v41  ;;  %v1341_v41 = vld [vmem:[#allocation10 + $0xa0] sm:$0xff]  ;;  %v3360_v58 = vpack.c.bf16 %v1356_v56, %v1354_v55  ;;  %v1355_v60 = vld [vmem:[#allocation10 + $0x110] sm:$0xff] }
 0x721   :  { %v1217_v63 = vpop.permute.xlu1 %1216  ;;  %v1353_v59 = vld [vmem:[#allocation10 + $0x100] sm:$0xff]  ;;  %v1485_v56 = vld [vmem:[#allocation10 + $0x250] sm:$0xff] }
 0x722   :  { %v1233_v1 = vmul.f32 %v1217_v63, %v1089_v42  ;;  %3067 = vmatmul.mubr.msk.f32.vlgmr.msra.gmra.mrb[18].mxu1 %vm116_vm0, %v1093_v61  ;;  %v1343_v42 = vld [vmem:[#allocation10 + $0xb0] sm:$0xff]  ;;  %v3362_v63 = vpack.c.bf16 %v1355_v60, %v1353_v59  ;;  %v1483_v55 = vld [vmem:[#allocation10 + $0x240] sm:$0xff] }
 0x723   :  { %3320 = vmatpush3.bf16.msra.mxu1 %v3319_v62  ;;  %v1229_v2 = vpop.permute.xlu0 %1228  ;;  %3081 = vmatprep.mubr.msk.f32.mxu1 %vm4047_vm13, %v4048_v32  ;;  %v1340_v32 = vld [vmem:[#allocation10 + $0x98] sm:$0xff]  ;;  %v3350_v45 = vpack.c.bf16 %v1343_v42, %v1341_v41  ;;  %v1475_v42 = vld [vmem:[#allocation10 + $0x200] sm:$0xff]  ;;  %v3402_v59 = vpack.c.bf16 %v1485_v56, %v1483_v55 }
 0x724   :  { %v3322_v3 = vpack.c.bf16 %v1234_v0, %v1233_v1  ;;  %3321 = vmatprep.subr.bf16.mxu1 %v4045_v27  ;;  %v1236_v7 = vmul.f32 %v1229_v2, %v1092_v49  ;;  %v3344_v34 = vpack.c.bf16 %v1340_v32, %v1338_v31  ;;  %v1350_v49 = vld [vmem:[#allocation10 + $0xe8] sm:$0xff]  ;;  %v1360_v62 = vld [vmem:[#allocation10 + $0x138] sm:$0xff]  ;;  %v1357_v1 = vld [vmem:[#allocation10 + $0x120] sm:$0xff] }
 0x725   :  { %v1225_v4 = vpop.permute.xlu1 %1224  ;;  %v3356_v52 = vpack.c.bf16 %v1352_v50, %v1350_v49  ;;  %v1359_v2 = vld [vmem:[#allocation10 + $0x130] sm:$0xff]  ;;  %v1478_v41 = vld [vmem:[#allocation10 + $0x218] sm:$0xff]  ;;  %v1479_v49 = vld [vmem:[#allocation10 + $0x220] sm:$0xff] }
 0x726   :  { %v1235_v8 = vmul.f32 %v1225_v4, %v1091_v51  ;;  %v3354_v51 = vpack.c.bf16 %v1347_v48, %v1345_v47  ;;  %v1364_v4 = vld [vmem:[#allocation10 + $0x158] sm:$0xff]  ;;  %v3366_v5 = vpack.c.bf16 %v1359_v2, %v1357_v1  ;;  %v1379_v31 = vld [vmem:[#allocation10 + $0x1d0] sm:$0xff]  ;;  %v3394_v47 = vpack.c.bf16 %v1477_v44, %v1475_v42 }
 0x727   :  { %3323 = vmatpush3.bf16.msra.mxu1 %v3322_v3  ;;  %v1362_v3 = vld [vmem:[#allocation10 + $0x148] sm:$0xff]  ;;  %v3386_v35 = vpack.c.bf16 %v1379_v31, %v1377_v30  ;;  %v1481_v50 = vld [vmem:[#allocation10 + $0x230] sm:$0xff]  ;;  %v1514_v30 = vld [vmem:[#allocation10 + $0x338] sm:$0xff] }
 0x728   :  { %v3325_v9 = vpack.c.bf16 %v1236_v7, %v1235_v8  ;;  %3324 = vmatprep.subr.bf16.mxu1 %v4045_v27  ;;  %v3338_v27 = vpack.c.bf16 %v1331_v24, %v1329_v23  ;;  %v3368_v6 = vpack.c.bf16 %v1364_v4, %v1362_v3  ;;  %v1361_v7 = vld [vmem:[#allocation10 + $0x140] sm:$0xff]  ;;  %v1363_v8 = vld [vmem:[#allocation10 + $0x150] sm:$0xff]  ;;  %v1376_v23 = vld [vmem:[#allocation10 + $0x1b8] sm:$0xff]  ;;  %v3398_v53 = vpack.c.bf16 %v1481_v50, %v1479_v49 }
 0x729   :  { %v3370_v11 = vpack.c.bf16 %v1363_v8, %v1361_v7  ;;  %v1491_v3 = vld [vmem:[#allocation10 + $0x280] sm:$0xff]  ;;  %v1493_v4 = vld [vmem:[#allocation10 + $0x290] sm:$0xff]  ;;  %v1522_v42 = vld [vmem:[#allocation10 + $0x378] sm:$0xff] }
 0x72a   :  { %v3410_v7 = vpack.c.bf16 %v1493_v4, %v1491_v3  ;;  %v1532_v3 = vld [vmem:[#allocation10 + $0x3c8] sm:$0xff]  ;;  %v1534_v4 = vld [vmem:[#allocation10 + $0x3d8] sm:$0xff] }
 0x72b   :  { %3327 = vmatpush3.bf16.msk.msra.mxu1 %vm4211_vm1, %v3325_v9  ;;  %v1366_v9 = vld [vmem:[#allocation10 + $0x168] sm:$0xff] }
 0x72c   :  { %3329 = vmatprep.subr.bf16.mxu1 %v3328_v10  ;;  %v1368_v10 = vld [vmem:[#allocation10 + $0x178] sm:$0xff] }
 0x72d   :  { %v3372_v12 = vpack.c.bf16 %v1368_v10, %v1366_v9  ;;  %v1495_v9 = vld [vmem:[#allocation10 + $0x2a0] sm:$0xff]  ;;  %v1497_v10 = vld [vmem:[#allocation10 + $0x2b0] sm:$0xff] }
 0x72e   :  { %3082 = vmatmul.mubr.msk.f32.vlgmr.msra.gmra.mrb[20].mxu1 %vm116_vm0, %v1093_v61  ;;  %v1358_v61 = vld [vmem:[#allocation10 + $0x128] sm:$0xff]  ;;  %v3414_v13 = vpack.c.bf16 %v1497_v10, %v1495_v9  ;;  %vm1315_vm0 = vcmask 187392   ;;  %v1538_v10 = vld [vmem:[#allocation10 + $0x3f8] sm:$0xff] }
 0x72f   :  { %3331 = vmatpush1.bf16.msra.mxu1 %v3330_v15  ;;  %v3364_v0 = vpack.c.bf16 %v1360_v62, %v1358_v61  ;;  %v1370_v15 = vld [vmem:[#allocation10 + $0x188] sm:$0xff]  ;;  %v1487_v61 = vld [vmem:[#allocation10 + $0x260] sm:$0xff]  ;;  %v1489_v62 = vld [vmem:[#allocation10 + $0x270] sm:$0xff] }
 0x730   :  { %3333 = vmatprep.subr.bf16.mxu1 %v3332_v16  ;;  %v1372_v16 = vld [vmem:[#allocation10 + $0x198] sm:$0xff]  ;;  %v3406_v1 = vpack.c.bf16 %v1489_v62, %v1487_v61  ;;  %v1313_v62 = vpop.permute.xlu1 %1312  ;;  %v1536_v9 = vld [vmem:[#allocation10 + $0x3e8] sm:$0xff] }
 0x731   :  { %v3376_v18 = vpack.c.bf16 %v1372_v16, %v1370_v15  ;;  %v1499_v15 = vld [vmem:[#allocation10 + $0x2c0] sm:$0xff]  ;;  %v1501_v16 = vld [vmem:[#allocation10 + $0x2d0] sm:$0xff] }
 0x733   :  { %3335 = vmatpush1.bf16.msra.mxu1 %v3334_v21  ;;  %v3378_v21 = vpack.c.bf16 %v1371_v20, %v1369_v19  ;;  %v3418_v19 = vpack.c.bf16 %v1501_v16, %v1499_v15  ;;  %v1631_v15 = vld [vmem:[#allocation10 + $0x408] sm:$0xff]  ;;  %v1633_v16 = vld [vmem:[#allocation10 + $0x418] sm:$0xff] }
 0x734   :  { %3337 = vmatprep.subr.bf16.mxu1 %v3336_v22  ;;  %v1374_v22 = vld [vmem:[#allocation10 + $0x1a8] sm:$0xff] }
 0x735   :  { %v3380_v24 = vpack.c.bf16 %v1376_v23, %v1374_v22  ;;  %v1505_v22 = vld [vmem:[#allocation10 + $0x2f0] sm:$0xff]  ;;  %v1508_v23 = vld [vmem:[#allocation10 + $0x308] sm:$0xff] }
 0x737   :  { %3339 = vmatpush1.bf16.msra.mxu1 %v3338_v27  ;;  %v1378_v27 = vld [vmem:[#allocation10 + $0x1c8] sm:$0xff] }
 0x738   :  { %3341 = vmatprep.subr.bf16.mxu1 %v3340_v28  ;;  %v3382_v28 = vpack.c.bf16 %v1375_v26, %v1373_v25  ;;  %v3384_v32 = vpack.c.bf16 %v1380_v29, %v1378_v27  ;;  %v1507_v27 = vld [vmem:[#allocation10 + $0x300] sm:$0xff]  ;;  %v1512_v29 = vld [vmem:[#allocation10 + $0x328] sm:$0xff] }
 0x73b   :  { %3343 = vmatpush1.bf16.msra.mxu1 %v3342_v33  ;;  %v1382_v33 = vld [vmem:[#allocation10 + $0x1e8] sm:$0xff] }
 0x73c   :  { %3345 = vmatprep.subr.bf16.mxu1 %v3344_v34  ;;  %v1384_v34 = vld [vmem:[#allocation10 + $0x1f8] sm:$0xff] }
 0x73d   :  { %v3388_v36 = vpack.c.bf16 %v1384_v34, %v1382_v33  ;;  %v1511_v33 = vld [vmem:[#allocation10 + $0x320] sm:$0xff]  ;;  %v1513_v34 = vld [vmem:[#allocation10 + $0x330] sm:$0xff] }
 0x73f   :  { %3347 = vmatpush1.bf16.msra.mxu1 %v3346_v39  ;;  %v3390_v39 = vpack.c.bf16 %v1383_v38, %v1381_v37  ;;  %v3430_v37 = vpack.c.bf16 %v1513_v34, %v1511_v33  ;;  %v1645_v33 = vld [vmem:[#allocation10 + $0x478] sm:$0xff] }
 0x740   :  { %3349 = vmatprep.subr.bf16.mxu1 %v3348_v40  ;;  %v1476_v40 = vld [vmem:[#allocation10 + $0x208] sm:$0xff] }
 0x741   :  { %v3392_v43 = vpack.c.bf16 %v1478_v41, %v1476_v40  ;;  %v1517_v40 = vld [vmem:[#allocation10 + $0x350] sm:$0xff]  ;;  %v1520_v41 = vld [vmem:[#allocation10 + $0x368] sm:$0xff] }
 0x742   :  { %v3436_v44 = vpack.c.bf16 %v1522_v42, %v1520_v41  ;;  %v1646_v42 = vld [vmem:[#allocation10 + $0x480] sm:$0xff] }
 0x743   :  { %3351 = vmatpush1.bf16.msra.mxu1 %v3350_v45  ;;  %v1480_v45 = vld [vmem:[#allocation10 + $0x228] sm:$0xff]  ;;  %3393 = vmatprep.subr.bf16.mxu0 %v3392_v43 }
 0x744   :  { %3353 = vmatprep.subr.bf16.mxu1 %v3352_v46  ;;  %v1482_v46 = vld [vmem:[#allocation10 + $0x238] sm:$0xff]  ;;  %3395 = vmatpush1.bf16.msra.mxu0 %v3394_v47  ;;  %v1524_v47 = vld [vmem:[#allocation10 + $0x388] sm:$0xff] }
 0x745   :  { %v3396_v48 = vpack.c.bf16 %v1482_v46, %v1480_v45  ;;  %v1519_v45 = vld [vmem:[#allocation10 + $0x360] sm:$0xff]  ;;  %v1521_v46 = vld [vmem:[#allocation10 + $0x370] sm:$0xff] }
 0x746   :  { %v3438_v49 = vpack.c.bf16 %v1521_v46, %v1519_v45  ;;  %v1653_v45 = vld [vmem:[#allocation10 + $0x4b8] sm:$0xff] }
 0x747   :  { %3355 = vmatpush1.bf16.msra.mxu1 %v3354_v51  ;;  %v1484_v51 = vld [vmem:[#allocation10 + $0x248] sm:$0xff]  ;;  %3397 = vmatprep.subr.bf16.mxu0 %v3396_v48  ;;  %v1526_v48 = vld [vmem:[#allocation10 + $0x398] sm:$0xff] }
 0x748   :  { %3357 = vmatprep.subr.bf16.mxu1 %v3356_v52  ;;  %v1486_v52 = vld [vmem:[#allocation10 + $0x258] sm:$0xff]  ;;  %3399 = vmatpush1.bf16.msra.mxu0 %v3398_v53  ;;  %v3440_v50 = vpack.c.bf16 %v1526_v48, %v1524_v47  ;;  %v1528_v53 = vld [vmem:[#allocation10 + $0x3a8] sm:$0xff]  ;;  %v1650_v48 = vld [vmem:[#allocation10 + $0x4a0] sm:$0xff] }
 0x749   :  { %v3400_v54 = vpack.c.bf16 %v1486_v52, %v1484_v51  ;;  %v1523_v51 = vld [vmem:[#allocation10 + $0x380] sm:$0xff]  ;;  %v1525_v52 = vld [vmem:[#allocation10 + $0x390] sm:$0xff] }
 0x74a   :  { %v3442_v55 = vpack.c.bf16 %v1525_v52, %v1523_v51  ;;  %v1657_v51 = vld [vmem:[#allocation10 + $0x4d8] sm:$0xff] }
 0x74b   :  { %3359 = vmatpush1.bf16.msra.mxu1 %v3358_v57  ;;  %v1488_v57 = vld [vmem:[#allocation10 + $0x268] sm:$0xff]  ;;  %3401 = vmatprep.subr.bf16.mxu0 %v3400_v54  ;;  %v1530_v54 = vld [vmem:[#allocation10 + $0x3b8] sm:$0xff] }
 0x74c   :  { %3361 = vmatprep.subr.bf16.mxu1 %v3360_v58  ;;  %v1490_v58 = vld [vmem:[#allocation10 + $0x278] sm:$0xff]  ;;  %3403 = vmatpush1.bf16.msra.mxu0 %v3402_v59  ;;  %v3444_v56 = vpack.c.bf16 %v1530_v54, %v1528_v53  ;;  %v1654_v54 = vld [vmem:[#allocation10 + $0x4c0] sm:$0xff] }
 0x74d   :  { %v3404_v60 = vpack.c.bf16 %v1490_v58, %v1488_v57  ;;  %v1527_v57 = vld [vmem:[#allocation10 + $0x3a0] sm:$0xff]  ;;  %v1529_v58 = vld [vmem:[#allocation10 + $0x3b0] sm:$0xff] }
 0x74e   :  { %v3446_v59 = vpack.c.bf16 %v1529_v58, %v1527_v57  ;;  %v1661_v57 = vld [vmem:[#allocation10 + $0x4f8] sm:$0xff] }
 0x74f   :  { %3363 = vmatpush1.bf16.msra.mxu1 %v3362_v63  ;;  %v1492_v63 = vld [vmem:[#allocation10 + $0x288] sm:$0xff]  ;;  %3405 = vmatprep.subr.bf16.mxu0 %v3404_v60 }
 0x750   :  { %3365 = vmatprep.subr.bf16.mxu1 %v3364_v0  ;;  %v1494_v0 = vld [vmem:[#allocation10 + $0x298] sm:$0xff]  ;;  %3407 = vmatpush1.bf16.msra.mxu0 %v3406_v1 }
 0x751   :  { %v3408_v2 = vpack.c.bf16 %v1494_v0, %v1492_v63 }
 0x753   :  { %3367 = vmatpush1.bf16.msra.mxu1 %v3366_v5  ;;  %v1496_v5 = vld [vmem:[#allocation10 + $0x2a8] sm:$0xff]  ;;  %3409 = vmatprep.subr.bf16.mxu0 %v3408_v2 }
 0x754   :  { %3369 = vmatprep.subr.bf16.mxu1 %v3368_v6  ;;  %v1498_v6 = vld [vmem:[#allocation10 + $0x2b8] sm:$0xff]  ;;  %3411 = vmatpush1.bf16.msra.mxu0 %v3410_v7  ;;  %v1533_v7 = vld [vmem:[#allocation10 + $0x3d0] sm:$0xff] }
 0x755   :  { %v3412_v8 = vpack.c.bf16 %v1498_v6, %v1496_v5  ;;  %v3448_v5 = vpack.c.bf16 %v1534_v4, %v1532_v3  ;;  %v1531_v6 = vld [vmem:[#allocation10 + $0x3c0] sm:$0xff]  ;;  %v1664_v3 = vld [vmem:[#allocation10 + $0x510] sm:$0xff]  ;;  %v1667_v4 = vld [vmem:[#allocation10 + $0x528] sm:$0xff] }
 0x757   :  { %3371 = vmatpush1.bf16.msra.mxu1 %v3370_v11  ;;  %v1500_v11 = vld [vmem:[#allocation10 + $0x2c8] sm:$0xff]  ;;  %3413 = vmatprep.subr.bf16.mxu0 %v3412_v8  ;;  %v3450_v8 = vpack.c.bf16 %v1533_v7, %v1531_v6 }
 0x758   :  { %3373 = vmatprep.subr.bf16.mxu1 %v3372_v12  ;;  %v1502_v12 = vld [vmem:[#allocation10 + $0x2d8] sm:$0xff]  ;;  %3415 = vmatpush1.bf16.msra.mxu0 %v3414_v13  ;;  %v1537_v13 = vld [vmem:[#allocation10 + $0x3f0] sm:$0xff] }
 0x759   :  { %v3416_v14 = vpack.c.bf16 %v1502_v12, %v1500_v11  ;;  %v3452_v11 = vpack.c.bf16 %v1538_v10, %v1536_v9  ;;  %v1535_v12 = vld [vmem:[#allocation10 + $0x3e0] sm:$0xff]  ;;  %v1668_v9 = vld [vmem:[#allocation10 + $0x530] sm:$0xff]  ;;  %v1671_v10 = vld [vmem:[#allocation10 + $0x548] sm:$0xff] }
 0x75b   :  { %3375 = vmatpush1.bf16.msra.mxu1 %v3374_v17  ;;  %v1504_v17 = vld [vmem:[#allocation10 + $0x2e8] sm:$0xff]  ;;  %3417 = vmatprep.subr.bf16.mxu0 %v3416_v14  ;;  %v3454_v14 = vpack.c.bf16 %v1537_v13, %v1535_v12 }
 0x75c   :  { %3377 = vmatprep.subr.bf16.mxu1 %v3376_v18  ;;  %v1506_v18 = vld [vmem:[#allocation10 + $0x2f8] sm:$0xff]  ;;  %3419 = vmatpush1.bf16.msra.mxu0 %v3418_v19  ;;  %v1632_v19 = vld [vmem:[#allocation10 + $0x410] sm:$0xff] }
 0x75d   :  { %v3420_v20 = vpack.c.bf16 %v1506_v18, %v1504_v17  ;;  %v1630_v17 = vld [vmem:[#allocation10 + $0x400] sm:$0xff]  ;;  %v3456_v18 = vpack.c.bf16 %v1633_v16, %v1631_v15  ;;  %v1672_v15 = vld [vmem:[#allocation10 + $0x550] sm:$0xff]  ;;  %v1675_v16 = vld [vmem:[#allocation10 + $0x568] sm:$0xff] }
 0x75f   :  { %3379 = vmatpush1.bf16.msra.mxu1 %v3378_v21  ;;  %v1503_v21 = vld [vmem:[#allocation10 + $0x2e0] sm:$0xff]  ;;  %3421 = vmatprep.subr.bf16.mxu0 %v3420_v20  ;;  %v1635_v20 = vld [vmem:[#allocation10 + $0x428] sm:$0xff] }
 0x760   :  { %3381 = vmatprep.subr.bf16.mxu1 %v3380_v24  ;;  %v1510_v24 = vld [vmem:[#allocation10 + $0x318] sm:$0xff]  ;;  %v3422_v25 = vpack.c.bf16 %v1505_v22, %v1503_v21  ;;  %v3458_v22 = vpack.c.bf16 %v1632_v19, %v1630_v17 }
 0x761   :  { %v3424_v26 = vpack.c.bf16 %v1510_v24, %v1508_v23  ;;  %v1637_v21 = vld [vmem:[#allocation10 + $0x438] sm:$0xff]  ;;  %v1634_v24 = vld [vmem:[#allocation10 + $0x420] sm:$0xff] }
 0x762   :  { %3423 = vmatpush1.bf16.msra.mxu0 %v3422_v25  ;;  %v3460_v23 = vpack.c.bf16 %v1637_v21, %v1635_v20  ;;  %v1636_v25 = vld [vmem:[#allocation10 + $0x430] sm:$0xff]  ;;  %v1677_v17 = vld [vmem:[#allocation10 + $0x578] sm:$0xff]  ;;  %v1674_v20 = vld [vmem:[#allocation10 + $0x560] sm:$0xff] }
 0x763   :  { %3383 = vmatpush1.bf16.msra.mxu1 %v3382_v28  ;;  %v1509_v28 = vld [vmem:[#allocation10 + $0x310] sm:$0xff]  ;;  %3425 = vmatprep.subr.bf16.mxu0 %v3424_v26  ;;  %v1639_v26 = vld [vmem:[#allocation10 + $0x448] sm:$0xff]  ;;  %v3500_v19 = vpack.c.bf16 %v1677_v17, %v1675_v16  ;;  %v1800_v16 = vld [vmem:[#allocation10 + $0x678] sm:$0xff] }
 0x764   :  { %3385 = vmatprep.subr.bf16.mxu1 %v3384_v32  ;;  %v3426_v31 = vpack.c.bf16 %v1509_v28, %v1507_v27  ;;  %v3428_v32 = vpack.c.bf16 %v1514_v30, %v1512_v29  ;;  %v1641_v27 = vld [vmem:[#allocation10 + $0x458] sm:$0xff]  ;;  %v3462_v28 = vpack.c.bf16 %v1636_v25, %v1634_v24  ;;  %v1638_v30 = vld [vmem:[#allocation10 + $0x440] sm:$0xff]  ;;  %v1676_v21 = vld [vmem:[#allocation10 + $0x570] sm:$0xff] }
 0x765   :  { %v3464_v29 = vpack.c.bf16 %v1641_v27, %v1639_v26  ;;  %v3502_v24 = vpack.c.bf16 %v1676_v21, %v1674_v20  ;;  %v1678_v26 = vld [vmem:[#allocation10 + $0x580] sm:$0xff]  ;;  %v1680_v27 = vld [vmem:[#allocation10 + $0x590] sm:$0xff]  ;;  %v1802_v21 = vld [vmem:[#allocation10 + $0x688] sm:$0xff] }
 0x766   :  { %3427 = vmatpush1.bf16.msra.mxu0 %v3426_v31  ;;  %v1640_v31 = vld [vmem:[#allocation10 + $0x450] sm:$0xff] }
 0x767   :  { %3387 = vmatpush1.bf16.msra.mxu1 %v3386_v35  ;;  %v1516_v35 = vld [vmem:[#allocation10 + $0x348] sm:$0xff]  ;;  %3429 = vmatprep.subr.bf16.mxu0 %v3428_v32  ;;  %v3466_v34 = vpack.c.bf16 %v1640_v31, %v1638_v30  ;;  %v3506_v30 = vpack.c.bf16 %v1680_v27, %v1678_v26  ;;  %v1799_v20 = vld [vmem:[#allocation10 + $0x670] sm:$0xff] }
 0x768   :  { %3389 = vmatprep.subr.bf16.mxu1 %v3388_v36  ;;  %v1518_v36 = vld [vmem:[#allocation10 + $0x358] sm:$0xff]  ;;  %v1643_v32 = vld [vmem:[#allocation10 + $0x468] sm:$0xff]  ;;  %v1803_v26 = vld [vmem:[#allocation10 + $0x690] sm:$0xff] }
 0x769   :  { %v3432_v38 = vpack.c.bf16 %v1518_v36, %v1516_v35  ;;  %v3468_v35 = vpack.c.bf16 %v1645_v33, %v1643_v32  ;;  %v1642_v36 = vld [vmem:[#allocation10 + $0x460] sm:$0xff]  ;;  %v1684_v33 = vld [vmem:[#allocation10 + $0x5b0] sm:$0xff]  ;;  %v1806_v27 = vld [vmem:[#allocation10 + $0x6a8] sm:$0xff] }
 0x76a   :  { %3431 = vmatpush1.bf16.msra.mxu0 %v3430_v37  ;;  %v1644_v37 = vld [vmem:[#allocation10 + $0x470] sm:$0xff]  ;;  %v1682_v32 = vld [vmem:[#allocation10 + $0x5a0] sm:$0xff] }
 0x76b   :  { %3391 = vmatpush1.bf16.msra.mxu1 %v3390_v39  ;;  %v1515_v39 = vld [vmem:[#allocation10 + $0x340] sm:$0xff]  ;;  %3433 = vmatprep.subr.bf16.mxu0 %v3432_v38  ;;  %v1647_v38 = vld [vmem:[#allocation10 + $0x488] sm:$0xff] }
 0x76c   :  { %v3434_v43 = vpack.c.bf16 %v1517_v40, %v1515_v39  ;;  %3457 = vmatprep.subr.bf16.mxu1 %v3456_v18  ;;  %v1649_v39 = vld [vmem:[#allocation10 + $0x498] sm:$0xff]  ;;  %v3470_v40 = vpack.c.bf16 %v1644_v37, %v1642_v36 }
 0x76d   :  { %v3472_v41 = vpack.c.bf16 %v1649_v39, %v1647_v38  ;;  %v1385_v38 = vld [vmem:[#allocation11] sm:$0x3] }
 0x76e   :  { %3435 = vmatpush1.bf16.msra.mxu0 %v3434_v43  ;;  %v1648_v43 = vld [vmem:[#allocation10 + $0x490] sm:$0xff] }
 0x76f   :  { %3437 = vmatprep.subr.bf16.mxu0 %v3436_v44  ;;  %v1651_v44 = vld [vmem:[#allocation10 + $0x4a8] sm:$0xff]  ;;  %v3474_v46 = vpack.c.bf16 %v1648_v43, %v1646_v42 }
 0x770   :  { %v3476_v47 = vpack.c.bf16 %v1653_v45, %v1651_v44 }
 0x772   :  { %3439 = vmatpush1.bf16.msra.mxu0 %v3438_v49  ;;  %v1652_v49 = vld [vmem:[#allocation10 + $0x4b0] sm:$0xff] }
 0x773   :  { %3441 = vmatprep.subr.bf16.mxu0 %v3440_v50  ;;  %v1655_v50 = vld [vmem:[#allocation10 + $0x4c8] sm:$0xff]  ;;  %v3478_v52 = vpack.c.bf16 %v1652_v49, %v1650_v48 }
 0x774   :  { %v3480_v53 = vpack.c.bf16 %v1657_v51, %v1655_v50  ;;  %v1687_v50 = vld [vmem:[#allocation10 + $0x5c8] sm:$0xff]  ;;  %v1689_v51 = vld [vmem:[#allocation10 + $0x5d8] sm:$0xff] }
 0x776   :  { %3443 = vmatpush1.bf16.msra.mxu0 %v3442_v55  ;;  %v1656_v55 = vld [vmem:[#allocation10 + $0x4d0] sm:$0xff] }
 0x777   :  { %3445 = vmatprep.subr.bf16.mxu0 %v3444_v56  ;;  %v1659_v56 = vld [vmem:[#allocation10 + $0x4e8] sm:$0xff]  ;;  %v3482_v58 = vpack.c.bf16 %v1656_v55, %v1654_v54  ;;  %v1688_v54 = vld [vmem:[#allocation10 + $0x5d0] sm:$0xff] }
 0x77a   :  { %3447 = vmatpush1.bf16.msra.mxu0 %v3446_v59  ;;  %v3484_v59 = vpack.c.bf16 %v1661_v57, %v1659_v56  ;;  %v1691_v56 = vld [vmem:[#allocation10 + $0x5e8] sm:$0xff]  ;;  %v1693_v57 = vld [vmem:[#allocation10 + $0x5f8] sm:$0xff] }
 0x77b   :  { %3449 = vmatprep.subr.bf16.mxu0 %v3448_v5  ;;  %v1669_v5 = vld [vmem:[#allocation10 + $0x538] sm:$0xff] }
 0x77c   :  { %v3492_v7 = vpack.c.bf16 %v1669_v5, %v1667_v4  ;;  %v1792_v4 = vld [vmem:[#allocation10 + $0x638] sm:$0xff] }
 0x77e   :  { %3451 = vmatpush1.bf16.msra.mxu0 %v3450_v8  ;;  %v1666_v8 = vld [vmem:[#allocation10 + $0x520] sm:$0xff] }
 0x77f   :  { %3453 = vmatprep.subr.bf16.mxu0 %v3452_v11  ;;  %v1673_v11 = vld [vmem:[#allocation10 + $0x558] sm:$0xff]  ;;  %v3494_v12 = vpack.c.bf16 %v1668_v9, %v1666_v8  ;;  %v1791_v8 = vld [vmem:[#allocation10 + $0x630] sm:$0xff]  ;;  %v1794_v9 = vld [vmem:[#allocation10 + $0x648] sm:$0xff] }
 0x780   :  { %v3496_v13 = vpack.c.bf16 %v1673_v11, %v1671_v10  ;;  %v1796_v10 = vld [vmem:[#allocation10 + $0x658] sm:$0xff] }
 0x782   :  { %3455 = vmatpush1.bf16.msra.mxu0 %v3454_v14  ;;  %v1670_v14 = vld [vmem:[#allocation10 + $0x540] sm:$0xff] }
 0x783   :  { %v3498_v18 = vpack.c.bf16 %v1672_v15, %v1670_v14  ;;  %v1795_v14 = vld [vmem:[#allocation10 + $0x650] sm:$0xff]  ;;  %v1798_v15 = vld [vmem:[#allocation10 + $0x668] sm:$0xff] }
 0x7f5   :  { %v1203_v60 = vpop.f32.mrb[18].mxu1 }
 0x7f6   :  { %v3068_v61 = vpop.f32.mrb[19].mxu1  ;;  %v1316_v2 = vsel %vm1315_vm0, %v1203_v60, %v1313_v62  ;;  %v1658_v60 = vld [vmem:[#allocation10 + $0x4e0] sm:$0xff] }
 0x7f7   :  { %v1660_v61 = vld [vmem:[#allocation10 + $0x4f0] sm:$0xff] }
 0x801   :  { %v1306_v63 = vpop.f32.mrb[20].mxu1 }
 0x802   :  { %v1319_v0 = vsel %vm1315_vm0, %v1306_v63, %v1313_v62  ;;  %v3083_v1 = vpop.f32.mrb[21].mxu1  ;;  %v1663_v62 = vld [vmem:[#allocation10 + $0x508] sm:$0xff]  ;;  %v1665_v63 = vld [vmem:[#allocation10 + $0x518] sm:$0xff] }
 0x803   :  { %2597 = vmatprep.mubr.msk.f32.mxu1 %vm1317_vm2, %v1319_v0  ;;  %v3486_v0 = vpack.c.bf16 %v1660_v61, %v1658_v60  ;;  %v3488_v1 = vpack.c.bf16 %v1665_v63, %v1663_v62  ;;  %v1692_v60 = vld [vmem:[#allocation10 + $0x5f0] sm:$0xff]  ;;  %v1786_v62 = vld [vmem:[#allocation10 + $0x608] sm:$0xff]  ;;  %v1788_v63 = vld [vmem:[#allocation10 + $0x618] sm:$0xff] }
 0x804   :  { %2598 = vmatmul.mubr.msk.f32.vlgmr.msra.gmra.mrb[22].mxu1 %vm1317_vm2, %v1316_v2  ;;  %v1662_v2 = vld [vmem:[#allocation10 + $0x500] sm:$0xff] }
 0x805   :  { %3459 = vmatpush1.bf16.msra.mxu1 %v3458_v22  ;;  %v3490_v6 = vpack.c.bf16 %v1664_v3, %v1662_v2  ;;  %v1679_v22 = vld [vmem:[#allocation10 + $0x588] sm:$0xff]  ;;  %v1787_v2 = vld [vmem:[#allocation10 + $0x610] sm:$0xff] }
 0x806   :  { %3461 = vmatprep.subr.bf16.mxu1 %v3460_v23  ;;  %v1681_v23 = vld [vmem:[#allocation10 + $0x598] sm:$0xff]  ;;  %v1790_v3 = vld [vmem:[#allocation10 + $0x628] sm:$0xff] }
 0x807   :  { %v3504_v25 = vpack.c.bf16 %v1681_v23, %v1679_v22  ;;  %v1804_v22 = vld [vmem:[#allocation10 + $0x698] sm:$0xff] }
 0x809   :  { %3463 = vmatpush1.bf16.msra.mxu1 %v3462_v28  ;;  %v1683_v28 = vld [vmem:[#allocation10 + $0x5a8] sm:$0xff] }
 0x80a   :  { %3465 = vmatprep.subr.bf16.mxu1 %v3464_v29  ;;  %v1685_v29 = vld [vmem:[#allocation10 + $0x5b8] sm:$0xff] }
 0x80b   :  { %v3508_v31 = vpack.c.bf16 %v1685_v29, %v1683_v28  ;;  %v1808_v28 = vld [vmem:[#allocation10 + $0x6b8] sm:$0xff] }
 0x80d   :  { %3467 = vmatpush1.bf16.msra.mxu1 %v3466_v34  ;;  %v3510_v34 = vpack.c.bf16 %v1684_v33, %v1682_v32  ;;  %v1807_v32 = vld [vmem:[#allocation10 + $0x6b0] sm:$0xff]  ;;  %v1810_v33 = vld [vmem:[#allocation10 + $0x6c8] sm:$0xff] }
 0x80e   :  { %3469 = vmatprep.subr.bf16.mxu1 %v3468_v35  ;;  %v1387_v35 = vlaneseq }
 0x810   :  { %v1388_v36 = vshrl.u32 %v1387_v35, 7 }
 0x811   :  { %3471 = vmatpush1.bf16.msra.mxu1 %v3470_v40 }
 0x812   :  { %3473 = vmatprep.subr.bf16.mxu1 %v3472_v41  ;;  %v4225_v37 = vsub.s32 0, %v1388_v36  ;;  %v4227_v39 = vsub.s32 1, %v1388_v36 }
 0x814   :  { %v1390_v40 = vrot.slane %v1385_v38, %v4225_v37  ;;  %v1394_v41 = vrot.slane %v1385_v38, %v4227_v39  ;;  %v1809_v38 = vld [vmem:[#allocation10 + $0x6c0] sm:$0xff] }
 0x815   :  { %3475 = vmatpush1.bf16.msra.mxu1 %v3474_v46 }
 0x816   :  { %3477 = vmatprep.subr.bf16.mxu1 %v3476_v47 }
 0x819   :  { %3479 = vmatpush1.bf16.msra.mxu1 %v3478_v52  ;;  %v3512_v52 = vpack.c.bf16 %v1689_v51, %v1687_v50  ;;  %v1817_v51 = vld [vmem:[#allocation10 + $0x700] sm:$0xff] }
 0x81a   :  { %3481 = vmatprep.subr.bf16.mxu1 %v3480_v53  ;;  %v1686_v53 = vld [vmem:[#allocation10 + $0x5c0] sm:$0xff] }
 0x81b   :  { %v3514_v55 = vpack.c.bf16 %v1688_v54, %v1686_v53  ;;  %v1822_v53 = vld [vmem:[#allocation10 + $0x728] sm:$0xff]  ;;  %v1824_v54 = vld [vmem:[#allocation10 + $0x738] sm:$0xff] }
 0x81d   :  { %3483 = vmatpush1.bf16.msra.mxu1 %v3482_v58  ;;  %v3516_v58 = vpack.c.bf16 %v1693_v57, %v1691_v56  ;;  %v3556_v56 = vpack.c.bf16 %v1824_v54, %v1822_v53  ;;  %v1821_v57 = vld [vmem:[#allocation10 + $0x720] sm:$0xff] }
 0x81e   :  { %3485 = vmatprep.subr.bf16.mxu1 %v3484_v59  ;;  %v1690_v59 = vld [vmem:[#allocation10 + $0x5e0] sm:$0xff] }
 0x81f   :  { %v3518_v61 = vpack.c.bf16 %v1692_v60, %v1690_v59  ;;  %v1826_v59 = vld [vmem:[#allocation10 + $0x748] sm:$0xff]  ;;  %v1828_v60 = vld [vmem:[#allocation10 + $0x758] sm:$0xff]  ;;  %v1944_v54 = vld [vmem:[#allocation10 + $0x820] sm:$0xff] }
 0x821   :  { %3487 = vmatpush1.bf16.msra.mxu1 %v3486_v0  ;;  %v1785_v0 = vld [vmem:[#allocation10 + $0x600] sm:$0xff] }
 0x822   :  { %3489 = vmatprep.subr.bf16.mxu1 %v3488_v1  ;;  %v3520_v1 = vpack.c.bf16 %v1788_v63, %v1786_v62  ;;  %v3522_v5 = vpack.c.bf16 %v1787_v2, %v1785_v0  ;;  %v3560_v62 = vpack.c.bf16 %v1828_v60, %v1826_v59  ;;  %v1825_v63 = vld [vmem:[#allocation10 + $0x740] sm:$0xff]  ;;  %v1827_v0 = vld [vmem:[#allocation10 + $0x750] sm:$0xff]  ;;  %v1832_v2 = vld [vmem:[#allocation10 + $0x778] sm:$0xff] }
 0x823   :  { %v1948_v60 = vld [vmem:[#allocation10 + $0x840] sm:$0xff] }
 0x824   :  { %3521 = vmatprep.subr.bf16.mxu0 %v3520_v1  ;;  %v1830_v1 = vld [vmem:[#allocation10 + $0x768] sm:$0xff] }
 0x825   :  { %3491 = vmatpush1.bf16.msra.mxu1 %v3490_v6  ;;  %v3524_v6 = vpack.c.bf16 %v1792_v4, %v1790_v3  ;;  %v3562_v3 = vpack.c.bf16 %v1827_v0, %v1825_v63  ;;  %v3564_v4 = vpack.c.bf16 %v1832_v2, %v1830_v1  ;;  %v1955_v63 = vld [vmem:[#allocation10 + $0x878] sm:$0xff]  ;;  %v1952_v2 = vld [vmem:[#allocation10 + $0x860] sm:$0xff] }
 0x826   :  { %3493 = vmatprep.subr.bf16.mxu1 %v3492_v7  ;;  %v1789_v7 = vld [vmem:[#allocation10 + $0x620] sm:$0xff] }
 0x827   :  { %v3526_v11 = vpack.c.bf16 %v1791_v8, %v1789_v7  ;;  %v1834_v7 = vld [vmem:[#allocation10 + $0x788] sm:$0xff]  ;;  %v1836_v8 = vld [vmem:[#allocation10 + $0x798] sm:$0xff] }
 0x829   :  { %3495 = vmatpush1.bf16.msra.mxu1 %v3494_v12  ;;  %v3528_v12 = vpack.c.bf16 %v1796_v10, %v1794_v9  ;;  %v3568_v10 = vpack.c.bf16 %v1836_v8, %v1834_v7  ;;  %v1956_v8 = vld [vmem:[#allocation10 + $0x880] sm:$0xff] }
 0x82a   :  { %3497 = vmatprep.subr.bf16.mxu1 %v3496_v13  ;;  %v1793_v13 = vld [vmem:[#allocation10 + $0x640] sm:$0xff] }
 0x82b   :  { %v3530_v17 = vpack.c.bf16 %v1795_v14, %v1793_v13  ;;  %v1838_v13 = vld [vmem:[#allocation10 + $0x7a8] sm:$0xff]  ;;  %v1840_v14 = vld [vmem:[#allocation10 + $0x7b8] sm:$0xff] }
 0x82d   :  { %3499 = vmatpush1.bf16.msra.mxu1 %v3498_v18  ;;  %v3532_v18 = vpack.c.bf16 %v1800_v16, %v1798_v15  ;;  %v3572_v16 = vpack.c.bf16 %v1840_v14, %v1838_v13  ;;  %v1960_v14 = vld [vmem:[#allocation10 + $0x8a0] sm:$0xff] }
 0x82e   :  { %3501 = vmatprep.subr.bf16.mxu1 %v3500_v19  ;;  %v1797_v19 = vld [vmem:[#allocation10 + $0x660] sm:$0xff] }
 0x82f   :  { %v3534_v23 = vpack.c.bf16 %v1799_v20, %v1797_v19  ;;  %v1540_v20 = vld [vmem:[#allocation11 + $0x2] sm:$0x3] }
 0x831   :  { %3503 = vmatpush1.bf16.msra.mxu1 %v3502_v24  ;;  %v3536_v24 = vpack.c.bf16 %v1804_v22, %v1802_v21  ;;  %v1545_v21 = vrot.slane %v1540_v20, %v4225_v37  ;;  %v1549_v22 = vrot.slane %v1540_v20, %v4227_v39  ;;  %v1964_v20 = vld [vmem:[#allocation10 + $0x8c0] sm:$0xff] }
 0x832   :  { %3505 = vmatprep.subr.bf16.mxu1 %v3504_v25  ;;  %v1801_v25 = vld [vmem:[#allocation10 + $0x680] sm:$0xff] }
 0x833   :  { %v3538_v29 = vpack.c.bf16 %v1803_v26, %v1801_v25 }
 0x835   :  { %3507 = vmatpush1.bf16.msra.mxu1 %v3506_v30  ;;  %v3540_v30 = vpack.c.bf16 %v1808_v28, %v1806_v27 }
 0x836   :  { %3509 = vmatprep.subr.bf16.mxu1 %v3508_v31  ;;  %v1805_v31 = vld [vmem:[#allocation10 + $0x6a0] sm:$0xff] }
 0x837   :  { %v3542_v35 = vpack.c.bf16 %v1807_v32, %v1805_v31  ;;  %v1842_v31 = vld [vmem:[#allocation10 + $0x7c8] sm:$0xff]  ;;  %v1844_v32 = vld [vmem:[#allocation10 + $0x7d8] sm:$0xff] }
 0x839   :  { %3511 = vmatpush1.bf16.msra.mxu1 %v3510_v34  ;;  %v1812_v34 = vld [vmem:[#allocation10 + $0x6d8] sm:$0xff] }
 0x83a   :  { %3513 = vmatprep.subr.bf16.mxu1 %v3512_v52  ;;  %v3544_v36 = vpack.c.bf16 %v1812_v34, %v1810_v33  ;;  %v1819_v52 = vld [vmem:[#allocation10 + $0x710] sm:$0xff]  ;;  %v3576_v33 = vpack.c.bf16 %v1844_v32, %v1842_v31  ;;  %v1841_v34 = vld [vmem:[#allocation10 + $0x7c0] sm:$0xff] }
 0x83b   :  { %v1972_v32 = vld [vmem:[#allocation10 + $0x900] sm:$0xff] }
 0x83d   :  { %3515 = vmatpush1.bf16.msra.mxu1 %v3514_v55  ;;  %v3554_v55 = vpack.c.bf16 %v1819_v52, %v1817_v51  ;;  %v1947_v51 = vld [vmem:[#allocation10 + $0x838] sm:$0xff] }
 0x83e   :  { %3517 = vmatprep.subr.bf16.mxu1 %v3516_v58  ;;  %v1823_v58 = vld [vmem:[#allocation10 + $0x730] sm:$0xff] }
 0x841   :  { %3519 = vmatpush1.bf16.msra.mxu1 %v3518_v61  ;;  %v3558_v61 = vpack.c.bf16 %v1823_v58, %v1821_v57  ;;  %v1951_v57 = vld [vmem:[#allocation10 + $0x858] sm:$0xff] }
 0x8d7   :  { %v1463_v42 = vpop.f32.mrb[22].mxu1 }
 0x8d8   :  { %v1464_v43 = vadd.f32 %v1463_v42, %v1390_v40  ;;  %v1465_v44 = vpop.f32.mrb[23].mxu1  ;;  %v1811_v40 = vld [vmem:[#allocation10 + $0x6d0] sm:$0xff]  ;;  %v1816_v42 = vld [vmem:[#allocation10 + $0x6f8] sm:$0xff] }
 0x8d9   :  { %v1466_v45 = vadd.f32 %v1465_v44, %v1394_v41  ;;  %v1814_v41 = vld [vmem:[#allocation10 + $0x6e8] sm:$0xff] }
 0x8da   :  { %v1470_v46 = vmul.f32 0.01, %v1464_v43  ;;  %vm1468_vm3 = vcmp.gt.f32.partialorder %v1464_v43, 0.0  ;;  %v3548_v44 = vpack.c.bf16 %v1816_v42, %v1814_v41  ;;  %v1845_v42 = vld [vmem:[#allocation10 + $0x7e0] sm:$0xff] }
 0x8db   :  { %v1471_v47 = vmul.f32 0.01, %v1466_v45  ;;  %vm1469_vm4 = vcmp.gt.f32.partialorder %v1466_v45, 0.0 }
 0x8dc   :  { %v1472_v49 = vsel %vm1468_vm3, %v1464_v43, %v1470_v46  ;;  %v3546_v43 = vpack.c.bf16 %v1811_v40, %v1809_v38  ;;  %v1815_v46 = vld [vmem:[#allocation10 + $0x6f0] sm:$0xff]  ;;  %v1846_v38 = vld [vmem:[#allocation10 + $0x7e8] sm:$0xff]  ;;  %v1848_v40 = vld [vmem:[#allocation10 + $0x7f8] sm:$0xff]  ;;  %vm2560_vm3 = vcmask 181248  }
 0x8dd   :  { %v1473_v48 = vsel %vm1469_vm4, %v1466_v45, %v1471_v47  ;;  %v1813_v45 = vld [vmem:[#allocation10 + $0x6e0] sm:$0xff]  ;;  %v1818_v47 = vld [vmem:[#allocation10 + $0x708] sm:$0xff]  ;;  %v3580_v41 = vpack.c.bf16 %v1848_v40, %v1846_v38 }
 0x8de   :  { %1616 = vmatprep.mubr.f32.mxu0 %v1473_v48  ;;  %v1820_v48 = vld [vmem:[#allocation10 + $0x718] sm:$0xff]  ;;  %v1976_v40 = vld [vmem:[#allocation10 + $0x920] sm:$0xff] }
 0x8df   :  { %1617 = vmatmul.mubr.f32.vlgmr.msra.gmra.mrb[24].mxu0 %v1472_v49  ;;  %v3550_v49 = vpack.c.bf16 %v1815_v46, %v1813_v45  ;;  %v3552_v50 = vpack.c.bf16 %v1820_v48, %v1818_v47  ;;  %v1941_v45 = vld [vmem:[#allocation10 + $0x808] sm:$0xff]  ;;  %v1943_v46 = vld [vmem:[#allocation10 + $0x818] sm:$0xff]  ;;  %v1940_v47 = vld [vmem:[#allocation10 + $0x800] sm:$0xff] }
 0x8e0   :  { %3523 = vmatpush1.bf16.msra.mxu0 %v3522_v5  ;;  %v1829_v5 = vld [vmem:[#allocation10 + $0x760] sm:$0xff]  ;;  %v3584_v48 = vpack.c.bf16 %v1943_v46, %v1941_v45 }
 0x8e1   :  { %3525 = vmatprep.subr.bf16.mxu0 %v3524_v6  ;;  %v1831_v6 = vld [vmem:[#allocation10 + $0x770] sm:$0xff]  ;;  %v1980_v46 = vld [vmem:[#allocation10 + $0x940] sm:$0xff] }
 0x8e2   :  { %v3566_v9 = vpack.c.bf16 %v1831_v6, %v1829_v5  ;;  %3585 = vmatprep.subr.bf16.mxu1 %v3584_v48  ;;  %v1959_v5 = vld [vmem:[#allocation10 + $0x898] sm:$0xff]  ;;  %v1985_v48 = vld [vmem:[#allocation10 + $0x968] sm:$0xff] }
 0x8e4   :  { %3527 = vmatpush1.bf16.msra.mxu0 %v3526_v11  ;;  %v1833_v11 = vld [vmem:[#allocation10 + $0x780] sm:$0xff] }
 0x8e5   :  { %3529 = vmatprep.subr.bf16.mxu0 %v3528_v12  ;;  %v1835_v12 = vld [vmem:[#allocation10 + $0x790] sm:$0xff] }
 0x8e6   :  { %v3570_v15 = vpack.c.bf16 %v1835_v12, %v1833_v11  ;;  %v1963_v11 = vld [vmem:[#allocation10 + $0x8b8] sm:$0xff] }
 0x8e8   :  { %3531 = vmatpush1.bf16.msra.mxu0 %v3530_v17  ;;  %v1837_v17 = vld [vmem:[#allocation10 + $0x7a0] sm:$0xff] }
 0x8e9   :  { %3533 = vmatprep.subr.bf16.mxu0 %v3532_v18  ;;  %v1839_v18 = vld [vmem:[#allocation10 + $0x7b0] sm:$0xff] }
 0x8ea   :  { %v3574_v19 = vpack.c.bf16 %v1839_v18, %v1837_v17  ;;  %v1967_v17 = vld [vmem:[#allocation10 + $0x8d8] sm:$0xff] }
 0x8ec   :  { %3535 = vmatpush1.bf16.msra.mxu0 %v3534_v23 }
 0x8ed   :  { %3537 = vmatprep.subr.bf16.mxu0 %v3536_v24 }
 0x8f0   :  { %3539 = vmatpush1.bf16.msra.mxu0 %v3538_v29 }
 0x8f1   :  { %3541 = vmatprep.subr.bf16.mxu0 %v3540_v30 }
 0x8f4   :  { %3543 = vmatpush1.bf16.msra.mxu0 %v3542_v35  ;;  %v1843_v35 = vld [vmem:[#allocation10 + $0x7d0] sm:$0xff] }
 0x8f5   :  { %3545 = vmatprep.subr.bf16.mxu0 %v3544_v36  ;;  %v3578_v36 = vpack.c.bf16 %v1843_v35, %v1841_v34  ;;  %v1977_v34 = vld [vmem:[#allocation10 + $0x928] sm:$0xff]  ;;  %v1979_v35 = vld [vmem:[#allocation10 + $0x938] sm:$0xff] }
 0x8f6   :  { %v3620_v38 = vpack.c.bf16 %v1979_v35, %v1977_v34  ;;  %v2099_v35 = vld [vmem:[#allocation10 + $0xa20] sm:$0xff] }
 0x8f8   :  { %3547 = vmatpush1.bf16.msra.mxu0 %v3546_v43  ;;  %v1847_v43 = vld [vmem:[#allocation10 + $0x7f0] sm:$0xff] }
 0x8f9   :  { %3549 = vmatprep.subr.bf16.mxu0 %v3548_v44  ;;  %v3582_v44 = vpack.c.bf16 %v1847_v43, %v1845_v42  ;;  %v1981_v42 = vld [vmem:[#allocation10 + $0x948] sm:$0xff]  ;;  %v1983_v43 = vld [vmem:[#allocation10 + $0x958] sm:$0xff] }
 0x8fa   :  { %v3624_v45 = vpack.c.bf16 %v1983_v43, %v1981_v42  ;;  %v2103_v43 = vld [vmem:[#allocation10 + $0xa40] sm:$0xff] }
 0x8fc   :  { %3551 = vmatpush1.bf16.msra.mxu0 %v3550_v49  ;;  %v1942_v49 = vld [vmem:[#allocation10 + $0x810] sm:$0xff] }
 0x8fd   :  { %3553 = vmatprep.subr.bf16.mxu0 %v3552_v50  ;;  %v1945_v50 = vld [vmem:[#allocation10 + $0x828] sm:$0xff]  ;;  %v3586_v52 = vpack.c.bf16 %v1942_v49, %v1940_v47  ;;  %v1982_v47 = vld [vmem:[#allocation10 + $0x950] sm:$0xff]  ;;  %v1987_v49 = vld [vmem:[#allocation10 + $0x978] sm:$0xff] }
 0x8fe   :  { %v3588_v53 = vpack.c.bf16 %v1947_v51, %v1945_v50  ;;  %v3626_v50 = vpack.c.bf16 %v1982_v47, %v1980_v46  ;;  %v3628_v51 = vpack.c.bf16 %v1987_v49, %v1985_v48  ;;  %v2110_v46 = vld [vmem:[#allocation10 + $0xa78] sm:$0xff]  ;;  %v2107_v49 = vld [vmem:[#allocation10 + $0xa60] sm:$0xff] }
 0x900   :  { %3555 = vmatpush1.bf16.msra.mxu0 %v3554_v55  ;;  %v1946_v55 = vld [vmem:[#allocation10 + $0x830] sm:$0xff] }
 0x901   :  { %3557 = vmatprep.subr.bf16.mxu0 %v3556_v56  ;;  %v1949_v56 = vld [vmem:[#allocation10 + $0x848] sm:$0xff]  ;;  %v3590_v58 = vpack.c.bf16 %v1946_v55, %v1944_v54  ;;  %v1991_v55 = vld [vmem:[#allocation10 + $0x998] sm:$0xff] }
 0x902   :  { %v3592_v59 = vpack.c.bf16 %v1951_v57, %v1949_v56  ;;  %v1989_v54 = vld [vmem:[#allocation10 + $0x988] sm:$0xff] }
 0x903   :  { %v3632_v57 = vpack.c.bf16 %v1991_v55, %v1989_v54  ;;  %v2111_v55 = vld [vmem:[#allocation10 + $0xa80] sm:$0xff] }
 0x904   :  { %3559 = vmatpush1.bf16.msra.mxu0 %v3558_v61  ;;  %v1950_v61 = vld [vmem:[#allocation10 + $0x850] sm:$0xff] }
 0x905   :  { %3561 = vmatprep.subr.bf16.mxu0 %v3560_v62  ;;  %v1953_v62 = vld [vmem:[#allocation10 + $0x868] sm:$0xff]  ;;  %v3594_v0 = vpack.c.bf16 %v1950_v61, %v1948_v60  ;;  %v1995_v61 = vld [vmem:[#allocation10 + $0x9b8] sm:$0xff] }
 0x906   :  { %v3596_v1 = vpack.c.bf16 %v1955_v63, %v1953_v62  ;;  %v1993_v60 = vld [vmem:[#allocation10 + $0x9a8] sm:$0xff] }
 0x907   :  { %v3636_v63 = vpack.c.bf16 %v1995_v61, %v1993_v60  ;;  %v2115_v61 = vld [vmem:[#allocation10 + $0xaa0] sm:$0xff] }
 0x908   :  { %3563 = vmatpush1.bf16.msra.mxu0 %v3562_v3  ;;  %v1954_v3 = vld [vmem:[#allocation10 + $0x870] sm:$0xff] }
 0x909   :  { %3565 = vmatprep.subr.bf16.mxu0 %v3564_v4  ;;  %v1957_v4 = vld [vmem:[#allocation10 + $0x888] sm:$0xff]  ;;  %v3598_v6 = vpack.c.bf16 %v1954_v3, %v1952_v2  ;;  %v1695_v3 = vld [vmem:[#allocation11 + $0x4] sm:$0x3] }
 0x90a   :  { %v3600_v7 = vpack.c.bf16 %v1959_v5, %v1957_v4  ;;  %v1700_v4 = vrot.slane %v1695_v3, %v4225_v37  ;;  %v1704_v5 = vrot.slane %v1695_v3, %v4227_v39  ;;  %v2119_v3 = vld [vmem:[#allocation10 + $0xac0] sm:$0xff] }
 0x90c   :  { %3567 = vmatpush1.bf16.msra.mxu0 %v3566_v9  ;;  %v1958_v9 = vld [vmem:[#allocation10 + $0x890] sm:$0xff] }
 0x90d   :  { %3569 = vmatprep.subr.bf16.mxu0 %v3568_v10  ;;  %v1961_v10 = vld [vmem:[#allocation10 + $0x8a8] sm:$0xff]  ;;  %v3602_v12 = vpack.c.bf16 %v1958_v9, %v1956_v8 }
 0x90e   :  { %v3604_v13 = vpack.c.bf16 %v1963_v11, %v1961_v10 }
 0x910   :  { %3571 = vmatpush1.bf16.msra.mxu0 %v3570_v15  ;;  %v1962_v15 = vld [vmem:[#allocation10 + $0x8b0] sm:$0xff] }
 0x911   :  { %3573 = vmatprep.subr.bf16.mxu0 %v3572_v16  ;;  %v1965_v16 = vld [vmem:[#allocation10 + $0x8c8] sm:$0xff]  ;;  %v3606_v18 = vpack.c.bf16 %v1962_v15, %v1960_v14  ;;  %v1999_v15 = vld [vmem:[#allocation10 + $0x9d8] sm:$0xff] }
 0x912   :  { %v1997_v14 = vld [vmem:[#allocation10 + $0x9c8] sm:$0xff] }
 0x914   :  { %3575 = vmatpush1.bf16.msra.mxu0 %v3574_v19  ;;  %v3608_v19 = vpack.c.bf16 %v1967_v17, %v1965_v16  ;;  %v3640_v16 = vpack.c.bf16 %v1999_v15, %v1997_v14  ;;  %v1996_v17 = vld [vmem:[#allocation10 + $0x9c0] sm:$0xff] }
 0x915   :  { %3577 = vmatprep.subr.bf16.mxu0 %v3576_v33  ;;  %v1974_v33 = vld [vmem:[#allocation10 + $0x910] sm:$0xff]  ;;  %v2127_v15 = vld [vmem:[#allocation10 + $0xb00] sm:$0xff] }
 0x918   :  { %3579 = vmatpush1.bf16.msra.mxu0 %v3578_v36  ;;  %v3618_v36 = vpack.c.bf16 %v1974_v33, %v1972_v32  ;;  %v2102_v32 = vld [vmem:[#allocation10 + $0xa38] sm:$0xff] }
 0x919   :  { %3581 = vmatprep.subr.bf16.mxu0 %v3580_v41  ;;  %v1978_v41 = vld [vmem:[#allocation10 + $0x930] sm:$0xff] }
 0x91c   :  { %3583 = vmatpush1.bf16.msra.mxu0 %v3582_v44  ;;  %v3622_v44 = vpack.c.bf16 %v1978_v41, %v1976_v40  ;;  %v2106_v40 = vld [vmem:[#allocation10 + $0xa58] sm:$0xff] }
 0x9b2   :  { %v1618_v23 = vpop.f32.mrb[24].mxu0 }
 0x9b3   :  { %v1619_v24 = vadd.f32 %v1618_v23, %v1545_v21  ;;  %v1620_v25 = vpop.f32.mrb[25].mxu0  ;;  %v1966_v21 = vld [vmem:[#allocation10 + $0x8d0] sm:$0xff]  ;;  %v1971_v23 = vld [vmem:[#allocation10 + $0x8f8] sm:$0xff] }
 0x9b4   :  { %v1621_v26 = vadd.f32 %v1620_v25, %v1549_v22  ;;  %v1969_v22 = vld [vmem:[#allocation10 + $0x8e8] sm:$0xff] }
 0x9b5   :  { %v1625_v27 = vmul.f32 0.01, %v1619_v24  ;;  %vm1623_vm5 = vcmp.gt.f32.partialorder %v1619_v24, 0.0  ;;  %v3612_v25 = vpack.c.bf16 %v1971_v23, %v1969_v22  ;;  %v2000_v23 = vld [vmem:[#allocation10 + $0x9e0] sm:$0xff] }
 0x9b6   :  { %v1626_v28 = vmul.f32 0.01, %v1621_v26  ;;  %vm1624_vm6 = vcmp.gt.f32.partialorder %v1621_v26, 0.0 }
 0x9b7   :  { %v1627_v30 = vsel %vm1623_vm5, %v1619_v24, %v1625_v27  ;;  %v3610_v24 = vpack.c.bf16 %v1966_v21, %v1964_v20  ;;  %v1970_v27 = vld [vmem:[#allocation10 + $0x8f0] sm:$0xff]  ;;  %v2001_v20 = vld [vmem:[#allocation10 + $0x9e8] sm:$0xff]  ;;  %v2003_v21 = vld [vmem:[#allocation10 + $0x9f8] sm:$0xff] }
 0x9b8   :  { %v1628_v29 = vsel %vm1624_vm6, %v1621_v26, %v1626_v28  ;;  %v1968_v26 = vld [vmem:[#allocation10 + $0x8e0] sm:$0xff]  ;;  %v1973_v28 = vld [vmem:[#allocation10 + $0x908] sm:$0xff]  ;;  %v3644_v22 = vpack.c.bf16 %v2003_v21, %v2001_v20 }
 0x9b9   :  { %1771 = vmatprep.mubr.f32.mxu1 %v1628_v29  ;;  %v1975_v29 = vld [vmem:[#allocation10 + $0x918] sm:$0xff]  ;;  %v2131_v21 = vld [vmem:[#allocation10 + $0xb20] sm:$0xff] }
 0x9ba   :  { %1772 = vmatmul.mubr.f32.vlgmr.msra.gmra.mrb[24].mxu1 %v1627_v30  ;;  %v3614_v30 = vpack.c.bf16 %v1970_v27, %v1968_v26  ;;  %v3616_v31 = vpack.c.bf16 %v1975_v29, %v1973_v28  ;;  %v2096_v26 = vld [vmem:[#allocation10 + $0xa08] sm:$0xff]  ;;  %v2098_v27 = vld [vmem:[#allocation10 + $0xa18] sm:$0xff]  ;;  %v2095_v28 = vld [vmem:[#allocation10 + $0xa00] sm:$0xff] }
 0x9bb   :  { %3587 = vmatpush1.bf16.msra.mxu1 %v3586_v52  ;;  %v1984_v52 = vld [vmem:[#allocation10 + $0x960] sm:$0xff]  ;;  %v3648_v29 = vpack.c.bf16 %v2098_v27, %v2096_v26 }
 0x9bc   :  { %3589 = vmatprep.subr.bf16.mxu1 %v3588_v53  ;;  %v1986_v53 = vld [vmem:[#allocation10 + $0x970] sm:$0xff]  ;;  %v2135_v27 = vld [vmem:[#allocation10 + $0xb40] sm:$0xff] }
 0x9bd   :  { %v3630_v56 = vpack.c.bf16 %v1986_v53, %v1984_v52  ;;  %3649 = vmatprep.subr.bf16.mxu0 %v3648_v29  ;;  %v2114_v52 = vld [vmem:[#allocation10 + $0xa98] sm:$0xff]  ;;  %v2140_v29 = vld [vmem:[#allocation10 + $0xb68] sm:$0xff] }
 0x9bf   :  { %3591 = vmatpush1.bf16.msra.mxu1 %v3590_v58  ;;  %v1988_v58 = vld [vmem:[#allocation10 + $0x980] sm:$0xff] }
 0x9c0   :  { %3593 = vmatprep.subr.bf16.mxu1 %v3592_v59  ;;  %v1990_v59 = vld [vmem:[#allocation10 + $0x990] sm:$0xff] }
 0x9c1   :  { %v3634_v62 = vpack.c.bf16 %v1990_v59, %v1988_v58  ;;  %v2118_v58 = vld [vmem:[#allocation10 + $0xab8] sm:$0xff] }
 0x9c3   :  { %3595 = vmatpush1.bf16.msra.mxu1 %v3594_v0  ;;  %v1992_v0 = vld [vmem:[#allocation10 + $0x9a0] sm:$0xff] }
 0x9c4   :  { %3597 = vmatprep.subr.bf16.mxu1 %v3596_v1  ;;  %v1994_v1 = vld [vmem:[#allocation10 + $0x9b0] sm:$0xff] }
 0x9c5   :  { %v3638_v2 = vpack.c.bf16 %v1994_v1, %v1992_v0  ;;  %v2122_v0 = vld [vmem:[#allocation10 + $0xad8] sm:$0xff] }
 0x9c7   :  { %3599 = vmatpush1.bf16.msra.mxu1 %v3598_v6 }
 0x9c8   :  { %3601 = vmatprep.subr.bf16.mxu1 %v3600_v7 }
 0x9cb   :  { %3603 = vmatpush1.bf16.msra.mxu1 %v3602_v12 }
 0x9cc   :  { %3605 = vmatprep.subr.bf16.mxu1 %v3604_v13 }
 0x9cf   :  { %3607 = vmatpush1.bf16.msra.mxu1 %v3606_v18  ;;  %v1998_v18 = vld [vmem:[#allocation10 + $0x9d0] sm:$0xff] }
 0x9d0   :  { %3609 = vmatprep.subr.bf16.mxu1 %v3608_v19  ;;  %v3642_v19 = vpack.c.bf16 %v1998_v18, %v1996_v17  ;;  %v2132_v17 = vld [vmem:[#allocation10 + $0xb28] sm:$0xff]  ;;  %v2134_v18 = vld [vmem:[#allocation10 + $0xb38] sm:$0xff] }
 0x9d1   :  { %v3684_v20 = vpack.c.bf16 %v2134_v18, %v2132_v17  ;;  %v2254_v18 = vld [vmem:[#allocation10 + $0xc20] sm:$0xff] }
 0x9d3   :  { %3611 = vmatpush1.bf16.msra.mxu1 %v3610_v24  ;;  %v2002_v24 = vld [vmem:[#allocation10 + $0x9f0] sm:$0xff] }
 0x9d4   :  { %3613 = vmatprep.subr.bf16.mxu1 %v3612_v25  ;;  %v3646_v25 = vpack.c.bf16 %v2002_v24, %v2000_v23  ;;  %v2136_v23 = vld [vmem:[#allocation10 + $0xb48] sm:$0xff]  ;;  %v2138_v24 = vld [vmem:[#allocation10 + $0xb58] sm:$0xff] }
 0x9d5   :  { %v3688_v26 = vpack.c.bf16 %v2138_v24, %v2136_v23  ;;  %v2258_v24 = vld [vmem:[#allocation10 + $0xc40] sm:$0xff] }
 0x9d7   :  { %3615 = vmatpush1.bf16.msra.mxu1 %v3614_v30  ;;  %v2097_v30 = vld [vmem:[#allocation10 + $0xa10] sm:$0xff] }
 0x9d8   :  { %3617 = vmatprep.subr.bf16.mxu1 %v3616_v31  ;;  %v2100_v31 = vld [vmem:[#allocation10 + $0xa28] sm:$0xff]  ;;  %v3650_v33 = vpack.c.bf16 %v2097_v30, %v2095_v28  ;;  %v2137_v28 = vld [vmem:[#allocation10 + $0xb50] sm:$0xff]  ;;  %v2142_v30 = vld [vmem:[#allocation10 + $0xb78] sm:$0xff] }
 0x9d9   :  { %v3652_v34 = vpack.c.bf16 %v2102_v32, %v2100_v31  ;;  %v3690_v31 = vpack.c.bf16 %v2137_v28, %v2135_v27  ;;  %v3692_v32 = vpack.c.bf16 %v2142_v30, %v2140_v29  ;;  %v2265_v27 = vld [vmem:[#allocation10 + $0xc78] sm:$0xff]  ;;  %v2262_v30 = vld [vmem:[#allocation10 + $0xc60] sm:$0xff] }
 0x9db   :  { %3619 = vmatpush1.bf16.msra.mxu1 %v3618_v36  ;;  %v2101_v36 = vld [vmem:[#allocation10 + $0xa30] sm:$0xff] }
 0x9dc   :  { %3621 = vmatprep.subr.bf16.mxu1 %v3620_v38  ;;  %v2104_v38 = vld [vmem:[#allocation10 + $0xa48] sm:$0xff]  ;;  %v3654_v41 = vpack.c.bf16 %v2101_v36, %v2099_v35  ;;  %v2146_v36 = vld [vmem:[#allocation10 + $0xb98] sm:$0xff] }
 0x9dd   :  { %v3656_v42 = vpack.c.bf16 %v2106_v40, %v2104_v38  ;;  %v2144_v35 = vld [vmem:[#allocation10 + $0xb88] sm:$0xff] }
 0x9de   :  { %v3696_v40 = vpack.c.bf16 %v2146_v36, %v2144_v35  ;;  %v2266_v36 = vld [vmem:[#allocation10 + $0xc80] sm:$0xff] }
 0x9df   :  { %3623 = vmatpush1.bf16.msra.mxu1 %v3622_v44  ;;  %v2105_v44 = vld [vmem:[#allocation10 + $0xa50] sm:$0xff] }
 0x9e0   :  { %3625 = vmatprep.subr.bf16.mxu1 %v3624_v45  ;;  %v2108_v45 = vld [vmem:[#allocation10 + $0xa68] sm:$0xff]  ;;  %v3658_v47 = vpack.c.bf16 %v2105_v44, %v2103_v43  ;;  %v2150_v44 = vld [vmem:[#allocation10 + $0xbb8] sm:$0xff] }
 0x9e1   :  { %v3660_v48 = vpack.c.bf16 %v2110_v46, %v2108_v45  ;;  %v2148_v43 = vld [vmem:[#allocation10 + $0xba8] sm:$0xff] }
 0x9e2   :  { %v3700_v46 = vpack.c.bf16 %v2150_v44, %v2148_v43  ;;  %v2270_v44 = vld [vmem:[#allocation10 + $0xca0] sm:$0xff] }
 0x9e3   :  { %3627 = vmatpush1.bf16.msra.mxu1 %v3626_v50  ;;  %v2109_v50 = vld [vmem:[#allocation10 + $0xa70] sm:$0xff] }
 0x9e4   :  { %3629 = vmatprep.subr.bf16.mxu1 %v3628_v51  ;;  %v2112_v51 = vld [vmem:[#allocation10 + $0xa88] sm:$0xff]  ;;  %v3662_v53 = vpack.c.bf16 %v2109_v50, %v2107_v49  ;;  %v1850_v50 = vld [vmem:[#allocation11 + $0x6] sm:$0x3] }
 0x9e5   :  { %v3664_v54 = vpack.c.bf16 %v2114_v52, %v2112_v51  ;;  %v1855_v51 = vrot.slane %v1850_v50, %v4225_v37  ;;  %v1859_v52 = vrot.slane %v1850_v50, %v4227_v39  ;;  %v2274_v50 = vld [vmem:[#allocation10 + $0xcc0] sm:$0xff] }
 0x9e7   :  { %3631 = vmatpush1.bf16.msra.mxu1 %v3630_v56  ;;  %v2113_v56 = vld [vmem:[#allocation10 + $0xa90] sm:$0xff] }
 0x9e8   :  { %3633 = vmatprep.subr.bf16.mxu1 %v3632_v57  ;;  %v2116_v57 = vld [vmem:[#allocation10 + $0xaa8] sm:$0xff]  ;;  %v3666_v59 = vpack.c.bf16 %v2113_v56, %v2111_v55 }
 0x9e9   :  { %v3668_v60 = vpack.c.bf16 %v2118_v58, %v2116_v57 }
 0x9eb   :  { %3635 = vmatpush1.bf16.msra.mxu1 %v3634_v62  ;;  %v2117_v62 = vld [vmem:[#allocation10 + $0xab0] sm:$0xff] }
 0x9ec   :  { %3637 = vmatprep.subr.bf16.mxu1 %v3636_v63  ;;  %v2120_v63 = vld [vmem:[#allocation10 + $0xac8] sm:$0xff]  ;;  %v3670_v1 = vpack.c.bf16 %v2117_v62, %v2115_v61  ;;  %v2154_v62 = vld [vmem:[#allocation10 + $0xbd8] sm:$0xff] }
 0x9ed   :  { %v2152_v61 = vld [vmem:[#allocation10 + $0xbc8] sm:$0xff] }
 0x9ef   :  { %3639 = vmatpush1.bf16.msra.mxu1 %v3638_v2  ;;  %v3672_v2 = vpack.c.bf16 %v2122_v0, %v2120_v63  ;;  %v3704_v63 = vpack.c.bf16 %v2154_v62, %v2152_v61  ;;  %v2151_v0 = vld [vmem:[#allocation10 + $0xbc0] sm:$0xff] }
 0x9f0   :  { %3641 = vmatprep.subr.bf16.mxu1 %v3640_v16  ;;  %v2129_v16 = vld [vmem:[#allocation10 + $0xb10] sm:$0xff]  ;;  %v2282_v62 = vld [vmem:[#allocation10 + $0xd00] sm:$0xff] }
 0x9f3   :  { %3643 = vmatpush1.bf16.msra.mxu1 %v3642_v19  ;;  %v3682_v19 = vpack.c.bf16 %v2129_v16, %v2127_v15  ;;  %v2257_v15 = vld [vmem:[#allocation10 + $0xc38] sm:$0xff] }
 0x9f4   :  { %3645 = vmatprep.subr.bf16.mxu1 %v3644_v22  ;;  %v2133_v22 = vld [vmem:[#allocation10 + $0xb30] sm:$0xff] }
 0x9f7   :  { %3647 = vmatpush1.bf16.msra.mxu1 %v3646_v25  ;;  %v3686_v25 = vpack.c.bf16 %v2133_v22, %v2131_v21  ;;  %v2261_v21 = vld [vmem:[#allocation10 + $0xc58] sm:$0xff] }
 0xa8d   :  { %v1773_v6 = vpop.f32.mrb[24].mxu1 }
 0xa8e   :  { %v1774_v7 = vadd.f32 %v1773_v6, %v1700_v4  ;;  %v1775_v8 = vpop.f32.mrb[25].mxu1  ;;  %v2121_v4 = vld [vmem:[#allocation10 + $0xad0] sm:$0xff]  ;;  %v2126_v6 = vld [vmem:[#allocation10 + $0xaf8] sm:$0xff] }
 0xa8f   :  { %v1776_v9 = vadd.f32 %v1775_v8, %v1704_v5  ;;  %v2124_v5 = vld [vmem:[#allocation10 + $0xae8] sm:$0xff] }
 0xa90   :  { %v1780_v10 = vmul.f32 0.01, %v1774_v7  ;;  %vm1778_vm7 = vcmp.gt.f32.partialorder %v1774_v7, 0.0  ;;  %v3676_v8 = vpack.c.bf16 %v2126_v6, %v2124_v5  ;;  %v2155_v6 = vld [vmem:[#allocation10 + $0xbe0] sm:$0xff] }
 0xa91   :  { %v1781_v11 = vmul.f32 0.01, %v1776_v9  ;;  %vm1779_vm8 = vcmp.gt.f32.partialorder %v1776_v9, 0.0 }
 0xa92   :  { %v1782_v13 = vsel %vm1778_vm7, %v1774_v7, %v1780_v10  ;;  %v3674_v7 = vpack.c.bf16 %v2121_v4, %v2119_v3  ;;  %v2125_v10 = vld [vmem:[#allocation10 + $0xaf0] sm:$0xff]  ;;  %v2156_v3 = vld [vmem:[#allocation10 + $0xbe8] sm:$0xff]  ;;  %v2158_v4 = vld [vmem:[#allocation10 + $0xbf8] sm:$0xff] }
 0xa93   :  { %v1783_v12 = vsel %vm1779_vm8, %v1776_v9, %v1781_v11  ;;  %v2123_v9 = vld [vmem:[#allocation10 + $0xae0] sm:$0xff]  ;;  %v2128_v11 = vld [vmem:[#allocation10 + $0xb08] sm:$0xff]  ;;  %v3708_v5 = vpack.c.bf16 %v2158_v4, %v2156_v3 }
 0xa94   :  { %1926 = vmatprep.mubr.f32.mxu0 %v1783_v12  ;;  %v2130_v12 = vld [vmem:[#allocation10 + $0xb18] sm:$0xff]  ;;  %v2286_v4 = vld [vmem:[#allocation10 + $0xd20] sm:$0xff] }
 0xa95   :  { %1927 = vmatmul.mubr.f32.vlgmr.msra.gmra.mrb[26].mxu0 %v1782_v13  ;;  %v3678_v13 = vpack.c.bf16 %v2125_v10, %v2123_v9  ;;  %v3680_v14 = vpack.c.bf16 %v2130_v12, %v2128_v11  ;;  %v2251_v9 = vld [vmem:[#allocation10 + $0xc08] sm:$0xff]  ;;  %v2253_v10 = vld [vmem:[#allocation10 + $0xc18] sm:$0xff]  ;;  %v2250_v11 = vld [vmem:[#allocation10 + $0xc00] sm:$0xff] }
 0xa96   :  { %3651 = vmatpush1.bf16.msra.mxu0 %v3650_v33  ;;  %v2139_v33 = vld [vmem:[#allocation10 + $0xb60] sm:$0xff]  ;;  %v3712_v12 = vpack.c.bf16 %v2253_v10, %v2251_v9 }
 0xa97   :  { %3653 = vmatprep.subr.bf16.mxu0 %v3652_v34  ;;  %v2141_v34 = vld [vmem:[#allocation10 + $0xb70] sm:$0xff]  ;;  %v2290_v10 = vld [vmem:[#allocation10 + $0xd40] sm:$0xff] }
 0xa98   :  { %v3694_v38 = vpack.c.bf16 %v2141_v34, %v2139_v33  ;;  %3713 = vmatprep.subr.bf16.mxu1 %v3712_v12  ;;  %v2269_v33 = vld [vmem:[#allocation10 + $0xc98] sm:$0xff]  ;;  %v2295_v12 = vld [vmem:[#allocation10 + $0xd68] sm:$0xff] }
 0xa9a   :  { %3655 = vmatpush1.bf16.msra.mxu0 %v3654_v41  ;;  %v2143_v41 = vld [vmem:[#allocation10 + $0xb80] sm:$0xff] }
 0xa9b   :  { %3657 = vmatprep.subr.bf16.mxu0 %v3656_v42  ;;  %v2145_v42 = vld [vmem:[#allocation10 + $0xb90] sm:$0xff] }
 0xa9c   :  { %v3698_v45 = vpack.c.bf16 %v2145_v42, %v2143_v41  ;;  %v2273_v41 = vld [vmem:[#allocation10 + $0xcb8] sm:$0xff] }
 0xa9e   :  { %3659 = vmatpush1.bf16.msra.mxu0 %v3658_v47  ;;  %v2147_v47 = vld [vmem:[#allocation10 + $0xba0] sm:$0xff] }
 0xa9f   :  { %3661 = vmatprep.subr.bf16.mxu0 %v3660_v48  ;;  %v2149_v48 = vld [vmem:[#allocation10 + $0xbb0] sm:$0xff] }
 0xaa0   :  { %v3702_v49 = vpack.c.bf16 %v2149_v48, %v2147_v47  ;;  %v2277_v47 = vld [vmem:[#allocation10 + $0xcd8] sm:$0xff] }
 0xaa2   :  { %3663 = vmatpush1.bf16.msra.mxu0 %v3662_v53 }
 0xaa3   :  { %3665 = vmatprep.subr.bf16.mxu0 %v3664_v54 }
 0xaa6   :  { %3667 = vmatpush1.bf16.msra.mxu0 %v3666_v59 }
 0xaa7   :  { %3669 = vmatprep.subr.bf16.mxu0 %v3668_v60 }
 0xaaa   :  { %3671 = vmatpush1.bf16.msra.mxu0 %v3670_v1  ;;  %v2153_v1 = vld [vmem:[#allocation10 + $0xbd0] sm:$0xff] }
 0xaab   :  { %3673 = vmatprep.subr.bf16.mxu0 %v3672_v2  ;;  %v3706_v2 = vpack.c.bf16 %v2153_v1, %v2151_v0  ;;  %v2287_v0 = vld [vmem:[#allocation10 + $0xd28] sm:$0xff]  ;;  %v2289_v1 = vld [vmem:[#allocation10 + $0xd38] sm:$0xff] }
 0xaac   :  { %v3748_v3 = vpack.c.bf16 %v2289_v1, %v2287_v0  ;;  %v2409_v1 = vld [vmem:[#allocation10 + $0xe20] sm:$0xff] }
 0xaae   :  { %3675 = vmatpush1.bf16.msra.mxu0 %v3674_v7  ;;  %v2157_v7 = vld [vmem:[#allocation10 + $0xbf0] sm:$0xff] }
 0xaaf   :  { %3677 = vmatprep.subr.bf16.mxu0 %v3676_v8  ;;  %v3710_v8 = vpack.c.bf16 %v2157_v7, %v2155_v6  ;;  %v2291_v6 = vld [vmem:[#allocation10 + $0xd48] sm:$0xff]  ;;  %v2293_v7 = vld [vmem:[#allocation10 + $0xd58] sm:$0xff] }
 0xab0   :  { %v3752_v9 = vpack.c.bf16 %v2293_v7, %v2291_v6  ;;  %v2413_v7 = vld [vmem:[#allocation10 + $0xe40] sm:$0xff] }
 0xab2   :  { %3679 = vmatpush1.bf16.msra.mxu0 %v3678_v13  ;;  %v2252_v13 = vld [vmem:[#allocation10 + $0xc10] sm:$0xff] }
 0xab3   :  { %3681 = vmatprep.subr.bf16.mxu0 %v3680_v14  ;;  %v2255_v14 = vld [vmem:[#allocation10 + $0xc28] sm:$0xff]  ;;  %v3714_v16 = vpack.c.bf16 %v2252_v13, %v2250_v11  ;;  %v2292_v11 = vld [vmem:[#allocation10 + $0xd50] sm:$0xff]  ;;  %v2297_v13 = vld [vmem:[#allocation10 + $0xd78] sm:$0xff] }
 0xab4   :  { %v3716_v17 = vpack.c.bf16 %v2257_v15, %v2255_v14  ;;  %v3754_v14 = vpack.c.bf16 %v2292_v11, %v2290_v10  ;;  %v3756_v15 = vpack.c.bf16 %v2297_v13, %v2295_v12  ;;  %v2420_v10 = vld [vmem:[#allocation10 + $0xe78] sm:$0xff]  ;;  %v2417_v13 = vld [vmem:[#allocation10 + $0xe60] sm:$0xff] }
 0xab6   :  { %3683 = vmatpush1.bf16.msra.mxu0 %v3682_v19  ;;  %v2256_v19 = vld [vmem:[#allocation10 + $0xc30] sm:$0xff] }
 0xab7   :  { %3685 = vmatprep.subr.bf16.mxu0 %v3684_v20  ;;  %v2259_v20 = vld [vmem:[#allocation10 + $0xc48] sm:$0xff]  ;;  %v3718_v22 = vpack.c.bf16 %v2256_v19, %v2254_v18  ;;  %v2301_v19 = vld [vmem:[#allocation10 + $0xd98] sm:$0xff] }
 0xab8   :  { %v3720_v23 = vpack.c.bf16 %v2261_v21, %v2259_v20  ;;  %v2299_v18 = vld [vmem:[#allocation10 + $0xd88] sm:$0xff] }
 0xab9   :  { %v3760_v21 = vpack.c.bf16 %v2301_v19, %v2299_v18  ;;  %v2421_v19 = vld [vmem:[#allocation10 + $0xe80] sm:$0xff] }
 0xaba   :  { %3687 = vmatpush1.bf16.msra.mxu0 %v3686_v25  ;;  %v2260_v25 = vld [vmem:[#allocation10 + $0xc50] sm:$0xff] }
 0xabb   :  { %3689 = vmatprep.subr.bf16.mxu0 %v3688_v26  ;;  %v2263_v26 = vld [vmem:[#allocation10 + $0xc68] sm:$0xff]  ;;  %v3722_v28 = vpack.c.bf16 %v2260_v25, %v2258_v24  ;;  %v2305_v25 = vld [vmem:[#allocation10 + $0xdb8] sm:$0xff] }
 0xabc   :  { %v3724_v29 = vpack.c.bf16 %v2265_v27, %v2263_v26  ;;  %v2303_v24 = vld [vmem:[#allocation10 + $0xda8] sm:$0xff] }
 0xabd   :  { %v3764_v27 = vpack.c.bf16 %v2305_v25, %v2303_v24  ;;  %v2425_v25 = vld [vmem:[#allocation10 + $0xea0] sm:$0xff] }
 0xabe   :  { %3691 = vmatpush1.bf16.msra.mxu0 %v3690_v31  ;;  %v2264_v31 = vld [vmem:[#allocation10 + $0xc70] sm:$0xff] }
 0xabf   :  { %3693 = vmatprep.subr.bf16.mxu0 %v3692_v32  ;;  %v2267_v32 = vld [vmem:[#allocation10 + $0xc88] sm:$0xff]  ;;  %v3726_v34 = vpack.c.bf16 %v2264_v31, %v2262_v30 }
 0xac0   :  { %v3728_v35 = vpack.c.bf16 %v2269_v33, %v2267_v32  ;;  %v2005_v31 = vld [vmem:[#allocation11 + $0x8] sm:$0x3] }
 0xac1   :  { %v2010_v32 = vrot.slane %v2005_v31, %v4225_v37  ;;  %v2014_v33 = vrot.slane %v2005_v31, %v4227_v39  ;;  %v2429_v31 = vld [vmem:[#allocation10 + $0xec0] sm:$0xff] }
 0xac2   :  { %3695 = vmatpush1.bf16.msra.mxu0 %v3694_v38  ;;  %v2268_v38 = vld [vmem:[#allocation10 + $0xc90] sm:$0xff] }
 0xac3   :  { %3697 = vmatprep.subr.bf16.mxu0 %v3696_v40  ;;  %v2271_v40 = vld [vmem:[#allocation10 + $0xca8] sm:$0xff]  ;;  %v3730_v42 = vpack.c.bf16 %v2268_v38, %v2266_v36 }
 0xac4   :  { %v3732_v43 = vpack.c.bf16 %v2273_v41, %v2271_v40 }
 0xac6   :  { %3699 = vmatpush1.bf16.msra.mxu0 %v3698_v45  ;;  %v2272_v45 = vld [vmem:[#allocation10 + $0xcb0] sm:$0xff] }
 0xac7   :  { %3701 = vmatprep.subr.bf16.mxu0 %v3700_v46  ;;  %v2275_v46 = vld [vmem:[#allocation10 + $0xcc8] sm:$0xff]  ;;  %v3734_v48 = vpack.c.bf16 %v2272_v45, %v2270_v44  ;;  %v2309_v45 = vld [vmem:[#allocation10 + $0xdd8] sm:$0xff] }
 0xac8   :  { %v2307_v44 = vld [vmem:[#allocation10 + $0xdc8] sm:$0xff] }
 0xaca   :  { %3703 = vmatpush1.bf16.msra.mxu0 %v3702_v49  ;;  %v3736_v49 = vpack.c.bf16 %v2277_v47, %v2275_v46  ;;  %v3768_v46 = vpack.c.bf16 %v2309_v45, %v2307_v44  ;;  %v2306_v47 = vld [vmem:[#allocation10 + $0xdc0] sm:$0xff] }
 0xacb   :  { %3705 = vmatprep.subr.bf16.mxu0 %v3704_v63  ;;  %v2284_v63 = vld [vmem:[#allocation10 + $0xd10] sm:$0xff]  ;;  %v2437_v45 = vld [vmem:[#allocation10 + $0xf00] sm:$0xff] }
 0xace   :  { %3707 = vmatpush1.bf16.msra.mxu0 %v3706_v2  ;;  %v3746_v2 = vpack.c.bf16 %v2284_v63, %v2282_v62  ;;  %v2412_v62 = vld [vmem:[#allocation10 + $0xe38] sm:$0xff] }
 0xacf   :  { %3709 = vmatprep.subr.bf16.mxu0 %v3708_v5  ;;  %v2288_v5 = vld [vmem:[#allocation10 + $0xd30] sm:$0xff] }
 0xad2   :  { %3711 = vmatpush1.bf16.msra.mxu0 %v3710_v8  ;;  %v3750_v8 = vpack.c.bf16 %v2288_v5, %v2286_v4  ;;  %v2416_v4 = vld [vmem:[#allocation10 + $0xe58] sm:$0xff] }
 0xb68   :  { %v1928_v53 = vpop.f32.mrb[26].mxu0 }
 0xb69   :  { %v1929_v54 = vadd.f32 %v1928_v53, %v1855_v51  ;;  %v1930_v55 = vpop.f32.mrb[27].mxu0  ;;  %v2276_v51 = vld [vmem:[#allocation10 + $0xcd0] sm:$0xff]  ;;  %v2281_v53 = vld [vmem:[#allocation10 + $0xcf8] sm:$0xff] }
 0xb6a   :  { %v1931_v56 = vadd.f32 %v1930_v55, %v1859_v52  ;;  %v2279_v52 = vld [vmem:[#allocation10 + $0xce8] sm:$0xff] }
 0xb6b   :  { %v1935_v57 = vmul.f32 0.01, %v1929_v54  ;;  %vm1933_vm9 = vcmp.gt.f32.partialorder %v1929_v54, 0.0  ;;  %v3740_v55 = vpack.c.bf16 %v2281_v53, %v2279_v52  ;;  %v2310_v53 = vld [vmem:[#allocation10 + $0xde0] sm:$0xff] }
 0xb6c   :  { %v1936_v58 = vmul.f32 0.01, %v1931_v56  ;;  %vm1934_vm10 = vcmp.gt.f32.partialorder %v1931_v56, 0.0 }
 0xb6d   :  { %v1937_v60 = vsel %vm1933_vm9, %v1929_v54, %v1935_v57  ;;  %v3738_v54 = vpack.c.bf16 %v2276_v51, %v2274_v50  ;;  %v2280_v57 = vld [vmem:[#allocation10 + $0xcf0] sm:$0xff]  ;;  %v2311_v50 = vld [vmem:[#allocation10 + $0xde8] sm:$0xff]  ;;  %v2313_v51 = vld [vmem:[#allocation10 + $0xdf8] sm:$0xff] }
 0xb6e   :  { %v1938_v59 = vsel %vm1934_vm10, %v1931_v56, %v1936_v58  ;;  %v2278_v56 = vld [vmem:[#allocation10 + $0xce0] sm:$0xff]  ;;  %v2283_v58 = vld [vmem:[#allocation10 + $0xd08] sm:$0xff]  ;;  %v3772_v52 = vpack.c.bf16 %v2313_v51, %v2311_v50 }
 0xb6f   :  { %2081 = vmatprep.mubr.f32.mxu1 %v1938_v59  ;;  %v2285_v59 = vld [vmem:[#allocation10 + $0xd18] sm:$0xff]  ;;  %v2441_v51 = vld [vmem:[#allocation10 + $0xf20] sm:$0xff] }
 0xb70   :  { %2082 = vmatmul.mubr.f32.vlgmr.msra.gmra.mrb[26].mxu1 %v1937_v60  ;;  %v3742_v60 = vpack.c.bf16 %v2280_v57, %v2278_v56  ;;  %v3744_v61 = vpack.c.bf16 %v2285_v59, %v2283_v58  ;;  %v2406_v56 = vld [vmem:[#allocation10 + $0xe08] sm:$0xff]  ;;  %v2408_v57 = vld [vmem:[#allocation10 + $0xe18] sm:$0xff]  ;;  %v2405_v58 = vld [vmem:[#allocation10 + $0xe00] sm:$0xff] }
 0xb71   :  { %3715 = vmatpush1.bf16.msra.mxu1 %v3714_v16  ;;  %v2294_v16 = vld [vmem:[#allocation10 + $0xd60] sm:$0xff]  ;;  %v3776_v59 = vpack.c.bf16 %v2408_v57, %v2406_v56 }
 0xb72   :  { %3717 = vmatprep.subr.bf16.mxu1 %v3716_v17  ;;  %v2296_v17 = vld [vmem:[#allocation10 + $0xd70] sm:$0xff]  ;;  %v2445_v57 = vld [vmem:[#allocation10 + $0xf40] sm:$0xff] }
 0xb73   :  { %v3758_v20 = vpack.c.bf16 %v2296_v17, %v2294_v16  ;;  %3777 = vmatprep.subr.bf16.mxu0 %v3776_v59  ;;  %v2424_v16 = vld [vmem:[#allocation10 + $0xe98] sm:$0xff]  ;;  %v2450_v59 = vld [vmem:[#allocation10 + $0xf68] sm:$0xff] }
 0xb75   :  { %3719 = vmatpush1.bf16.msra.mxu1 %v3718_v22  ;;  %v2298_v22 = vld [vmem:[#allocation10 + $0xd80] sm:$0xff] }
 0xb76   :  { %3721 = vmatprep.subr.bf16.mxu1 %v3720_v23  ;;  %v2300_v23 = vld [vmem:[#allocation10 + $0xd90] sm:$0xff] }
 0xb77   :  { %v3762_v26 = vpack.c.bf16 %v2300_v23, %v2298_v22  ;;  %v2428_v22 = vld [vmem:[#allocation10 + $0xeb8] sm:$0xff] }
 0xb79   :  { %3723 = vmatpush1.bf16.msra.mxu1 %v3722_v28  ;;  %v2302_v28 = vld [vmem:[#allocation10 + $0xda0] sm:$0xff] }
 0xb7a   :  { %3725 = vmatprep.subr.bf16.mxu1 %v3724_v29  ;;  %v2304_v29 = vld [vmem:[#allocation10 + $0xdb0] sm:$0xff] }
 0xb7b   :  { %v3766_v30 = vpack.c.bf16 %v2304_v29, %v2302_v28  ;;  %v2432_v28 = vld [vmem:[#allocation10 + $0xed8] sm:$0xff] }
 0xb7d   :  { %3727 = vmatpush1.bf16.msra.mxu1 %v3726_v34 }
 0xb7e   :  { %3729 = vmatprep.subr.bf16.mxu1 %v3728_v35 }
 0xb81   :  { %3731 = vmatpush1.bf16.msra.mxu1 %v3730_v42 }
 0xb82   :  { %3733 = vmatprep.subr.bf16.mxu1 %v3732_v43 }
 0xb85   :  { %3735 = vmatpush1.bf16.msra.mxu1 %v3734_v48  ;;  %v2308_v48 = vld [vmem:[#allocation10 + $0xdd0] sm:$0xff] }
 0xb86   :  { %3737 = vmatprep.subr.bf16.mxu1 %v3736_v49  ;;  %v3770_v49 = vpack.c.bf16 %v2308_v48, %v2306_v47  ;;  %v2442_v47 = vld [vmem:[#allocation10 + $0xf28] sm:$0xff]  ;;  %v2444_v48 = vld [vmem:[#allocation10 + $0xf38] sm:$0xff] }
 0xb87   :  { %v3812_v50 = vpack.c.bf16 %v2444_v48, %v2442_v47 }
 0xb89   :  { %3739 = vmatpush1.bf16.msra.mxu1 %v3738_v54  ;;  %v2312_v54 = vld [vmem:[#allocation10 + $0xdf0] sm:$0xff] }
 0xb8a   :  { %3741 = vmatprep.subr.bf16.mxu1 %v3740_v55  ;;  %v3774_v55 = vpack.c.bf16 %v2312_v54, %v2310_v53  ;;  %v2446_v53 = vld [vmem:[#allocation10 + $0xf48] sm:$0xff]  ;;  %v2448_v54 = vld [vmem:[#allocation10 + $0xf58] sm:$0xff] }
 0xb8b   :  { %v3816_v56 = vpack.c.bf16 %v2448_v54, %v2446_v53 }
 0xb8d   :  { %3743 = vmatpush1.bf16.msra.mxu1 %v3742_v60  ;;  %v2407_v60 = vld [vmem:[#allocation10 + $0xe10] sm:$0xff] }
 0xb8e   :  { %3745 = vmatprep.subr.bf16.mxu1 %v3744_v61  ;;  %v2410_v61 = vld [vmem:[#allocation10 + $0xe28] sm:$0xff]  ;;  %v3778_v63 = vpack.c.bf16 %v2407_v60, %v2405_v58  ;;  %v2447_v58 = vld [vmem:[#allocation10 + $0xf50] sm:$0xff]  ;;  %v2452_v60 = vld [vmem:[#allocation10 + $0xf78] sm:$0xff] }
 0xb8f   :  { %v3780_v0 = vpack.c.bf16 %v2412_v62, %v2410_v61  ;;  %v3818_v61 = vpack.c.bf16 %v2447_v58, %v2445_v57  ;;  %v3820_v62 = vpack.c.bf16 %v2452_v60, %v2450_v59 }
 0xb91   :  { %3747 = vmatpush1.bf16.msra.mxu1 %v3746_v2  ;;  %v2411_v2 = vld [vmem:[#allocation10 + $0xe30] sm:$0xff] }
 0xb92   :  { %3749 = vmatprep.subr.bf16.mxu1 %v3748_v3  ;;  %v2414_v3 = vld [vmem:[#allocation10 + $0xe48] sm:$0xff]  ;;  %v3782_v5 = vpack.c.bf16 %v2411_v2, %v2409_v1  ;;  %v2456_v2 = vld [vmem:[#allocation10 + $0xf98] sm:$0xff] }
 0xb93   :  { %v3784_v6 = vpack.c.bf16 %v2416_v4, %v2414_v3  ;;  %v2454_v1 = vld [vmem:[#allocation10 + $0xf88] sm:$0xff] }
 0xb94   :  { %v3824_v4 = vpack.c.bf16 %v2456_v2, %v2454_v1 }
 0xb95   :  { %3751 = vmatpush1.bf16.msra.mxu1 %v3750_v8  ;;  %v2415_v8 = vld [vmem:[#allocation10 + $0xe50] sm:$0xff] }
 0xb96   :  { %3753 = vmatprep.subr.bf16.mxu1 %v3752_v9  ;;  %v2418_v9 = vld [vmem:[#allocation10 + $0xe68] sm:$0xff]  ;;  %v3786_v11 = vpack.c.bf16 %v2415_v8, %v2413_v7  ;;  %v2460_v8 = vld [vmem:[#allocation10 + $0xfb8] sm:$0xff] }
 0xb97   :  { %v3788_v12 = vpack.c.bf16 %v2420_v10, %v2418_v9  ;;  %v2458_v7 = vld [vmem:[#allocation10 + $0xfa8] sm:$0xff] }
 0xb98   :  { %v3828_v10 = vpack.c.bf16 %v2460_v8, %v2458_v7 }
 0xb99   :  { %3755 = vmatpush1.bf16.msra.mxu1 %v3754_v14  ;;  %v2419_v14 = vld [vmem:[#allocation10 + $0xe70] sm:$0xff] }
 0xb9a   :  { %3757 = vmatprep.subr.bf16.mxu1 %v3756_v15  ;;  %v2422_v15 = vld [vmem:[#allocation10 + $0xe88] sm:$0xff]  ;;  %v3790_v17 = vpack.c.bf16 %v2419_v14, %v2417_v13 }
 0xb9b   :  { %v3792_v18 = vpack.c.bf16 %v2424_v16, %v2422_v15  ;;  %v2160_v14 = vld [vmem:[#allocation11 + $0xa] sm:$0x3] }
 0xb9c   :  { %v2165_v15 = vrot.slane %v2160_v14, %v4225_v37  ;;  %v2169_v16 = vrot.slane %v2160_v14, %v4227_v39 }
 0xb9d   :  { %3759 = vmatpush1.bf16.msra.mxu1 %v3758_v20  ;;  %v2423_v20 = vld [vmem:[#allocation10 + $0xe90] sm:$0xff] }
 0xb9e   :  { %3761 = vmatprep.subr.bf16.mxu1 %v3760_v21  ;;  %v2426_v21 = vld [vmem:[#allocation10 + $0xea8] sm:$0xff]  ;;  %v3794_v23 = vpack.c.bf16 %v2423_v20, %v2421_v19 }
 0xb9f   :  { %v3796_v24 = vpack.c.bf16 %v2428_v22, %v2426_v21 }
 0xba1   :  { %3763 = vmatpush1.bf16.msra.mxu1 %v3762_v26  ;;  %v2427_v26 = vld [vmem:[#allocation10 + $0xeb0] sm:$0xff] }
 0xba2   :  { %3765 = vmatprep.subr.bf16.mxu1 %v3764_v27  ;;  %v2430_v27 = vld [vmem:[#allocation10 + $0xec8] sm:$0xff]  ;;  %v3798_v29 = vpack.c.bf16 %v2427_v26, %v2425_v25  ;;  %v2464_v26 = vld [vmem:[#allocation10 + $0xfd8] sm:$0xff] }
 0xba3   :  { %v2462_v25 = vld [vmem:[#allocation10 + $0xfc8] sm:$0xff] }
 0xba5   :  { %3767 = vmatpush1.bf16.msra.mxu1 %v3766_v30  ;;  %v3800_v30 = vpack.c.bf16 %v2432_v28, %v2430_v27  ;;  %v3832_v27 = vpack.c.bf16 %v2464_v26, %v2462_v25  ;;  %v2461_v28 = vld [vmem:[#allocation10 + $0xfc0] sm:$0xff] }
 0xba6   :  { %3769 = vmatprep.subr.bf16.mxu1 %v3768_v46  ;;  %v2439_v46 = vld [vmem:[#allocation10 + $0xf10] sm:$0xff] }
 0xba9   :  { %3771 = vmatpush1.bf16.msra.mxu1 %v3770_v49  ;;  %v3810_v49 = vpack.c.bf16 %v2439_v46, %v2437_v45 }
 0xbaa   :  { %3773 = vmatprep.subr.bf16.mxu1 %v3772_v52  ;;  %v2443_v52 = vld [vmem:[#allocation10 + $0xf30] sm:$0xff] }
 0xbad   :  { %3775 = vmatpush1.bf16.msra.mxu1 %v3774_v55  ;;  %v3814_v55 = vpack.c.bf16 %v2443_v52, %v2441_v51 }
 0xc43   :  { %v2083_v34 = vpop.f32.mrb[26].mxu1 }
 0xc44   :  { %v2084_v35 = vadd.f32 %v2083_v34, %v2010_v32  ;;  %v2085_v36 = vpop.f32.mrb[27].mxu1  ;;  %v2431_v32 = vld [vmem:[#allocation10 + $0xed0] sm:$0xff]  ;;  %v2436_v34 = vld [vmem:[#allocation10 + $0xef8] sm:$0xff] }
 0xc45   :  { %v2086_v38 = vadd.f32 %v2085_v36, %v2014_v33  ;;  %v2434_v33 = vld [vmem:[#allocation10 + $0xee8] sm:$0xff] }
 0xc46   :  { %v2090_v40 = vmul.f32 0.01, %v2084_v35  ;;  %vm2088_vm11 = vcmp.gt.f32.partialorder %v2084_v35, 0.0  ;;  %v3804_v36 = vpack.c.bf16 %v2436_v34, %v2434_v33  ;;  %v2465_v34 = vld [vmem:[#allocation10 + $0xfe0] sm:$0xff] }
 0xc47   :  { %v2091_v41 = vmul.f32 0.01, %v2086_v38  ;;  %vm2089_vm12 = vcmp.gt.f32.partialorder %v2086_v38, 0.0 }
 0xc48   :  { %v2092_v43 = vsel %vm2088_vm11, %v2084_v35, %v2090_v40  ;;  %v3802_v35 = vpack.c.bf16 %v2431_v32, %v2429_v31  ;;  %v2435_v40 = vld [vmem:[#allocation10 + $0xef0] sm:$0xff]  ;;  %v2466_v31 = vld [vmem:[#allocation10 + $0xfe8] sm:$0xff]  ;;  %v2468_v32 = vld [vmem:[#allocation10 + $0xff8] sm:$0xff] }
 0xc49   :  { %v2093_v42 = vsel %vm2089_vm12, %v2086_v38, %v2091_v41  ;;  %v2433_v38 = vld [vmem:[#allocation10 + $0xee0] sm:$0xff]  ;;  %v2438_v41 = vld [vmem:[#allocation10 + $0xf08] sm:$0xff]  ;;  %v3836_v33 = vpack.c.bf16 %v2468_v32, %v2466_v31 }
 0xc4a   :  { %2236 = vmatprep.mubr.f32.mxu0 %v2093_v42  ;;  %v2440_v42 = vld [vmem:[#allocation10 + $0xf18] sm:$0xff] }
 0xc4b   :  { %2237 = vmatmul.mubr.f32.vlgmr.msra.gmra.mrb[28].mxu0 %v2092_v43  ;;  %v3806_v43 = vpack.c.bf16 %v2435_v40, %v2433_v38  ;;  %v3808_v44 = vpack.c.bf16 %v2440_v42, %v2438_v41  ;;  %v2315_v38 = vld [vmem:[#allocation11 + $0xc] sm:$0x3] }
 0xc4c   :  { %3779 = vmatpush1.bf16.msra.mxu0 %v3778_v63  ;;  %v2449_v63 = vld [vmem:[#allocation10 + $0xf60] sm:$0xff]  ;;  %v2320_v40 = vrot.slane %v2315_v38, %v4225_v37  ;;  %v2324_v41 = vrot.slane %v2315_v38, %v4227_v39 }
 0xc4d   :  { %3781 = vmatprep.subr.bf16.mxu0 %v3780_v0  ;;  %v2451_v0 = vld [vmem:[#allocation10 + $0xf70] sm:$0xff] }
 0xc4e   :  { %v3822_v3 = vpack.c.bf16 %v2451_v0, %v2449_v63 }
 0xc50   :  { %3783 = vmatpush1.bf16.msra.mxu0 %v3782_v5  ;;  %v2453_v5 = vld [vmem:[#allocation10 + $0xf80] sm:$0xff] }
 0xc51   :  { %3785 = vmatprep.subr.bf16.mxu0 %v3784_v6  ;;  %v2455_v6 = vld [vmem:[#allocation10 + $0xf90] sm:$0xff] }
 0xc52   :  { %v3826_v9 = vpack.c.bf16 %v2455_v6, %v2453_v5 }
 0xc54   :  { %3787 = vmatpush1.bf16.msra.mxu0 %v3786_v11  ;;  %v2457_v11 = vld [vmem:[#allocation10 + $0xfa0] sm:$0xff] }
 0xc55   :  { %3789 = vmatprep.subr.bf16.mxu0 %v3788_v12  ;;  %v2459_v12 = vld [vmem:[#allocation10 + $0xfb0] sm:$0xff] }
 0xc56   :  { %v3830_v13 = vpack.c.bf16 %v2459_v12, %v2457_v11 }
 0xc58   :  { %3791 = vmatpush1.bf16.msra.mxu0 %v3790_v17 }
 0xc59   :  { %3793 = vmatprep.subr.bf16.mxu0 %v3792_v18 }
 0xc5c   :  { %3795 = vmatpush1.bf16.msra.mxu0 %v3794_v23 }
 0xc5d   :  { %3797 = vmatprep.subr.bf16.mxu0 %v3796_v24 }
 0xc60   :  { %3799 = vmatpush1.bf16.msra.mxu0 %v3798_v29  ;;  %v2463_v29 = vld [vmem:[#allocation10 + $0xfd0] sm:$0xff] }
 0xc61   :  { %3801 = vmatprep.subr.bf16.mxu0 %v3800_v30  ;;  %v3834_v30 = vpack.c.bf16 %v2463_v29, %v2461_v28 }
 0xc64   :  { %3803 = vmatpush1.bf16.msra.mxu0 %v3802_v35  ;;  %v2467_v35 = vld [vmem:[#allocation10 + $0xff0] sm:$0xff] }
 0xc65   :  { %3805 = vmatprep.subr.bf16.mxu0 %v3804_v36  ;;  %v3838_v36 = vpack.c.bf16 %v2467_v35, %v2465_v34 }
 0xc68   :  { %3807 = vmatpush1.bf16.msra.mxu0 %v3806_v43 }
 0xc69   :  { %3809 = vmatprep.subr.bf16.mxu0 %v3808_v44 }
 0xc6c   :  { %3811 = vmatpush1.bf16.msra.mxu0 %v3810_v49 }
 0xc6d   :  { %3813 = vmatprep.subr.bf16.mxu0 %v3812_v50  ;;  %v2470_v50 = vld [vmem:[#allocation11 + $0xe] sm:$0x3] }
 0xc6e   :  { %v2475_v51 = vrot.slane %v2470_v50, %v4225_v37  ;;  %v2479_v52 = vrot.slane %v2470_v50, %v4227_v39 }
 0xc70   :  { %3815 = vmatpush1.bf16.msra.mxu0 %v3814_v55 }
 0xc71   :  { %3817 = vmatprep.subr.bf16.mxu0 %v3816_v56 }
 0xc74   :  { %3819 = vmatpush1.bf16.msra.mxu0 %v3818_v61 }
 0xc75   :  { %3821 = vmatprep.subr.bf16.mxu0 %v3820_v62 }
 0xc78   :  { %3823 = vmatpush1.bf16.msra.mxu0 %v3822_v3 }
 0xc79   :  { %3825 = vmatprep.subr.bf16.mxu0 %v3824_v4 }
 0xc7c   :  { %3827 = vmatpush1.bf16.msra.mxu0 %v3826_v9 }
 0xc7d   :  { %3829 = vmatprep.subr.bf16.mxu0 %v3828_v10 }
 0xc80   :  { %3831 = vmatpush1.bf16.msra.mxu0 %v3830_v13 }
 0xc81   :  { %3833 = vmatprep.subr.bf16.mxu0 %v3832_v27 }
 0xc84   :  { %3835 = vmatpush1.bf16.msra.mxu0 %v3834_v30 }
 0xc85   :  { %3837 = vmatprep.subr.bf16.mxu0 %v3836_v33 }
 0xc88   :  { %3839 = vmatpush1.bf16.msra.mxu0 %v3838_v36 }
 0xd1e   :  { %v2238_v17 = vpop.f32.mrb[28].mxu0 }
 0xd1f   :  { %v2239_v18 = vadd.f32 %v2238_v17, %v2165_v15  ;;  %v2240_v19 = vpop.f32.mrb[29].mxu0 }
 0xd20   :  { %v2241_v20 = vadd.f32 %v2240_v19, %v2169_v16 }
 0xd21   :  { %v2245_v21 = vmul.f32 0.01, %v2239_v18  ;;  %vm2243_vm13 = vcmp.gt.f32.partialorder %v2239_v18, 0.0 }
 0xd22   :  { %v2246_v22 = vmul.f32 0.01, %v2241_v20  ;;  %vm2244_vm14 = vcmp.gt.f32.partialorder %v2241_v20, 0.0 }
 0xd23   :  { %v2247_v24 = vsel %vm2243_vm13, %v2239_v18, %v2245_v21 }
 0xd24   :  { %v2248_v23 = vsel %vm2244_vm14, %v2241_v20, %v2246_v22 }
 0xd25   :  { %2391 = vmatprep.mubr.f32.mxu1 %v2248_v23 }
 0xd26   :  { %2392 = vmatmul.mubr.f32.vlgmr.msra.gmra.mrb[28].mxu1 %v2247_v24 }
 0xdf9   :  { %v2393_v42 = vpop.f32.mrb[28].mxu1 }
 0xdfa   :  { %v2394_v43 = vadd.f32 %v2393_v42, %v2320_v40  ;;  %v2395_v44 = vpop.f32.mrb[29].mxu1 }
 0xdfb   :  { %v2396_v45 = vadd.f32 %v2395_v44, %v2324_v41 }
 0xdfc   :  { %v2400_v46 = vmul.f32 0.01, %v2394_v43  ;;  %vm2398_vm15 = vcmp.gt.f32.partialorder %v2394_v43, 0.0 }
 0xdfd   :  { %v2401_v47 = vmul.f32 0.01, %v2396_v45  ;;  %vm2399_vm1 = vcmp.gt.f32.partialorder %v2396_v45, 0.0 }
 0xdfe   :  { %v2402_v49 = vsel %vm2398_vm15, %v2394_v43, %v2400_v46 }
 0xdff   :  { %v2403_v48 = vsel %vm2399_vm1, %v2396_v45, %v2401_v47 }
 0xe00   :  { %2546 = vmatprep.mubr.f32.mxu0 %v2403_v48 }
 0xe01   :  { %2547 = vmatmul.mubr.f32.vlgmr.msra.gmra.mrb[30].mxu0 %v2402_v49 }
 0xed4   :  { %v2548_v53 = vpop.f32.mrb[30].mxu0 }
 0xed5   :  { %v2549_v54 = vadd.f32 %v2548_v53, %v2475_v51  ;;  %v2550_v55 = vpop.f32.mrb[31].mxu0 }
 0xed6   :  { %v2551_v56 = vadd.f32 %v2550_v55, %v2479_v52 }
 0xed7   :  { %vm2553_vm0 = vcmp.gt.f32.partialorder %v2549_v54, 0.0  ;;  %v2555_v57 = vmul.f32 0.01, %v2549_v54 }
 0xed8   :  { %vm2554_vm2 = vcmp.gt.f32.partialorder %v2551_v56, 0.0  ;;  %v2556_v58 = vmul.f32 0.01, %v2551_v56 }
 0xed9   :  { %v2557_v59 = vsel %vm2553_vm0, %v2549_v54, %v2555_v57 }
 0xeda   :  { %v2558_v60 = vsel %vm2554_vm2, %v2551_v56, %v2556_v58 }
 0xedb   :  { %v2559_v61 = vadd.f32 %v2558_v60, %v2557_v59 }
 0xedd   :  { %2561 = vst.msk [vmem:[#allocation13] sm:$0x3] %vm2560_vm3, %v2559_v61 }
 0xede   :  { %4010 = shalt.err (!%p4007_p10)
}
 0xedf   :  { %s4011_s3 = scalar_lea.hbm %s4265_s8, 32 }
 0xee0   :  { %p4012_p11 = scmp.ne.s32.totalorder %s4265_s8, %s4011_s3  ;;  %p4015_p12 = scmp.lt.u32.totalorder %s4011_s3, %s4265_s8 }
 0xee2   :  { %p4017_p13 = pnand %p4015_p12, %p4012_p11 }
 0xee4   :  { %4020 = shalt.err (!%p4017_p13)
}
 0xee5   :  { %2571 = dma.vmem_to_hbm [thread:$0]  %s2569_s22, 32, %s4265_s8, [#allocation4]  }
 0xee6   :  { %4029 = dma.done.wait [#allocation4], 32  }
 0xee7   :  { %4030 = vsyncadd [#allocation4], 4294967264 }
 0xee8   :  { %2575 = vsyncpa [#allocation3], 1 }
 0xee9   :  { %2576 = vsyncpa [#allocation6], 1 }
 0xeea   :  { %2577 = vsyncpa [#allocation9], 1 }
 0xeeb   :  { %2578 = vsyncpa [#allocation12], 1 }
 0xeec   :  { %2579 = vsyncpa [#allocation4], 1 }

</bundles_post_ra>
